<compile_context>
chip_gen: v7x
topology: tpu7x:2x2x1
jax: 0.10.0
libtpu: 0.0.40
codegen_flags: <defaults>
</compile_context>

<pallas_src>
import jax
import jax.numpy as jnp
from jax.experimental import pallas as pl
from jax.experimental.pallas import tpu as pltpu

CHANNELS = 1
IMG_SIZE = 28
N_CLASSES = 1

_MAX_NB = 64  # batch-tile cap: keeps per-step activations well inside v7x's 64 MiB VMEM
_BLOCK_CHANNELS = [(CHANNELS, 16, False), (16, 32, True), (32, 64, True), (64, 128, True)]


def _spatial_sizes(h):
    """Per block: (H_in, H_in padded-to-even (>= H_in+2), H_out)."""
    sizes = []
    for _ in range(len(_BLOCK_CHANNELS)):
        ho = (h - 1) // 2 + 1
        hp = h + 2 + (h % 2)
        sizes.append((h, hp, ho))
        h = ho
    return sizes


_SIZES = _spatial_sizes(IMG_SIZE)  # [(28,30,14), (14,16,7), (7,10,4), (4,6,2)]


def _round_up(x, m):
    return ((x + m - 1) // m) * m


def _pick_batch_tile(n):
    """Batch tile: multiple of 8, <= _MAX_NB, and >= 2 grid steps when possible (v7x)."""
    n8 = _round_up(n, 8)
    if n8 <= 16:
        return n8
    return min(_MAX_NB, _round_up((n8 + 1) // 2, 8))


# ------------------------------ Pallas kernel ------------------------------

def _conv_epilogue(acc, epi):
    """acc: (M, Cout) f32 conv result; epi: (3, Cout) f32 = [bias; scale; shift]."""
    acc = acc + epi[0:1, :]                         # conv bias
    acc = jnp.where(acc > 0.0, acc, 0.2 * acc)      # LeakyReLU(0.2)
    acc = acc * epi[1:2, :] + epi[2:3, :]           # eval-mode BN (after activation)
    return acc.astype(jnp.bfloat16)


def _conv_block(x6, w, epi, ho, wo):
    """x6: (Hp/2, 2, Wp/2, 2, NB, Cin) bf16 padded activation (even/odd split).

    Conv2d(k=3, s=2, p=1) as one im2col matmul: lane-concat the 9 tap patches
    into (M, 9*Cin) and multiply by the (9*Cin, Cout) bf16 weight (f32 acc).
    Returns (ho, wo, NB, Cout) bf16.
    """
    nb, cin = x6.shape[4], x6.shape[5]
    m = ho * wo * nb
    taps = []
    for ki in range(3):
        qi, ri = divmod(ki, 2)
        for kj in range(3):
            qj, rj = divmod(kj, 2)
            # Tap (ki, kj): contiguous leading-dim slice (no strided access).
            taps.append(x6[qi:qi + ho, ri, qj:qj + wo, rj, :, :].reshape(m, cin))
    slab = jnp.concatenate(taps, axis=-1)                               # (M, 9*Cin)
    acc = jnp.dot(slab, w, preferred_element_type=jnp.float32)          # single wide-K MXU matmul
    return _conv_epilogue(acc, epi).reshape(ho, wo, nb, w.shape[-1])


def _pad6(a, hp, wp):
    """(ho, wo, NB, C) -> zero-padded (hp, wp, NB, C) (pad 1 top/left) viewed 6D."""
    ho, wo, nb, c = a.shape
    a = jnp.concatenate(
        [jnp.zeros((ho, 1, nb, c), a.dtype), a,
         jnp.zeros((ho, wp - wo - 1, nb, c), a.dtype)], axis=1)
    a = jnp.concatenate(
        [jnp.zeros((1, wp, nb, c), a.dtype), a,
         jnp.zeros((hp - ho - 1, wp, nb, c), a.dtype)], axis=0)
    return a.reshape(hp // 2, 2, wp // 2, 2, nb, c)


def _disc_kernel(x_ref, w1, e1, w2, e2, w3, e3, w4, e4, wh_ref, bh_ref, out_ref):
    (_, _, o1), (_, p2_, o2), (_, p3_, o3), (_, p4_, o4) = _SIZES
    nb = x_ref.shape[2]

    # Block 1: im2col slab (o1, o1, NB, 9*C) comes pre-built from the wrapper.
    m1 = o1 * o1 * nb
    acc = jnp.dot(x_ref[...].reshape(m1, 9 * CHANNELS), w1[...],
                  preferred_element_type=jnp.float32)
    a = _conv_epilogue(acc, e1[...]).reshape(o1, o1, nb, w1.shape[-1])

    a = _conv_block(_pad6(a, p2_, p2_), w2[...], e2[...], o2, o2)
    a = _conv_block(_pad6(a, p3_, p3_), w3[...], e3[...], o3, o3)
    a = _conv_block(_pad6(a, p4_, p4_), w4[...], e4[...], o4, o4)
    # a: (o4, o4, NB, 128) bf16

    # Heads: lane-concat the 4 spatial positions -> (NB, 512), one K=512 matmul.
    feats = jnp.concatenate([a[i, j] for i in range(o4) for j in range(o4)], axis=-1)
    h = jnp.dot(feats, wh_ref[...], preferred_element_type=jnp.float32) + bh_ref[...]

    validity = 1.0 / (1.0 + jnp.exp(-h[:, 0:1]))                 # Sigmoid
    logits = h[:, 1:]
    logits = logits - jnp.max(logits, axis=-1, keepdims=True)    # Softmax(dim=1)
    e = jnp.exp(logits)
    label = e / jnp.sum(e, axis=-1, keepdims=True)
    out_ref[...] = jnp.concatenate([validity, label], axis=-1)   # single (NB, 1+n_classes) store


# ------------------------------ host wrapper -------------------------------

def _const_spec(shape):
    zero = (0,) * len(shape)
    return pl.BlockSpec(shape, lambda i, _z=zero: _z)


def discriminator_forward(params, img):
    """img: (N, 1, 28, 28) float32, PyTorch NCHW convention."""
    n = img.shape[0]
    nb = _pick_batch_tile(n)
    npad = _round_up(n, nb)
    h1, _, o1 = _SIZES[0]

    x = img.astype(jnp.float32)
    if npad != n:
        x = jnp.concatenate([x, jnp.zeros((npad - n,) + x.shape[1:], jnp.float32)], 0)

    # First-layer im2col in the wrapper (layout plumbing only, no FLOPs):
    # (npad, C, 28, 28) -> (o1, o1, npad, 9*C) bf16, tap order ki-major / kj-minor.
    xp = jnp.pad(x, ((0, 0), (0, 0), (1, 1), (1, 1)))
    taps = [xp[:, :, ki:ki + 2 * o1:2, kj:kj + 2 * o1:2]
            for ki in range(3) for kj in range(3)]               # each (npad, C, o1, o1)
    slab = jnp.stack(taps, axis=1)                               # (npad, 9, C, o1, o1)
    slab = jnp.transpose(slab, (3, 4, 0, 1, 2)).reshape(o1, o1, npad, 9 * CHANNELS)
    slab = slab.astype(jnp.bfloat16)

    w_args = [slab]
    in_specs = [pl.BlockSpec((o1, o1, nb, 9 * CHANNELS), lambda i: (0, 0, i, 0))]
    for (wk, epi) in params["blocks"]:
        w_args += [wk, epi]
        in_specs += [_const_spec(wk.shape), _const_spec(epi.shape)]   # VMEM-resident
    w_args += [params["wh"], params["bh"]]
    in_specs += [_const_spec(params["wh"].shape), _const_spec(params["bh"].shape)]

    out = pl.pallas_call(
        _disc_kernel,
        out_shape=jax.ShapeDtypeStruct((npad, 1 + N_CLASSES), jnp.float32),
        grid=(npad // nb,),
        in_specs=in_specs,
        out_specs=pl.BlockSpec((nb, 1 + N_CLASSES), lambda i: (i, 0)),
        compiler_params=pltpu.CompilerParams(
            dimension_semantics=("parallel",),
            vmem_limit_bytes=32 * 1024 * 1024),
    )(*w_args)
    return out[:n, 0:1], out[:n, 1:1 + N_CLASSES]


# ------------------------------ parameters ---------------------------------

def init_params(key):
    """Synthetic PyTorch-style (raw) parameters for a freshly built module."""
    blocks = []
    for (cin, cout, bn) in _BLOCK_CHANNELS:
        key, k1, k2 = jax.random.split(key, 3)
        bound = 1.0 / ((cin * 9) ** 0.5)
        w = jax.random.uniform(k1, (cout, cin, 3, 3), jnp.float32, -bound, bound)
        b = jax.random.uniform(k2, (cout,), jnp.float32, -bound, bound)
        if bn:
            # gamma, beta, running_mean, running_var, eps (BatchNorm2d(out, 0.8) -> eps=0.8)
            bn_p = (jnp.ones((cout,), jnp.float32), jnp.zeros((cout,), jnp.float32),
                    jnp.zeros((cout,), jnp.float32), jnp.ones((cout,), jnp.float32), 0.8)
        else:
            bn_p = None
        blocks.append((w, b, bn_p))

    feat = _BLOCK_CHANNELS[-1][1] * _SIZES[-1][2] ** 2   # 128 * 2 * 2 = 512
    key, k1, k2, k3, k4 = jax.random.split(key, 5)
    bound = 1.0 / (feat ** 0.5)
    return {
        "blocks": blocks,
        "w_adv": jax.random.uniform(k1, (1, feat), jnp.float32, -bound, bound),
        "b_adv": jax.random.uniform(k2, (1,), jnp.float32, -bound, bound),
        "w_aux": jax.random.uniform(k3, (N_CLASSES, feat), jnp.float32, -bound, bound),
        "b_aux": jax.random.uniform(k4, (N_CLASSES,), jnp.float32, -bound, bound),
    }


def pack_params(raw):
    """Re-layout parameters for the kernel (bf16 matmul weights, f32 epilogue)."""
    ds = _SIZES[-1][2]
    c_last = _BLOCK_CHANNELS[-1][1]
    blocks = []
    for (w, b, bn) in raw["blocks"]:
        cout, cin = w.shape[0], w.shape[1]
        if bn is not None:
            gamma, beta, mean, var, eps = bn
            scale = gamma / jnp.sqrt(var + eps)
            shift = beta - mean * scale
        else:
            scale = jnp.ones((cout,), jnp.float32)
            shift = jnp.zeros((cout,), jnp.float32)
        # (cout, cin, 3, 3) -> rows ordered (ki, kj, cin) to match the kernel's slab.
        w_k = jnp.transpose(w, (2, 3, 1, 0)).reshape(9 * cin, cout).astype(jnp.bfloat16)
        # BN applied after LeakyReLU (y*scale + shift): valid for any gamma sign.
        epi = jnp.stack([b, scale, shift]).astype(jnp.float32)       # (3, cout)
        blocks.append((w_k, epi))

    # Head weights: permute rows from PyTorch (c, oh, ow) flatten order to the
    # kernel's per-spatial-position concat order and merge adv/aux into one matrix.
    wa = jnp.transpose(raw["w_adv"].reshape(1, c_last, ds, ds),
                       (2, 3, 1, 0)).reshape(ds * ds * c_last, 1)
    wx = jnp.transpose(raw["w_aux"].reshape(N_CLASSES, c_last, ds, ds),
                       (2, 3, 1, 0)).reshape(ds * ds * c_last, N_CLASSES)
    wh = jnp.concatenate([wa, wx], axis=-1).astype(jnp.bfloat16)      # (512, 1+n_classes)
    bh = jnp.concatenate([raw["b_adv"], raw["b_aux"]]).reshape(1, 1 + N_CLASSES)
    return {"blocks": blocks, "wh": wh, "bh": bh.astype(jnp.float32)}


# ------------------------------ pure-JAX ref --------------------------------

def _reference_forward(raw, img):
    hi = jax.lax.Precision.HIGHEST
    x = img.astype(jnp.float32)
    for (w, b, bn) in raw["blocks"]:
        x = jax.lax.conv_general_dilated(
            x, w, window_strides=(2, 2), padding=((1, 1), (1, 1)),
            dimension_numbers=("NCHW", "OIHW", "NCHW"), precision=hi)
        x = x + b.reshape(1, -1, 1, 1)
        x = jnp.where(x > 0, x, 0.2 * x)
        if bn is not None:
            gamma, beta, mean, var, eps = bn
            inv = gamma / jnp.sqrt(var + eps)
            x = (x - mean.reshape(1, -1, 1, 1)) * inv.reshape(1, -1, 1, 1) + beta.reshape(1, -1, 1, 1)
    feat = x.reshape(x.shape[0], -1)
    v = jnp.dot(feat, raw["w_adv"].T, precision=hi) + raw["b_adv"]
    l = jnp.dot(feat, raw["w_aux"].T, precision=hi) + raw["b_aux"]
    return 1.0 / (1.0 + jnp.exp(-v)), jax.nn.softmax(l, axis=1)


# ----------------------------------- main -----------------------------------

if __name__ == "__main__":
    key = jax.random.PRNGKey(0)
    kp, kx = jax.random.split(key)
    raw = init_params(kp)
    params = pack_params(raw)
    img = jax.random.normal(kx, (2, CHANNELS, IMG_SIZE, IMG_SIZE), jnp.float32)

    fwd = jax.jit(discriminator_forward)
    validity, label = fwd(params, img)
    jax.block_until_ready((validity, label))

    assert validity.shape == (2, 1) and label.shape == (2, N_CLASSES)

    v_ref, l_ref = jax.jit(_reference_forward)(raw, img)
    # bf16 matmul operands -> loosen tolerance vs. the f32 HIGHEST reference.
    assert bool(jnp.all(jnp.abs(validity - v_ref) < 1e-2))
    assert bool(jnp.all(jnp.abs(label - l_ref) < 1e-2))
    assert bool(jnp.all((validity > 0.0) & (validity < 1.0)))
    assert bool(jnp.allclose(jnp.sum(label, axis=-1), 1.0, atol=1e-5))
    print("KERNEL_OK")
</pallas_src>

<mosaic_0001>
module attributes {stable_mosaic.version = 11 : i64} {
  func.func @_disc_kernel(%arg0: i32, %arg1: memref<14x14x8x9xbf16, #tpu.memory_space<vmem>>, %arg2: memref<9x16xbf16, #tpu.memory_space<vmem>>, %arg3: memref<3x16xf32, #tpu.memory_space<vmem>>, %arg4: memref<144x32xbf16, #tpu.memory_space<vmem>>, %arg5: memref<3x32xf32, #tpu.memory_space<vmem>>, %arg6: memref<288x64xbf16, #tpu.memory_space<vmem>>, %arg7: memref<3x64xf32, #tpu.memory_space<vmem>>, %arg8: memref<576x128xbf16, #tpu.memory_space<vmem>>, %arg9: memref<3x128xf32, #tpu.memory_space<vmem>>, %arg10: memref<512x2xbf16, #tpu.memory_space<vmem>>, %arg11: memref<1x2xf32, #tpu.memory_space<vmem>>, %arg12: memref<8x2xf32, #tpu.memory_space<vmem>>) attributes {dimension_semantics = [#tpu.dimension_semantics<parallel>], iteration_bounds = array<i64: 1>, scalar_prefetch = 0 : i64, scratch_operands = 0 : i64, tpu.core_type = #tpu.core_type<tc>, window_params = [{transform_indices = @transform_0, window_bounds = array<i64: 14, 14, 8, 9>}, {pipeline_mode = #tpu.pipeline_mode<synchronous>, transform_indices = @transform_1, window_bounds = array<i64: 9, 16>}, {pipeline_mode = #tpu.pipeline_mode<synchronous>, transform_indices = @transform_2, window_bounds = array<i64: 3, 16>}, {pipeline_mode = #tpu.pipeline_mode<synchronous>, transform_indices = @transform_3, window_bounds = array<i64: 144, 32>}, {pipeline_mode = #tpu.pipeline_mode<synchronous>, transform_indices = @transform_4, window_bounds = array<i64: 3, 32>}, {pipeline_mode = #tpu.pipeline_mode<synchronous>, transform_indices = @transform_5, window_bounds = array<i64: 288, 64>}, {pipeline_mode = #tpu.pipeline_mode<synchronous>, transform_indices = @transform_6, window_bounds = array<i64: 3, 64>}, {pipeline_mode = #tpu.pipeline_mode<synchronous>, transform_indices = @transform_7, window_bounds = array<i64: 576, 128>}, {pipeline_mode = #tpu.pipeline_mode<synchronous>, transform_indices = @transform_8, window_bounds = array<i64: 3, 128>}, {pipeline_mode = #tpu.pipeline_mode<synchronous>, transform_indices = @transform_9, window_bounds = array<i64: 512, 2>}, {pipeline_mode = #tpu.pipeline_mode<synchronous>, transform_indices = @transform_10, window_bounds = array<i64: 1, 2>}, {transform_indices = @transform_11, window_bounds = array<i64: 8, 2>}]} {
    %c0 = arith.constant 0 : index
    %c0_0 = arith.constant 0 : index
    %c0_1 = arith.constant 0 : index
    %c0_2 = arith.constant 0 : index
    %0 = vector.load %arg1[%c0, %c0_0, %c0_1, %c0_2] : memref<14x14x8x9xbf16, #tpu.memory_space<vmem>>, vector<14x14x8x9xbf16>
    %1 = vector.shape_cast %0 : vector<14x14x8x9xbf16> to vector<1568x9xbf16>
    %c0_3 = arith.constant 0 : index
    %c0_4 = arith.constant 0 : index
    %2 = vector.load %arg2[%c0_3, %c0_4] : memref<9x16xbf16, #tpu.memory_space<vmem>>, vector<9x16xbf16>
    %cst = arith.constant dense<0.000000e+00> : vector<1568x16xf32>
    %3 = tpu.matmul %1, %2, %cst {dimension_numbers = #tpu.dot_dimension_numbers<[1], [0], [0], [1], [0, 0, 1, 1], [], []>} : vector<1568x9xbf16>, vector<9x16xbf16>, vector<1568x16xf32> -> vector<1568x16xf32>
    %c0_5 = arith.constant 0 : index
    %c0_6 = arith.constant 0 : index
    %4 = vector.load %arg3[%c0_5, %c0_6] : memref<3x16xf32, #tpu.memory_space<vmem>>, vector<3x16xf32>
    %5 = vector.extract_strided_slice %4 {offsets = [0, 0], sizes = [1, 16], strides = [1, 1]} : vector<3x16xf32> to vector<1x16xf32>
    %6 = vector.broadcast %5 : vector<1x16xf32> to vector<1568x16xf32>
    %7 = arith.addf %3, %6 : vector<1568x16xf32>
    %cst_7 = arith.constant 0.000000e+00 : f32
    %8 = vector.broadcast %cst_7 : f32 to vector<1568x16xf32>
    %9 = arith.cmpf ogt, %7, %8 : vector<1568x16xf32>
    %cst_8 = arith.constant 2.000000e-01 : f32
    %10 = vector.broadcast %cst_8 : f32 to vector<1568x16xf32>
    %11 = arith.mulf %10, %7 : vector<1568x16xf32>
    %12 = arith.select %9, %7, %11 : vector<1568x16xi1>, vector<1568x16xf32>
    %13 = vector.extract_strided_slice %4 {offsets = [1, 0], sizes = [1, 16], strides = [1, 1]} : vector<3x16xf32> to vector<1x16xf32>
    %14 = vector.broadcast %13 : vector<1x16xf32> to vector<1568x16xf32>
    %15 = arith.mulf %12, %14 : vector<1568x16xf32>
    %16 = vector.extract_strided_slice %4 {offsets = [2, 0], sizes = [1, 16], strides = [1, 1]} : vector<3x16xf32> to vector<1x16xf32>
    %17 = vector.broadcast %16 : vector<1x16xf32> to vector<1568x16xf32>
    %18 = arith.addf %15, %17 : vector<1568x16xf32>
    %19 = arith.truncf %18 : vector<1568x16xf32> to vector<1568x16xbf16>
    %20 = vector.shape_cast %19 : vector<1568x16xbf16> to vector<14x14x8x16xbf16>
    %cst_9 = arith.constant 0.000000e+00 : bf16
    %21 = vector.broadcast %cst_9 : bf16 to vector<14x1x8x16xbf16>
    %cst_10 = arith.constant 0.000000e+00 : bf16
    %22 = vector.broadcast %cst_10 : bf16 to vector<14x1x8x16xbf16>
    %23 = tpu.concatenate %21, %20, %22 in 1 : vector<14x1x8x16xbf16>, vector<14x14x8x16xbf16>, vector<14x1x8x16xbf16> -> vector<14x16x8x16xbf16>
    %cst_11 = arith.constant 0.000000e+00 : bf16
    %24 = vector.broadcast %cst_11 : bf16 to vector<1x16x8x16xbf16>
    %cst_12 = arith.constant 0.000000e+00 : bf16
    %25 = vector.broadcast %cst_12 : bf16 to vector<1x16x8x16xbf16>
    %26 = tpu.concatenate %24, %23, %25 in 0 : vector<1x16x8x16xbf16>, vector<14x16x8x16xbf16>, vector<1x16x8x16xbf16> -> vector<16x16x8x16xbf16>
    %27 = vector.shape_cast %26 : vector<16x16x8x16xbf16> to vector<8x2x8x2x8x16xbf16>
    %c0_13 = arith.constant 0 : index
    %c0_14 = arith.constant 0 : index
    %28 = vector.load %arg4[%c0_13, %c0_14] : memref<144x32xbf16, #tpu.memory_space<vmem>>, vector<144x32xbf16>
    %c0_15 = arith.constant 0 : index
    %c0_16 = arith.constant 0 : index
    %29 = vector.load %arg5[%c0_15, %c0_16] : memref<3x32xf32, #tpu.memory_space<vmem>>, vector<3x32xf32>
    %30 = vector.extract_strided_slice %27 {offsets = [0, 0, 0, 0, 0, 0], sizes = [7, 1, 7, 1, 8, 16], strides = [1, 1, 1, 1, 1, 1]} : vector<8x2x8x2x8x16xbf16> to vector<7x1x7x1x8x16xbf16>
    %31 = vector.shape_cast %30 : vector<7x1x7x1x8x16xbf16> to vector<7x7x8x16xbf16>
    %32 = vector.shape_cast %31 : vector<7x7x8x16xbf16> to vector<392x16xbf16>
    %33 = vector.extract_strided_slice %27 {offsets = [0, 0, 0, 1, 0, 0], sizes = [7, 1, 7, 1, 8, 16], strides = [1, 1, 1, 1, 1, 1]} : vector<8x2x8x2x8x16xbf16> to vector<7x1x7x1x8x16xbf16>
    %34 = vector.shape_cast %33 : vector<7x1x7x1x8x16xbf16> to vector<7x7x8x16xbf16>
    %35 = vector.shape_cast %34 : vector<7x7x8x16xbf16> to vector<392x16xbf16>
    %36 = vector.extract_strided_slice %27 {offsets = [0, 0, 1, 0, 0, 0], sizes = [7, 1, 7, 1, 8, 16], strides = [1, 1, 1, 1, 1, 1]} : vector<8x2x8x2x8x16xbf16> to vector<7x1x7x1x8x16xbf16>
    %37 = vector.shape_cast %36 : vector<7x1x7x1x8x16xbf16> to vector<7x7x8x16xbf16>
    %38 = vector.shape_cast %37 : vector<7x7x8x16xbf16> to vector<392x16xbf16>
    %39 = vector.extract_strided_slice %27 {offsets = [0, 1, 0, 0, 0, 0], sizes = [7, 1, 7, 1, 8, 16], strides = [1, 1, 1, 1, 1, 1]} : vector<8x2x8x2x8x16xbf16> to vector<7x1x7x1x8x16xbf16>
    %40 = vector.shape_cast %39 : vector<7x1x7x1x8x16xbf16> to vector<7x7x8x16xbf16>
    %41 = vector.shape_cast %40 : vector<7x7x8x16xbf16> to vector<392x16xbf16>
    %42 = vector.extract_strided_slice %27 {offsets = [0, 1, 0, 1, 0, 0], sizes = [7, 1, 7, 1, 8, 16], strides = [1, 1, 1, 1, 1, 1]} : vector<8x2x8x2x8x16xbf16> to vector<7x1x7x1x8x16xbf16>
    %43 = vector.shape_cast %42 : vector<7x1x7x1x8x16xbf16> to vector<7x7x8x16xbf16>
    %44 = vector.shape_cast %43 : vector<7x7x8x16xbf16> to vector<392x16xbf16>
    %45 = vector.extract_strided_slice %27 {offsets = [0, 1, 1, 0, 0, 0], sizes = [7, 1, 7, 1, 8, 16], strides = [1, 1, 1, 1, 1, 1]} : vector<8x2x8x2x8x16xbf16> to vector<7x1x7x1x8x16xbf16>
    %46 = vector.shape_cast %45 : vector<7x1x7x1x8x16xbf16> to vector<7x7x8x16xbf16>
    %47 = vector.shape_cast %46 : vector<7x7x8x16xbf16> to vector<392x16xbf16>
    %48 = vector.extract_strided_slice %27 {offsets = [1, 0, 0, 0, 0, 0], sizes = [7, 1, 7, 1, 8, 16], strides = [1, 1, 1, 1, 1, 1]} : vector<8x2x8x2x8x16xbf16> to vector<7x1x7x1x8x16xbf16>
    %49 = vector.shape_cast %48 : vector<7x1x7x1x8x16xbf16> to vector<7x7x8x16xbf16>
    %50 = vector.shape_cast %49 : vector<7x7x8x16xbf16> to vector<392x16xbf16>
    %51 = vector.extract_strided_slice %27 {offsets = [1, 0, 0, 1, 0, 0], sizes = [7, 1, 7, 1, 8, 16], strides = [1, 1, 1, 1, 1, 1]} : vector<8x2x8x2x8x16xbf16> to vector<7x1x7x1x8x16xbf16>
    %52 = vector.shape_cast %51 : vector<7x1x7x1x8x16xbf16> to vector<7x7x8x16xbf16>
    %53 = vector.shape_cast %52 : vector<7x7x8x16xbf16> to vector<392x16xbf16>
    %54 = vector.extract_strided_slice %27 {offsets = [1, 0, 1, 0, 0, 0], sizes = [7, 1, 7, 1, 8, 16], strides = [1, 1, 1, 1, 1, 1]} : vector<8x2x8x2x8x16xbf16> to vector<7x1x7x1x8x16xbf16>
    %55 = vector.shape_cast %54 : vector<7x1x7x1x8x16xbf16> to vector<7x7x8x16xbf16>
    %56 = vector.shape_cast %55 : vector<7x7x8x16xbf16> to vector<392x16xbf16>
    %57 = tpu.concatenate %32, %35, %38, %41, %44, %47, %50, %53, %56 in 1 : vector<392x16xbf16>, vector<392x16xbf16>, vector<392x16xbf16>, vector<392x16xbf16>, vector<392x16xbf16>, vector<392x16xbf16>, vector<392x16xbf16>, vector<392x16xbf16>, vector<392x16xbf16> -> vector<392x144xbf16>
    %cst_17 = arith.constant dense<0.000000e+00> : vector<392x32xf32>
    %58 = tpu.matmul %57, %28, %cst_17 {dimension_numbers = #tpu.dot_dimension_numbers<[1], [0], [0], [1], [0, 0, 1, 1], [], []>} : vector<392x144xbf16>, vector<144x32xbf16>, vector<392x32xf32> -> vector<392x32xf32>
    %59 = vector.extract_strided_slice %29 {offsets = [0, 0], sizes = [1, 32], strides = [1, 1]} : vector<3x32xf32> to vector<1x32xf32>
    %60 = vector.broadcast %59 : vector<1x32xf32> to vector<392x32xf32>
    %61 = arith.addf %58, %60 : vector<392x32xf32>
    %cst_18 = arith.constant 0.000000e+00 : f32
    %62 = vector.broadcast %cst_18 : f32 to vector<392x32xf32>
    %63 = arith.cmpf ogt, %61, %62 : vector<392x32xf32>
    %cst_19 = arith.constant 2.000000e-01 : f32
    %64 = vector.broadcast %cst_19 : f32 to vector<392x32xf32>
    %65 = arith.mulf %64, %61 : vector<392x32xf32>
    %66 = arith.select %63, %61, %65 : vector<392x32xi1>, vector<392x32xf32>
    %67 = vector.extract_strided_slice %29 {offsets = [1, 0], sizes = [1, 32], strides = [1, 1]} : vector<3x32xf32> to vector<1x32xf32>
    %68 = vector.broadcast %67 : vector<1x32xf32> to vector<392x32xf32>
    %69 = arith.mulf %66, %68 : vector<392x32xf32>
    %70 = vector.extract_strided_slice %29 {offsets = [2, 0], sizes = [1, 32], strides = [1, 1]} : vector<3x32xf32> to vector<1x32xf32>
    %71 = vector.broadcast %70 : vector<1x32xf32> to vector<392x32xf32>
    %72 = arith.addf %69, %71 : vector<392x32xf32>
    %73 = arith.truncf %72 : vector<392x32xf32> to vector<392x32xbf16>
    %74 = vector.shape_cast %73 : vector<392x32xbf16> to vector<7x7x8x32xbf16>
    %cst_20 = arith.constant 0.000000e+00 : bf16
    %75 = vector.broadcast %cst_20 : bf16 to vector<7x1x8x32xbf16>
    %cst_21 = arith.constant 0.000000e+00 : bf16
    %76 = vector.broadcast %cst_21 : bf16 to vector<7x2x8x32xbf16>
    %77 = tpu.concatenate %75, %74, %76 in 1 : vector<7x1x8x32xbf16>, vector<7x7x8x32xbf16>, vector<7x2x8x32xbf16> -> vector<7x10x8x32xbf16>
    %cst_22 = arith.constant 0.000000e+00 : bf16
    %78 = vector.broadcast %cst_22 : bf16 to vector<1x10x8x32xbf16>
    %cst_23 = arith.constant 0.000000e+00 : bf16
    %79 = vector.broadcast %cst_23 : bf16 to vector<2x10x8x32xbf16>
    %80 = tpu.concatenate %78, %77, %79 in 0 : vector<1x10x8x32xbf16>, vector<7x10x8x32xbf16>, vector<2x10x8x32xbf16> -> vector<10x10x8x32xbf16>
    %81 = vector.shape_cast %80 : vector<10x10x8x32xbf16> to vector<5x2x5x2x8x32xbf16>
    %c0_24 = arith.constant 0 : index
    %c0_25 = arith.constant 0 : index
    %82 = vector.load %arg6[%c0_24, %c0_25] : memref<288x64xbf16, #tpu.memory_space<vmem>>, vector<288x64xbf16>
    %c0_26 = arith.constant 0 : index
    %c0_27 = arith.constant 0 : index
    %83 = vector.load %arg7[%c0_26, %c0_27] : memref<3x64xf32, #tpu.memory_space<vmem>>, vector<3x64xf32>
    %84 = vector.extract_strided_slice %81 {offsets = [0, 0, 0, 0, 0, 0], sizes = [4, 1, 4, 1, 8, 32], strides = [1, 1, 1, 1, 1, 1]} : vector<5x2x5x2x8x32xbf16> to vector<4x1x4x1x8x32xbf16>
    %85 = vector.shape_cast %84 : vector<4x1x4x1x8x32xbf16> to vector<4x4x8x32xbf16>
    %86 = vector.shape_cast %85 : vector<4x4x8x32xbf16> to vector<128x32xbf16>
    %87 = vector.extract_strided_slice %81 {offsets = [0, 0, 0, 1, 0, 0], sizes = [4, 1, 4, 1, 8, 32], strides = [1, 1, 1, 1, 1, 1]} : vector<5x2x5x2x8x32xbf16> to vector<4x1x4x1x8x32xbf16>
    %88 = vector.shape_cast %87 : vector<4x1x4x1x8x32xbf16> to vector<4x4x8x32xbf16>
    %89 = vector.shape_cast %88 : vector<4x4x8x32xbf16> to vector<128x32xbf16>
    %90 = vector.extract_strided_slice %81 {offsets = [0, 0, 1, 0, 0, 0], sizes = [4, 1, 4, 1, 8, 32], strides = [1, 1, 1, 1, 1, 1]} : vector<5x2x5x2x8x32xbf16> to vector<4x1x4x1x8x32xbf16>
    %91 = vector.shape_cast %90 : vector<4x1x4x1x8x32xbf16> to vector<4x4x8x32xbf16>
    %92 = vector.shape_cast %91 : vector<4x4x8x32xbf16> to vector<128x32xbf16>
    %93 = vector.extract_strided_slice %81 {offsets = [0, 1, 0, 0, 0, 0], sizes = [4, 1, 4, 1, 8, 32], strides = [1, 1, 1, 1, 1, 1]} : vector<5x2x5x2x8x32xbf16> to vector<4x1x4x1x8x32xbf16>
    %94 = vector.shape_cast %93 : vector<4x1x4x1x8x32xbf16> to vector<4x4x8x32xbf16>
    %95 = vector.shape_cast %94 : vector<4x4x8x32xbf16> to vector<128x32xbf16>
    %96 = vector.extract_strided_slice %81 {offsets = [0, 1, 0, 1, 0, 0], sizes = [4, 1, 4, 1, 8, 32], strides = [1, 1, 1, 1, 1, 1]} : vector<5x2x5x2x8x32xbf16> to vector<4x1x4x1x8x32xbf16>
    %97 = vector.shape_cast %96 : vector<4x1x4x1x8x32xbf16> to vector<4x4x8x32xbf16>
    %98 = vector.shape_cast %97 : vector<4x4x8x32xbf16> to vector<128x32xbf16>
    %99 = vector.extract_strided_slice %81 {offsets = [0, 1, 1, 0, 0, 0], sizes = [4, 1, 4, 1, 8, 32], strides = [1, 1, 1, 1, 1, 1]} : vector<5x2x5x2x8x32xbf16> to vector<4x1x4x1x8x32xbf16>
    %100 = vector.shape_cast %99 : vector<4x1x4x1x8x32xbf16> to vector<4x4x8x32xbf16>
    %101 = vector.shape_cast %100 : vector<4x4x8x32xbf16> to vector<128x32xbf16>
    %102 = vector.extract_strided_slice %81 {offsets = [1, 0, 0, 0, 0, 0], sizes = [4, 1, 4, 1, 8, 32], strides = [1, 1, 1, 1, 1, 1]} : vector<5x2x5x2x8x32xbf16> to vector<4x1x4x1x8x32xbf16>
    %103 = vector.shape_cast %102 : vector<4x1x4x1x8x32xbf16> to vector<4x4x8x32xbf16>
    %104 = vector.shape_cast %103 : vector<4x4x8x32xbf16> to vector<128x32xbf16>
    %105 = vector.extract_strided_slice %81 {offsets = [1, 0, 0, 1, 0, 0], sizes = [4, 1, 4, 1, 8, 32], strides = [1, 1, 1, 1, 1, 1]} : vector<5x2x5x2x8x32xbf16> to vector<4x1x4x1x8x32xbf16>
    %106 = vector.shape_cast %105 : vector<4x1x4x1x8x32xbf16> to vector<4x4x8x32xbf16>
    %107 = vector.shape_cast %106 : vector<4x4x8x32xbf16> to vector<128x32xbf16>
    %108 = vector.extract_strided_slice %81 {offsets = [1, 0, 1, 0, 0, 0], sizes = [4, 1, 4, 1, 8, 32], strides = [1, 1, 1, 1, 1, 1]} : vector<5x2x5x2x8x32xbf16> to vector<4x1x4x1x8x32xbf16>
    %109 = vector.shape_cast %108 : vector<4x1x4x1x8x32xbf16> to vector<4x4x8x32xbf16>
    %110 = vector.shape_cast %109 : vector<4x4x8x32xbf16> to vector<128x32xbf16>
    %111 = tpu.concatenate %86, %89, %92, %95, %98, %101, %104, %107, %110 in 1 : vector<128x32xbf16>, vector<128x32xbf16>, vector<128x32xbf16>, vector<128x32xbf16>, vector<128x32xbf16>, vector<128x32xbf16>, vector<128x32xbf16>, vector<128x32xbf16>, vector<128x32xbf16> -> vector<128x288xbf16>
    %cst_28 = arith.constant dense<0.000000e+00> : vector<128x64xf32>
    %112 = tpu.matmul %111, %82, %cst_28 {dimension_numbers = #tpu.dot_dimension_numbers<[1], [0], [0], [1], [0, 0, 1, 1], [], []>} : vector<128x288xbf16>, vector<288x64xbf16>, vector<128x64xf32> -> vector<128x64xf32>
    %113 = vector.extract_strided_slice %83 {offsets = [0, 0], sizes = [1, 64], strides = [1, 1]} : vector<3x64xf32> to vector<1x64xf32>
    %114 = vector.broadcast %113 : vector<1x64xf32> to vector<128x64xf32>
    %115 = arith.addf %112, %114 : vector<128x64xf32>
    %cst_29 = arith.constant 0.000000e+00 : f32
    %116 = vector.broadcast %cst_29 : f32 to vector<128x64xf32>
    %117 = arith.cmpf ogt, %115, %116 : vector<128x64xf32>
    %cst_30 = arith.constant 2.000000e-01 : f32
    %118 = vector.broadcast %cst_30 : f32 to vector<128x64xf32>
    %119 = arith.mulf %118, %115 : vector<128x64xf32>
    %120 = arith.select %117, %115, %119 : vector<128x64xi1>, vector<128x64xf32>
    %121 = vector.extract_strided_slice %83 {offsets = [1, 0], sizes = [1, 64], strides = [1, 1]} : vector<3x64xf32> to vector<1x64xf32>
    %122 = vector.broadcast %121 : vector<1x64xf32> to vector<128x64xf32>
    %123 = arith.mulf %120, %122 : vector<128x64xf32>
    %124 = vector.extract_strided_slice %83 {offsets = [2, 0], sizes = [1, 64], strides = [1, 1]} : vector<3x64xf32> to vector<1x64xf32>
    %125 = vector.broadcast %124 : vector<1x64xf32> to vector<128x64xf32>
    %126 = arith.addf %123, %125 : vector<128x64xf32>
    %127 = arith.truncf %126 : vector<128x64xf32> to vector<128x64xbf16>
    %128 = vector.shape_cast %127 : vector<128x64xbf16> to vector<4x4x8x64xbf16>
    %cst_31 = arith.constant 0.000000e+00 : bf16
    %129 = vector.broadcast %cst_31 : bf16 to vector<4x1x8x64xbf16>
    %cst_32 = arith.constant 0.000000e+00 : bf16
    %130 = vector.broadcast %cst_32 : bf16 to vector<4x1x8x64xbf16>
    %131 = tpu.concatenate %129, %128, %130 in 1 : vector<4x1x8x64xbf16>, vector<4x4x8x64xbf16>, vector<4x1x8x64xbf16> -> vector<4x6x8x64xbf16>
    %cst_33 = arith.constant 0.000000e+00 : bf16
    %132 = vector.broadcast %cst_33 : bf16 to vector<1x6x8x64xbf16>
    %cst_34 = arith.constant 0.000000e+00 : bf16
    %133 = vector.broadcast %cst_34 : bf16 to vector<1x6x8x64xbf16>
    %134 = tpu.concatenate %132, %131, %133 in 0 : vector<1x6x8x64xbf16>, vector<4x6x8x64xbf16>, vector<1x6x8x64xbf16> -> vector<6x6x8x64xbf16>
    %135 = vector.shape_cast %134 : vector<6x6x8x64xbf16> to vector<3x2x3x2x8x64xbf16>
    %c0_35 = arith.constant 0 : index
    %c0_36 = arith.constant 0 : index
    %136 = vector.load %arg8[%c0_35, %c0_36] : memref<576x128xbf16, #tpu.memory_space<vmem>>, vector<576x128xbf16>
    %c0_37 = arith.constant 0 : index
    %c0_38 = arith.constant 0 : index
    %137 = vector.load %arg9[%c0_37, %c0_38] : memref<3x128xf32, #tpu.memory_space<vmem>>, vector<3x128xf32>
    %138 = vector.extract_strided_slice %135 {offsets = [0, 0, 0, 0, 0, 0], sizes = [2, 1, 2, 1, 8, 64], strides = [1, 1, 1, 1, 1, 1]} : vector<3x2x3x2x8x64xbf16> to vector<2x1x2x1x8x64xbf16>
    %139 = vector.shape_cast %138 : vector<2x1x2x1x8x64xbf16> to vector<2x2x8x64xbf16>
    %140 = vector.shape_cast %139 : vector<2x2x8x64xbf16> to vector<32x64xbf16>
    %141 = vector.extract_strided_slice %135 {offsets = [0, 0, 0, 1, 0, 0], sizes = [2, 1, 2, 1, 8, 64], strides = [1, 1, 1, 1, 1, 1]} : vector<3x2x3x2x8x64xbf16> to vector<2x1x2x1x8x64xbf16>
    %142 = vector.shape_cast %141 : vector<2x1x2x1x8x64xbf16> to vector<2x2x8x64xbf16>
    %143 = vector.shape_cast %142 : vector<2x2x8x64xbf16> to vector<32x64xbf16>
    %144 = vector.extract_strided_slice %135 {offsets = [0, 0, 1, 0, 0, 0], sizes = [2, 1, 2, 1, 8, 64], strides = [1, 1, 1, 1, 1, 1]} : vector<3x2x3x2x8x64xbf16> to vector<2x1x2x1x8x64xbf16>
    %145 = vector.shape_cast %144 : vector<2x1x2x1x8x64xbf16> to vector<2x2x8x64xbf16>
    %146 = vector.shape_cast %145 : vector<2x2x8x64xbf16> to vector<32x64xbf16>
    %147 = vector.extract_strided_slice %135 {offsets = [0, 1, 0, 0, 0, 0], sizes = [2, 1, 2, 1, 8, 64], strides = [1, 1, 1, 1, 1, 1]} : vector<3x2x3x2x8x64xbf16> to vector<2x1x2x1x8x64xbf16>
    %148 = vector.shape_cast %147 : vector<2x1x2x1x8x64xbf16> to vector<2x2x8x64xbf16>
    %149 = vector.shape_cast %148 : vector<2x2x8x64xbf16> to vector<32x64xbf16>
    %150 = vector.extract_strided_slice %135 {offsets = [0, 1, 0, 1, 0, 0], sizes = [2, 1, 2, 1, 8, 64], strides = [1, 1, 1, 1, 1, 1]} : vector<3x2x3x2x8x64xbf16> to vector<2x1x2x1x8x64xbf16>
    %151 = vector.shape_cast %150 : vector<2x1x2x1x8x64xbf16> to vector<2x2x8x64xbf16>
    %152 = vector.shape_cast %151 : vector<2x2x8x64xbf16> to vector<32x64xbf16>
    %153 = vector.extract_strided_slice %135 {offsets = [0, 1, 1, 0, 0, 0], sizes = [2, 1, 2, 1, 8, 64], strides = [1, 1, 1, 1, 1, 1]} : vector<3x2x3x2x8x64xbf16> to vector<2x1x2x1x8x64xbf16>
    %154 = vector.shape_cast %153 : vector<2x1x2x1x8x64xbf16> to vector<2x2x8x64xbf16>
    %155 = vector.shape_cast %154 : vector<2x2x8x64xbf16> to vector<32x64xbf16>
    %156 = vector.extract_strided_slice %135 {offsets = [1, 0, 0, 0, 0, 0], sizes = [2, 1, 2, 1, 8, 64], strides = [1, 1, 1, 1, 1, 1]} : vector<3x2x3x2x8x64xbf16> to vector<2x1x2x1x8x64xbf16>
    %157 = vector.shape_cast %156 : vector<2x1x2x1x8x64xbf16> to vector<2x2x8x64xbf16>
    %158 = vector.shape_cast %157 : vector<2x2x8x64xbf16> to vector<32x64xbf16>
    %159 = vector.extract_strided_slice %135 {offsets = [1, 0, 0, 1, 0, 0], sizes = [2, 1, 2, 1, 8, 64], strides = [1, 1, 1, 1, 1, 1]} : vector<3x2x3x2x8x64xbf16> to vector<2x1x2x1x8x64xbf16>
    %160 = vector.shape_cast %159 : vector<2x1x2x1x8x64xbf16> to vector<2x2x8x64xbf16>
    %161 = vector.shape_cast %160 : vector<2x2x8x64xbf16> to vector<32x64xbf16>
    %162 = vector.extract_strided_slice %135 {offsets = [1, 0, 1, 0, 0, 0], sizes = [2, 1, 2, 1, 8, 64], strides = [1, 1, 1, 1, 1, 1]} : vector<3x2x3x2x8x64xbf16> to vector<2x1x2x1x8x64xbf16>
    %163 = vector.shape_cast %162 : vector<2x1x2x1x8x64xbf16> to vector<2x2x8x64xbf16>
    %164 = vector.shape_cast %163 : vector<2x2x8x64xbf16> to vector<32x64xbf16>
    %165 = tpu.concatenate %140, %143, %146, %149, %152, %155, %158, %161, %164 in 1 : vector<32x64xbf16>, vector<32x64xbf16>, vector<32x64xbf16>, vector<32x64xbf16>, vector<32x64xbf16>, vector<32x64xbf16>, vector<32x64xbf16>, vector<32x64xbf16>, vector<32x64xbf16> -> vector<32x576xbf16>
    %cst_39 = arith.constant dense<0.000000e+00> : vector<32x128xf32>
    %166 = tpu.matmul %165, %136, %cst_39 {dimension_numbers = #tpu.dot_dimension_numbers<[1], [0], [0], [1], [0, 0, 1, 1], [], []>} : vector<32x576xbf16>, vector<576x128xbf16>, vector<32x128xf32> -> vector<32x128xf32>
    %167 = vector.extract_strided_slice %137 {offsets = [0, 0], sizes = [1, 128], strides = [1, 1]} : vector<3x128xf32> to vector<1x128xf32>
    %168 = vector.broadcast %167 : vector<1x128xf32> to vector<32x128xf32>
    %169 = arith.addf %166, %168 : vector<32x128xf32>
    %cst_40 = arith.constant 0.000000e+00 : f32
    %170 = vector.broadcast %cst_40 : f32 to vector<32x128xf32>
    %171 = arith.cmpf ogt, %169, %170 : vector<32x128xf32>
    %cst_41 = arith.constant 2.000000e-01 : f32
    %172 = vector.broadcast %cst_41 : f32 to vector<32x128xf32>
    %173 = arith.mulf %172, %169 : vector<32x128xf32>
    %174 = arith.select %171, %169, %173 : vector<32x128xi1>, vector<32x128xf32>
    %175 = vector.extract_strided_slice %137 {offsets = [1, 0], sizes = [1, 128], strides = [1, 1]} : vector<3x128xf32> to vector<1x128xf32>
    %176 = vector.broadcast %175 : vector<1x128xf32> to vector<32x128xf32>
    %177 = arith.mulf %174, %176 : vector<32x128xf32>
    %178 = vector.extract_strided_slice %137 {offsets = [2, 0], sizes = [1, 128], strides = [1, 1]} : vector<3x128xf32> to vector<1x128xf32>
    %179 = vector.broadcast %178 : vector<1x128xf32> to vector<32x128xf32>
    %180 = arith.addf %177, %179 : vector<32x128xf32>
    %181 = arith.truncf %180 : vector<32x128xf32> to vector<32x128xbf16>
    %182 = vector.shape_cast %181 : vector<32x128xbf16> to vector<2x2x8x128xbf16>
    %183 = vector.extract_strided_slice %182 {offsets = [0, 0, 0, 0], sizes = [1, 1, 8, 128], strides = [1, 1, 1, 1]} : vector<2x2x8x128xbf16> to vector<1x1x8x128xbf16>
    %184 = vector.shape_cast %183 : vector<1x1x8x128xbf16> to vector<8x128xbf16>
    %185 = vector.extract_strided_slice %182 {offsets = [0, 1, 0, 0], sizes = [1, 1, 8, 128], strides = [1, 1, 1, 1]} : vector<2x2x8x128xbf16> to vector<1x1x8x128xbf16>
    %186 = vector.shape_cast %185 : vector<1x1x8x128xbf16> to vector<8x128xbf16>
    %187 = vector.extract_strided_slice %182 {offsets = [1, 0, 0, 0], sizes = [1, 1, 8, 128], strides = [1, 1, 1, 1]} : vector<2x2x8x128xbf16> to vector<1x1x8x128xbf16>
    %188 = vector.shape_cast %187 : vector<1x1x8x128xbf16> to vector<8x128xbf16>
    %189 = vector.extract_strided_slice %182 {offsets = [1, 1, 0, 0], sizes = [1, 1, 8, 128], strides = [1, 1, 1, 1]} : vector<2x2x8x128xbf16> to vector<1x1x8x128xbf16>
    %190 = vector.shape_cast %189 : vector<1x1x8x128xbf16> to vector<8x128xbf16>
    %191 = tpu.concatenate %184, %186, %188, %190 in 1 : vector<8x128xbf16>, vector<8x128xbf16>, vector<8x128xbf16>, vector<8x128xbf16> -> vector<8x512xbf16>
    %c0_42 = arith.constant 0 : index
    %c0_43 = arith.constant 0 : index
    %192 = vector.load %arg10[%c0_42, %c0_43] : memref<512x2xbf16, #tpu.memory_space<vmem>>, vector<512x2xbf16>
    %cst_44 = arith.constant dense<0.000000e+00> : vector<8x2xf32>
    %193 = tpu.matmul %191, %192, %cst_44 {dimension_numbers = #tpu.dot_dimension_numbers<[1], [0], [0], [1], [0, 0, 1, 1], [], []>} : vector<8x512xbf16>, vector<512x2xbf16>, vector<8x2xf32> -> vector<8x2xf32>
    %c0_45 = arith.constant 0 : index
    %c0_46 = arith.constant 0 : index
    %194 = vector.load %arg11[%c0_45, %c0_46] : memref<1x2xf32, #tpu.memory_space<vmem>>, vector<1x2xf32>
    %195 = vector.broadcast %194 : vector<1x2xf32> to vector<8x2xf32>
    %196 = arith.addf %193, %195 : vector<8x2xf32>
    %197 = vector.extract_strided_slice %196 {offsets = [0, 0], sizes = [8, 1], strides = [1, 1]} : vector<8x2xf32> to vector<8x1xf32>
    %cst_47 = arith.constant 0.000000e+00 : f32
    %198 = vector.broadcast %cst_47 : f32 to vector<8x1xf32>
    %199 = arith.subf %198, %197 : vector<8x1xf32>
    %200 = math.exp %199 : vector<8x1xf32>
    %cst_48 = arith.constant 1.000000e+00 : f32
    %201 = vector.broadcast %cst_48 : f32 to vector<8x1xf32>
    %202 = arith.addf %201, %200 : vector<8x1xf32>
    %cst_49 = arith.constant 1.000000e+00 : f32
    %203 = vector.broadcast %cst_49 : f32 to vector<8x1xf32>
    %204 = arith.divf %203, %202 : vector<8x1xf32>
    %205 = vector.extract_strided_slice %196 {offsets = [0, 1], sizes = [8, 1], strides = [1, 1]} : vector<8x2xf32> to vector<8x1xf32>
    %cst_50 = arith.constant dense<0xFF800000> : vector<8xf32>
    %206 = vector.multi_reduction <maximumf>, %205, %cst_50 [1] : vector<8x1xf32> to vector<8xf32>
    %207 = vector.shape_cast %206 : vector<8xf32> to vector<8x1xf32>
    %208 = arith.subf %205, %207 : vector<8x1xf32>
    %209 = math.exp %208 : vector<8x1xf32>
    %cst_51 = arith.constant dense<0.000000e+00> : vector<8xf32>
    %210 = vector.multi_reduction <add>, %209, %cst_51 [1] : vector<8x1xf32> to vector<8xf32>
    %211 = vector.shape_cast %210 : vector<8xf32> to vector<8x1xf32>
    %212 = arith.divf %209, %211 : vector<8x1xf32>
    %213 = tpu.concatenate %204, %212 in 1 : vector<8x1xf32>, vector<8x1xf32> -> vector<8x2xf32>
    %c0_52 = arith.constant 0 : index
    %c0_53 = arith.constant 0 : index
    %214 = vector.load %arg12[%c0_52, %c0_53] : memref<8x2xf32, #tpu.memory_space<vmem>>, vector<8x2xf32>
    tpu.vector_store %arg12[%c0_52, %c0_53], %213 {strides = array<i32>} : memref<8x2xf32, #tpu.memory_space<vmem>>, vector<8x2xf32>,
    return
  }
  func.func @transform_0(%arg0: i32) -> (i32, i32, i32, i32) {
    %c0_i32 = arith.constant 0 : i32
    %c0_i32_0 = arith.constant 0 : i32
    %c0_i32_1 = arith.constant 0 : i32
    %c0_i32_2 = arith.constant 0 : i32
    return %c0_i32, %c0_i32_0, %arg0, %c0_i32_1 : i32, i32, i32, i32
  }
  func.func @transform_1(%arg0: i32) -> (i32, i32) {
    %c0_i32 = arith.constant 0 : i32
    %c0_i32_0 = arith.constant 0 : i32
    %c0_i32_1 = arith.constant 0 : i32
    return %c0_i32, %c0_i32_0 : i32, i32
  }
  func.func @transform_2(%arg0: i32) -> (i32, i32) {
    %c0_i32 = arith.constant 0 : i32
    %c0_i32_0 = arith.constant 0 : i32
    %c0_i32_1 = arith.constant 0 : i32
    return %c0_i32, %c0_i32_0 : i32, i32
  }
  func.func @transform_3(%arg0: i32) -> (i32, i32) {
    %c0_i32 = arith.constant 0 : i32
    %c0_i32_0 = arith.constant 0 : i32
    %c0_i32_1 = arith.constant 0 : i32
    return %c0_i32, %c0_i32_0 : i32, i32
  }
  func.func @transform_4(%arg0: i32) -> (i32, i32) {
    %c0_i32 = arith.constant 0 : i32
    %c0_i32_0 = arith.constant 0 : i32
    %c0_i32_1 = arith.constant 0 : i32
    return %c0_i32, %c0_i32_0 : i32, i32
  }
  func.func @transform_5(%arg0: i32) -> (i32, i32) {
    %c0_i32 = arith.constant 0 : i32
    %c0_i32_0 = arith.constant 0 : i32
    %c0_i32_1 = arith.constant 0 : i32
    return %c0_i32, %c0_i32_0 : i32, i32
  }
  func.func @transform_6(%arg0: i32) -> (i32, i32) {
    %c0_i32 = arith.constant 0 : i32
    %c0_i32_0 = arith.constant 0 : i32
    %c0_i32_1 = arith.constant 0 : i32
    return %c0_i32, %c0_i32_0 : i32, i32
  }
  func.func @transform_7(%arg0: i32) -> (i32, i32) {
    %c0_i32 = arith.constant 0 : i32
    %c0_i32_0 = arith.constant 0 : i32
    %c0_i32_1 = arith.constant 0 : i32
    return %c0_i32, %c0_i32_0 : i32, i32
  }
  func.func @transform_8(%arg0: i32) -> (i32, i32) {
    %c0_i32 = arith.constant 0 : i32
    %c0_i32_0 = arith.constant 0 : i32
    %c0_i32_1 = arith.constant 0 : i32
    return %c0_i32, %c0_i32_0 : i32, i32
  }
  func.func @transform_9(%arg0: i32) -> (i32, i32) {
    %c0_i32 = arith.constant 0 : i32
    %c0_i32_0 = arith.constant 0 : i32
    %c0_i32_1 = arith.constant 0 : i32
    return %c0_i32, %c0_i32_0 : i32, i32
  }
  func.func @transform_10(%arg0: i32) -> (i32, i32) {
    %c0_i32 = arith.constant 0 : i32
    %c0_i32_0 = arith.constant 0 : i32
    %c0_i32_1 = arith.constant 0 : i32
    return %c0_i32, %c0_i32_0 : i32, i32
  }
  func.func @transform_11(%arg0: i32) -> (i32, i32) {
    %c0_i32 = arith.constant 0 : i32
    %c0_i32_0 = arith.constant 0 : i32
    return %arg0, %c0_i32 : i32, i32
  }
}

</mosaic_0001>

<bundles_post_ra>
// kernel: discriminator_forward.1
= control target key start
LH: loop header
LB: loop body
LE: loop exit
PB: predicated region body
PF: predicated region fallthrough
CT: control target
= control target key end

     0   :  { %vm1032_vm0 = vcmask 1043456   ;;  %vm1033_vm1 = vcmask 1044480   ;;  %vm737_vm2 = vcmask 72704   ;;  %v7974_v1 = vmov 65535   ;;  %s7976_s28 = smov 16   ;;  %s7977_s14 = smov 32   ;;  %s11321_s1 = inlined_call_operand.vmem [shape: bf16[9,16], index: 1, kind: input, shape index: {}]   ;;  %s11322_s0 = inlined_call_operand.vmem [shape: bf16[14,14,8,9], index: 0, kind: input, shape index: {}]   ;;  %s11323_s2 = inlined_call_operand.vmem [shape: f32[3,16], index: 2, kind: input, shape index: {}]   ;;  %s11324_s3 = inlined_call_operand.vmem [shape: bf16[144,32], index: 3, kind: input, shape index: {}]   ;;  %s11325_s4 = inlined_call_operand.vmem [shape: f32[3,32], index: 4, kind: input, shape index: {}]   ;;  %s11326_s5 = inlined_call_operand.vmem [shape: bf16[288,64], index: 5, kind: input, shape index: {}]   ;;  %s11327_s9 = inlined_call_operand.vmem [shape: bf16[512,2], index: 9, kind: input, shape index: {}]   ;;  %s11328_s7 = inlined_call_operand.vmem [shape: bf16[576,128], index: 7, kind: input, shape index: {}]   ;;  %s11329_s6 = inlined_call_operand.vmem [shape: f32[3,64], index: 6, kind: input, shape index: {}]   ;;  %s11330_s8 = inlined_call_operand.vmem [shape: f32[3,128], index: 8, kind: input, shape index: {}]   ;;  %s11331_s10 = inlined_call_operand.vmem [shape: f32[1,2], index: 10, kind: input, shape index: {}]   ;;  %s11332_s11 = inlined_call_operand.vmem [shape: f32[8,2], index: 11, kind: output, shape index: {}]  }
   0x1   :  { %v7772_v0 = vld [vmem:[%s11321_s1] sm:$0x1f]   ;;  %v1034_v2 = vsel %vm1032_vm0, 4294967295, %v7974_v1  ;;  %v7774_v6 = vld [vmem:[%s11322_s0 + $0x8] sm:$0xff]   ;;  %v7775_v7 = vld [vmem:[%s11322_s0 + $0x10] sm:$0xff]   ;;  %v11333_v30 = vmov 0   ;;  %v238_v59 = vlaneseq }
   0x2   :  { %v7773_v3 = vld [vmem:[%s11322_s0] sm:$0xff]   ;;  %v1035_v4 = vsel %vm1033_vm1, %v1034_v2, 0  ;;  %v7776_v8 = vld [vmem:[%s11322_s0 + $0x18] sm:$0xff]   ;;  %v7778_v10 = vld [vmem:[%s11322_s0 + $0x28] sm:$0xff]   ;;  %v8147_v31 = vcombine.low %v11333_v30, %v11333_v30  ;;  %4298 = vmatprep.subr.bf16.mxu1 %v11333_v30  ;;  %s7978_s16 = smov 64   ;;  %s7979_s17 = smov 80  }
   0x3   :  { %v1037_v5 = vand.u32 %v7772_v0, %v1035_v4  ;;  %7535 = vmatprep.mubr.msk.bf16.mxu0 %vm737_vm2, %v7773_v3  ;;  %v7777_v9 = vld [vmem:[%s11322_s0 + $0x20] sm:$0xff]   ;;  %v7779_v11 = vld [vmem:[%s11322_s0 + $0x30] sm:$0xff]   ;;  %v7780_v12 = vld [vmem:[%s11322_s0 + $0x38] sm:$0xff]   ;;  %v239_v61 = vshrl.u32 %v238_v59, 7  ;;  %s7980_s23 = smov 48   ;;  %s7981_s26 = smov 96  }
   0x4   :  { %v7781_v13 = vld [vmem:[%s11322_s0 + $0x40] sm:$0xff]   ;;  %v7782_v14 = vld [vmem:[%s11322_s0 + $0x48] sm:$0xff]   ;;  %v7783_v15 = vld [vmem:[%s11322_s0 + $0x50] sm:$0xff]   ;;  %11352 = vst [vmem:[#allocation2_spill] sm:$0xff] %v8147_v31  ;;  %3301 = vrot.lane.b32.xlu0 %v8147_v31, %s7976_s28  ;;  %s7982_s27 = smov 112  }
   0x5   :  { %7533 = vmatprep.subr.bf16.mxu0 %v1037_v5  ;;  %v7784_v16 = vld [vmem:[%s11322_s0 + $0x58] sm:$0xff]   ;;  %v7785_v17 = vld [vmem:[%s11322_s0 + $0x60] sm:$0xff]   ;;  %v7786_v18 = vld [vmem:[%s11322_s0 + $0x68] sm:$0xff]   ;;  %v8270_v63 = vsub.s32 0, %v239_v61  ;;  %v8282_v3 = vsub.s32 1, %v239_v61 }
   0x6   :  { %7534 = vmatpush3.bf16.msra.mxu0 %v1037_v5  ;;  %v7787_v19 = vld [vmem:[%s11322_s0 + $0x70] sm:$0xff]   ;;  %v7788_v20 = vld [vmem:[%s11322_s0 + $0x78] sm:$0xff]   ;;  %v7789_v21 = vld [vmem:[%s11322_s0 + $0x80] sm:$0xff]  }
   0x7   :  { %v7790_v22 = vld [vmem:[%s11322_s0 + $0x88] sm:$0xff]   ;;  %v7791_v23 = vld [vmem:[%s11322_s0 + $0x90] sm:$0xff]   ;;  %v7792_v24 = vld [vmem:[%s11322_s0 + $0x98] sm:$0xff]   ;;  %11353 = vst [vmem:[#allocation3_spill] sm:$0xff] %v8270_v63 }
   0x8   :  { %v7793_v25 = vld [vmem:[%s11322_s0 + $0xa0] sm:$0xff]   ;;  %v7794_v26 = vld [vmem:[%s11322_s0 + $0xa8] sm:$0xff]   ;;  %v7795_v27 = vld [vmem:[%s11322_s0 + $0xb0] sm:$0xff]   ;;  %3369 = vrot.lane.b32.xlu0 %v8147_v31, %s7977_s14  ;;  %11354 = vst [vmem:[#allocation4_spill] sm:$0xff] %v8282_v3 }
   0x9   :  { %7536 = vmatmul.mubr.msk.bf16.vlgmr.msra.gmra.mrb[0].mxu0 %vm737_vm2, %v7774_v6  ;;  %v7796_v28 = vld [vmem:[%s11322_s0 + $0xb8] sm:$0xff]   ;;  %v7797_v29 = vld [vmem:[%s11322_s0 + $0xc0] sm:$0xff]   ;;  %v7798_v32 = vld [vmem:[%s11322_s0 + $0xc8] sm:$0xff]   ;;  %v8288_v6 = vsub.s32 2, %v239_v61 }
   0xa   :  { %7539 = vmatprep.mubr.msk.bf16.mxu0 %vm737_vm2, %v7775_v7  ;;  %v7799_v33 = vld [vmem:[%s11322_s0 + $0xd0] sm:$0xff]   ;;  %v7800_v34 = vld [vmem:[%s11322_s0 + $0xd8] sm:$0xff]   ;;  %v7801_v35 = vld [vmem:[%s11322_s0 + $0xe0] sm:$0xff]  }
   0xb   :  { %v7802_v36 = vld [vmem:[%s11322_s0 + $0xe8] sm:$0xff]   ;;  %v7803_v37 = vld [vmem:[%s11322_s0 + $0xf0] sm:$0xff]   ;;  %v7804_v38 = vld [vmem:[%s11322_s0 + $0xf8] sm:$0xff]   ;;  %11355 = vst [vmem:[#allocation5_spill] sm:$0xff] %v8288_v6 }
   0xc   :  { %v7805_v39 = vld [vmem:[%s11322_s0 + $0x100] sm:$0xff]   ;;  %v7806_v40 = vld [vmem:[%s11322_s0 + $0x108] sm:$0xff]   ;;  %v7807_v41 = vld [vmem:[%s11322_s0 + $0x110] sm:$0xff]  }
   0xd   :  { %v7808_v42 = vld [vmem:[%s11322_s0 + $0x118] sm:$0xff]   ;;  %v7809_v43 = vld [vmem:[%s11322_s0 + $0x120] sm:$0xff]   ;;  %v7810_v44 = vld [vmem:[%s11322_s0 + $0x128] sm:$0xff]  }
   0xe   :  { %v7811_v45 = vld [vmem:[%s11322_s0 + $0x130] sm:$0xff]   ;;  %v7812_v46 = vld [vmem:[%s11322_s0 + $0x138] sm:$0xff]   ;;  %v7813_v47 = vld [vmem:[%s11322_s0 + $0x140] sm:$0xff]  }
   0xf   :  { %v7814_v48 = vld [vmem:[%s11322_s0 + $0x148] sm:$0xff]   ;;  %v7815_v49 = vld [vmem:[%s11322_s0 + $0x150] sm:$0xff]   ;;  %v7816_v50 = vld [vmem:[%s11322_s0 + $0x158] sm:$0xff]  }
  0x10   :  { %v7817_v51 = vld [vmem:[%s11322_s0 + $0x160] sm:$0xff]   ;;  %v7818_v52 = vld [vmem:[%s11322_s0 + $0x168] sm:$0xff]   ;;  %v7819_v53 = vld [vmem:[%s11322_s0 + $0x170] sm:$0xff]  }
  0x11   :  { %7540 = vmatmul.mubr.msk.bf16.gmra.mrb[4].mxu0 %vm737_vm2, %v7776_v8  ;;  %v7820_v54 = vld [vmem:[%s11322_s0 + $0x178] sm:$0xff]   ;;  %v7821_v55 = vld [vmem:[%s11322_s0 + $0x180] sm:$0xff]   ;;  %v7822_v56 = vld [vmem:[%s11322_s0 + $0x188] sm:$0xff]  }
  0x12   :  { %7543 = vmatprep.mubr.msk.bf16.mxu0 %vm737_vm2, %v7777_v9  ;;  %v7823_v57 = vld [vmem:[%s11322_s0 + $0x190] sm:$0xff]   ;;  %v7824_v58 = vld [vmem:[%s11322_s0 + $0x198] sm:$0xff]   ;;  %v7825_v60 = vld [vmem:[%s11322_s0 + $0x1a0] sm:$0xff]  }
  0x13   :  { %v7826_v62 = vld [vmem:[%s11322_s0 + $0x1a8] sm:$0xff]   ;;  %v237_v0 = vld [vmem:[%s11323_s2] sm:$0x7]  ;;  %v7827_v1 = vld [vmem:[%s11322_s0 + $0x1b0] sm:$0xff]  }
  0x14   :  { %v8280_v2 = vrot.slane %v237_v0, %v8270_v63  ;;  %v7828_v5 = vld [vmem:[%s11322_s0 + $0x1b8] sm:$0xff]   ;;  %v7829_v9 = vld [vmem:[%s11322_s0 + $0x1c0] sm:$0xff]  }
  0x19   :  { %7544 = vmatmul.mubr.msk.bf16.gmra.mrb[8].mxu0 %vm737_vm2, %v7778_v10 }
  0x1a   :  { %7547 = vmatprep.mubr.msk.bf16.mxu0 %vm737_vm2, %v7779_v11 }
  0x21   :  { %7548 = vmatmul.mubr.msk.bf16.gmra.mrb[12].mxu0 %vm737_vm2, %v7780_v12  ;;  %v8296_v12 = vrot.slane %v237_v0, %v8282_v3 }
  0x22   :  { %7551 = vmatprep.mubr.msk.bf16.mxu0 %vm737_vm2, %v7781_v13  ;;  %v7859_v13 = vld [vmem:[%s11324_s3] sm:$0xff]  }
  0x23   :  { %4299 = vmatpush1.bf16.msra.mxu1 %v7859_v13 }
  0x24   :  { %4300 = vmatprep.subr.bf16.mxu1 %v11333_v30 }
  0x29   :  { %7552 = vmatmul.mubr.msk.bf16.gmra.mrb[16].mxu0 %vm737_vm2, %v7782_v14 }
  0x2a   :  { %7555 = vmatprep.mubr.msk.bf16.mxu0 %vm737_vm2, %v7783_v15 }
  0x31   :  { %7556 = vmatmul.mubr.msk.bf16.gmra.mrb[20].mxu0 %vm737_vm2, %v7784_v16 }
  0x32   :  { %7559 = vmatprep.mubr.msk.bf16.mxu0 %vm737_vm2, %v7785_v17 }
  0x39   :  { %7560 = vmatmul.mubr.msk.bf16.gmra.mrb[24].mxu0 %vm737_vm2, %v7786_v18 }
  0x3a   :  { %7563 = vmatprep.mubr.msk.bf16.mxu0 %vm737_vm2, %v7787_v19  ;;  %v8304_v19 = vrot.slane %v237_v0, %v8288_v6 }
  0x41   :  { %7564 = vmatmul.mubr.msk.bf16.gmra.mrb[28].mxu0 %vm737_vm2, %v7788_v20 }
  0x42   :  { %7567 = vmatprep.mubr.msk.bf16.mxu0 %vm737_vm2, %v7789_v21 }
  0x49   :  { %7568 = vmatmul.mubr.msk.bf16.gmra.mrb[32].mxu0 %vm737_vm2, %v7790_v22  ;;  %v7860_v22 = vld [vmem:[%s11324_s3 + $0x8] sm:$0xff]  }
  0x4a   :  { %7571 = vmatprep.mubr.msk.bf16.mxu0 %vm737_vm2, %v7791_v23  ;;  %4301 = vmatpush1.bf16.msra.mxu1 %v7860_v22 }
  0x4b   :  { %4302 = vmatprep.subr.bf16.mxu1 %v11333_v30 }
  0x51   :  { %7572 = vmatmul.mubr.msk.bf16.gmra.mrb[36].mxu0 %vm737_vm2, %v7792_v24 }
  0x52   :  { %7575 = vmatprep.mubr.msk.bf16.mxu0 %vm737_vm2, %v7793_v25 }
  0x59   :  { %7576 = vmatmul.mubr.msk.bf16.gmra.mrb[40].mxu0 %vm737_vm2, %v7794_v26 }
  0x5a   :  { %7579 = vmatprep.mubr.msk.bf16.mxu0 %vm737_vm2, %v7795_v27 }
  0x61   :  { %7580 = vmatmul.mubr.msk.bf16.gmra.mrb[44].mxu0 %vm737_vm2, %v7796_v28 }
  0x62   :  { %7583 = vmatprep.mubr.msk.bf16.mxu0 %vm737_vm2, %v7797_v29 }
  0x69   :  { %7584 = vmatmul.mubr.msk.bf16.gmra.mrb[48].mxu0 %vm737_vm2, %v7798_v32 }
  0x6a   :  { %7587 = vmatprep.mubr.msk.bf16.mxu0 %vm737_vm2, %v7799_v33 }
  0x71   :  { %7588 = vmatmul.mubr.msk.bf16.gmra.mrb[52].mxu0 %vm737_vm2, %v7800_v34 }
  0x72   :  { %7591 = vmatprep.mubr.msk.bf16.mxu0 %vm737_vm2, %v7801_v35 }
  0x79   :  { %7592 = vmatmul.mubr.msk.bf16.gmra.mrb[56].mxu0 %vm737_vm2, %v7802_v36 }
  0x7a   :  { %7595 = vmatprep.mubr.msk.bf16.mxu0 %vm737_vm2, %v7803_v37  ;;  %v7830_v37 = vld [vmem:[%s11322_s0 + $0x1c8] sm:$0xff]  }
  0x81   :  { %7596 = vmatmul.mubr.msk.bf16.gmra.mrb[60].mxu0 %vm737_vm2, %v7804_v38 }
  0x82   :  { %7599 = vmatprep.mubr.msk.bf16.mxu0 %vm737_vm2, %v7805_v39  ;;  %v7863_v39 = vld [vmem:[%s11324_s3 + $0x10] sm:$0xff]  }
  0x83   :  { %4303 = vmatpush1.bf16.msra.mxu1 %v7863_v39 }
  0x84   :  { %4304 = vmatprep.subr.bf16.mxu1 %v11333_v30 }
  0x89   :  { %7600 = vmatmul.mubr.msk.bf16.gmra.mrb[64].mxu0 %vm737_vm2, %v7806_v40  ;;  %v8327_v40 = vunpack.c.l.b16 %v11333_v30 }
  0x8a   :  { %7603 = vmatprep.mubr.msk.bf16.mxu0 %vm737_vm2, %v7807_v41 }
  0x91   :  { %7604 = vmatmul.mubr.msk.bf16.gmra.mrb[68].mxu0 %vm737_vm2, %v7808_v42 }
  0x92   :  { %7607 = vmatprep.mubr.msk.bf16.mxu0 %vm737_vm2, %v7809_v43 }
  0x99   :  { %7608 = vmatmul.mubr.msk.bf16.gmra.mrb[72].mxu0 %vm737_vm2, %v7810_v44  ;;  %v7831_v44 = vld [vmem:[%s11322_s0 + $0x1d0] sm:$0xff]  }
  0x9a   :  { %7611 = vmatprep.mubr.msk.bf16.mxu0 %vm737_vm2, %v7811_v45 }
  0xa1   :  { %7612 = vmatmul.mubr.msk.bf16.gmra.mrb[76].mxu0 %vm737_vm2, %v7812_v46 }
  0xa2   :  { %7615 = vmatprep.mubr.msk.bf16.mxu0 %vm737_vm2, %v7813_v47 }
  0xa9   :  { %7616 = vmatmul.mubr.msk.bf16.gmra.mrb[80].mxu0 %vm737_vm2, %v7814_v48 }
  0xaa   :  { %7619 = vmatprep.mubr.msk.bf16.mxu0 %vm737_vm2, %v7815_v49 }
  0xb1   :  { %7620 = vmatmul.mubr.msk.bf16.gmra.mrb[84].mxu0 %vm737_vm2, %v7816_v50 }
  0xb2   :  { %7623 = vmatprep.mubr.msk.bf16.mxu0 %vm737_vm2, %v7817_v51 }
  0xb9   :  { %7624 = vmatmul.mubr.msk.bf16.gmra.mrb[88].mxu0 %vm737_vm2, %v7818_v52 }
  0xba   :  { %7627 = vmatprep.mubr.msk.bf16.mxu0 %vm737_vm2, %v7819_v53 }
  0xc1   :  { %7628 = vmatmul.mubr.msk.bf16.gmra.mrb[92].mxu0 %vm737_vm2, %v7820_v54 }
  0xc2   :  { %7631 = vmatprep.mubr.msk.bf16.mxu0 %vm737_vm2, %v7821_v55  ;;  %v7864_v55 = vld [vmem:[%s11324_s3 + $0x18] sm:$0xff]  }
  0xc3   :  { %4305 = vmatpush1.bf16.msra.mxu1 %v7864_v55 }
  0xc4   :  { %4306 = vmatprep.subr.bf16.mxu1 %v11333_v30 }
  0xc9   :  { %7632 = vmatmul.mubr.msk.bf16.gmra.mrb[96].mxu0 %vm737_vm2, %v7822_v56 }
  0xca   :  { %7635 = vmatprep.mubr.msk.bf16.mxu0 %vm737_vm2, %v7823_v57 }
  0xd1   :  { %7636 = vmatmul.mubr.msk.bf16.gmra.mrb[100].mxu0 %vm737_vm2, %v7824_v58 }
  0xd2   :  { %7639 = vmatprep.mubr.msk.bf16.mxu0 %vm737_vm2, %v7825_v60 }
  0xd9   :  { %7640 = vmatmul.mubr.msk.bf16.gmra.mrb[104].mxu0 %vm737_vm2, %v7826_v62 }
  0xda   :  { %7643 = vmatprep.mubr.msk.bf16.mxu0 %vm737_vm2, %v7827_v1 }
  0xdc   :  { %v7537_v4 = vpop.f32.mrb[0].mxu0 }
  0xdd   :  { %v1082_v7 = vadd.f32 %v7537_v4, %v8280_v2  ;;  %v1073_v8 = vpop.f32.mrb[1].mxu0 }
  0xde   :  { %v1074_v10 = vadd.f32 %v1073_v8, %v8280_v2  ;;  %v7538_v11 = vpop.f32.mrb[2].mxu0 }
  0xdf   :  { %vm1858_vm3 = vcmp.gt.f32.partialorder %v1082_v7, 0.0  ;;  %v2054_v14 = vmul.f32 0.2, %v1082_v7  ;;  %v1085_v15 = vadd.f32 %v7538_v11, %v8280_v2  ;;  %v1076_v16 = vpop.f32.mrb[3].mxu0  ;;  %v7832_v11 = vld [vmem:[%s11322_s0 + $0x1d8] sm:$0xff]  }
  0xe0   :  { %vm1856_vm4 = vcmp.gt.f32.partialorder %v1074_v10, 0.0  ;;  %v2052_v17 = vmul.f32 0.2, %v1074_v10  ;;  %v1077_v18 = vadd.f32 %v1076_v16, %v8280_v2 }
  0xe1   :  { %v2250_v20 = vsel %vm1858_vm3, %v1082_v7, %v2054_v14  ;;  %vm1859_vm5 = vcmp.gt.f32.partialorder %v1085_v15, 0.0  ;;  %v2055_v21 = vmul.f32 0.2, %v1085_v15  ;;  %7644 = vmatmul.mubr.msk.bf16.gmra.mrb[108].mxu0 %vm737_vm2, %v7828_v5  ;;  %v7867_v14 = vld [vmem:[%s11324_s3 + $0x20] sm:$0xff]  }
  0xe2   :  { %v2248_v23 = vsel %vm1856_vm4, %v1074_v10, %v2052_v17  ;;  %vm1857_vm6 = vcmp.gt.f32.partialorder %v1077_v18, 0.0  ;;  %v2053_v24 = vmul.f32 0.2, %v1077_v18  ;;  %7647 = vmatprep.mubr.msk.bf16.mxu0 %vm737_vm2, %v7829_v9  ;;  %v2450_v25 = vmul.f32 %v8296_v12, %v2250_v20  ;;  %4307 = vmatpush1.bf16.msra.mxu1 %v7867_v14 }
  0xe3   :  { %v2251_v26 = vsel %vm1859_vm5, %v1085_v15, %v2055_v21  ;;  %v2448_v27 = vmul.f32 %v8296_v12, %v2248_v23  ;;  %4308 = vmatprep.subr.bf16.mxu1 %v11333_v30 }
  0xe4   :  { %v2451_v28 = vmul.f32 %v8296_v12, %v2251_v26  ;;  %v2249_v29 = vsel %vm1857_vm6, %v1077_v18, %v2053_v24  ;;  %v7541_v32 = vpop.f32.mrb[4].mxu0  ;;  %v2650_v33 = vadd.f32 %v8304_v19, %v2450_v25  ;;  %v7833_v18 = vld [vmem:[%s11322_s0 + $0x1e0] sm:$0xff]   ;;  %vm3784_vm6 = vcmask 130048  }
  0xe5   :  { %v2449_v34 = vmul.f32 %v8296_v12, %v2249_v29  ;;  %v1098_v35 = vadd.f32 %v7541_v32, %v8280_v2  ;;  %v1089_v36 = vpop.f32.mrb[5].mxu0  ;;  %v2648_v38 = vadd.f32 %v8304_v19, %v2448_v27  ;;  %v7868_v29 = vld [vmem:[%s11324_s3 + $0x28] sm:$0xff]  }
  0xe6   :  { %v1090_v41 = vadd.f32 %v1089_v36, %v8280_v2  ;;  %v7542_v42 = vpop.f32.mrb[6].mxu0  ;;  %v8331_v43 = vadd.f32 %v8304_v19, %v2451_v28  ;;  %4309 = vmatpush1.bf16.msra.mxu1 %v7868_v29 }
  0xe7   :  { %vm1862_vm7 = vcmp.gt.f32.partialorder %v1098_v35, 0.0  ;;  %v2058_v45 = vmul.f32 0.2, %v1098_v35  ;;  %v1101_v46 = vadd.f32 %v7542_v42, %v8280_v2  ;;  %v1092_v47 = vpop.f32.mrb[7].mxu0  ;;  %v2649_v48 = vadd.f32 %v8304_v19, %v2449_v34  ;;  %4310 = vmatprep.subr.bf16.mxu1 %v11333_v30 }
  0xe8   :  { %vm1860_vm8 = vcmp.gt.f32.partialorder %v1090_v41, 0.0  ;;  %v2056_v49 = vmul.f32 0.2, %v1090_v41  ;;  %v1093_v50 = vadd.f32 %v1092_v47, %v8280_v2  ;;  %v7126_v51 = vpack.c.bf16 %v2650_v33, %v2648_v38 }
  0xe9   :  { %v2254_v52 = vsel %vm1862_vm7, %v1098_v35, %v2058_v45  ;;  %vm1863_vm9 = vcmp.gt.f32.partialorder %v1101_v46, 0.0  ;;  %v2059_v53 = vmul.f32 0.2, %v1101_v46  ;;  %7648 = vmatmul.mubr.msk.bf16.gmra.mrb[112].mxu0 %vm737_vm2, %v7830_v37  ;;  %v2844_v54 = vpack.c.bf16 %v2649_v48, %v2648_v38 }
  0xea   :  { %v2454_v56 = vmul.f32 %v8296_v12, %v2254_v52  ;;  %v2252_v57 = vsel %vm1860_vm8, %v1090_v41, %v2056_v49  ;;  %vm1861_vm10 = vcmp.gt.f32.partialorder %v1093_v50, 0.0  ;;  %v2057_v58 = vmul.f32 0.2, %v1093_v50  ;;  %3515 = vrot.lane.b32.xlu1 %v7126_v51, %s7978_s16  ;;  %7651 = vmatprep.mubr.msk.bf16.mxu0 %vm737_vm2, %v7831_v44  ;;  %v7871_v49 = vld [vmem:[%s11324_s3 + $0x30] sm:$0xff]  }
  0xeb   :  { %v2452_v59 = vmul.f32 %v8296_v12, %v2252_v57  ;;  %v2255_v60 = vsel %vm1863_vm9, %v1101_v46, %v2059_v53  ;;  %v7151_v61 = vpack.c.bf16 %v8331_v43, %v2649_v48  ;;  %v3041_v62 = vunpack.c.h.b16 %v2844_v54  ;;  %v7835_v52 = vld [vmem:[%s11322_s0 + $0x1f0] sm:$0xff]   ;;  %4311 = vmatpush1.bf16.msra.mxu1 %v7871_v49 }
  0xec   :  { %v2455_v0 = vmul.f32 %v8296_v12, %v2255_v60  ;;  %v2253_v1 = vsel %vm1861_vm10, %v1093_v50, %v2057_v58  ;;  %v7545_v4 = vpop.f32.mrb[8].mxu0  ;;  %v2654_v5 = vadd.f32 %v8304_v19, %v2454_v56  ;;  %4312 = vmatprep.subr.bf16.mxu1 %v11333_v30 }
  0xed   :  { %v2453_v7 = vmul.f32 %v8296_v12, %v2253_v1  ;;  %3590 = vrot.lane.b32.xlu0 %v7151_v61, %s7979_s17  ;;  %v1114_v8 = vadd.f32 %v7545_v4, %v8280_v2  ;;  %v1105_v9 = vpop.f32.mrb[9].mxu0  ;;  %v3415_v10 = vpack.c.b16 %v3041_v62, %v8327_v40  ;;  %v2652_v13 = vadd.f32 %v8304_v19, %v2452_v59  ;;  %v7872_v62 = vld [vmem:[%s11324_s3 + $0x38] sm:$0xff]  }
  0xee   :  { %v1106_v15 = vadd.f32 %v1105_v9, %v8280_v2  ;;  %v7546_v16 = vpop.f32.mrb[10].mxu0  ;;  %v8364_v17 = vadd.f32 %v8304_v19, %v2455_v0 }
  0xef   :  { %vm1866_vm11 = vcmp.gt.f32.partialorder %v1114_v8, 0.0  ;;  %v2062_v20 = vmul.f32 0.2, %v1114_v8  ;;  %v1117_v21 = vadd.f32 %v7546_v16, %v8280_v2  ;;  %v1108_v22 = vpop.f32.mrb[11].mxu0  ;;  %3440 = vrot.lane.b32.xlu1 %v3415_v10, %s7980_s23  ;;  %v7127_v23 = vpack.c.bf16 %v2654_v5, %v2652_v13  ;;  %4313 = vmatpush1.bf16.msra.mxu1 %v7872_v62  ;;  %v7875_v13 = vld [vmem:[%s11324_s3 + $0x40] sm:$0xff]  }
  0xf0   :  { %vm1864_vm12 = vcmp.gt.f32.partialorder %v1106_v15, 0.0  ;;  %v2060_v24 = vmul.f32 0.2, %v1106_v15  ;;  %v1109_v25 = vadd.f32 %v1108_v22, %v8280_v2  ;;  %v2653_v26 = vadd.f32 %v8304_v19, %v2453_v7  ;;  %4314 = vmatprep.subr.bf16.mxu1 %v11333_v30 }
  0xf1   :  { %v2258_v27 = vsel %vm1866_vm11, %v1114_v8, %v2062_v20  ;;  %vm1867_vm13 = vcmp.gt.f32.partialorder %v1117_v21, 0.0  ;;  %v2063_v28 = vmul.f32 0.2, %v1117_v21  ;;  %7652 = vmatmul.mubr.msk.bf16.gmra.mrb[116].mxu0 %vm737_vm2, %v7832_v11  ;;  %3517 = vrot.lane.b32.xlu0 %v7127_v23, %s7978_s16  ;;  %v7836_v11 = vld [vmem:[%s11322_s0 + $0x1f8] sm:$0xff]   ;;  %v7837_v20 = vld [vmem:[%s11322_s0 + $0x200] sm:$0xff]  }
  0xf2   :  { %v2458_v32 = vmul.f32 %v8296_v12, %v2258_v27  ;;  %v2256_v33 = vsel %vm1864_vm12, %v1106_v15, %v2060_v24  ;;  %vm1865_vm14 = vcmp.gt.f32.partialorder %v1109_v25, 0.0  ;;  %v2061_v34 = vmul.f32 0.2, %v1109_v25  ;;  %7655 = vmatprep.mubr.msk.bf16.mxu0 %vm737_vm2, %v7833_v18 }
  0xf3   :  { %v2456_v35 = vmul.f32 %v8296_v12, %v2256_v33  ;;  %v2259_v36 = vsel %vm1867_vm13, %v1117_v21, %v2063_v28  ;;  %v7108_v37 = vpack.c.bf16 %v2653_v26, %v8331_v43  ;;  %v7152_v38 = vpack.c.bf16 %v8364_v17, %v2653_v26  ;;  %v7834_v43 = vld [vmem:[%s11322_s0 + $0x1e8] sm:$0xff]   ;;  %4315 = vmatpush1.bf16.msra.mxu1 %v7875_v13 }
  0xf4   :  { %v2459_v39 = vmul.f32 %v8296_v12, %v2259_v36  ;;  %v2257_v41 = vsel %vm1865_vm14, %v1109_v25, %v2061_v34  ;;  %v7549_v42 = vpop.f32.mrb[12].mxu0  ;;  %v2658_v44 = vadd.f32 %v8304_v19, %v2458_v32 }
  0xf5   :  { %v2457_v45 = vmul.f32 %v8296_v12, %v2257_v41  ;;  %3442 = vrot.lane.b32.xlu1 %v7108_v37, %s7980_s23  ;;  %v1130_v46 = vadd.f32 %v7549_v42, %v8280_v2  ;;  %v1121_v47 = vpop.f32.mrb[13].mxu0  ;;  %v2656_v48 = vadd.f32 %v8304_v19, %v2456_v35 }
  0xf6   :  { %v7550_v50 = vpop.f32.mrb[14].mxu0  ;;  %v2659_v51 = vadd.f32 %v8304_v19, %v2459_v39  ;;  %v8427_v14 = vadd.f32 %v1121_v47, %v8280_v2 }
  0xf7   :  { %vm1870_vm15 = vcmp.gt.f32.partialorder %v1130_v46, 0.0  ;;  %v2066_v53 = vmul.f32 0.2, %v1130_v46  ;;  %v1133_v54 = vadd.f32 %v7550_v50, %v8280_v2  ;;  %v8403_v55 = vpop.f32.mrb[15].mxu0  ;;  %v2657_v56 = vadd.f32 %v8304_v19, %v2457_v45 }
  0xf8   :  { %v7128_v57 = vpack.c.bf16 %v2658_v44, %v2656_v48  ;;  %v2849_v4 = vpack.c.bf16 %v2659_v51, %v2658_v44  ;;  %vm1868_vm7 = vcmp.gt.f32.partialorder %v8427_v14, 0.0  ;;  %v2064_v50 = vmul.f32 0.2, %v8427_v14 }
  0xf9   :  { %v2262_v58 = vsel %vm1870_vm15, %v1130_v46, %v2066_v53  ;;  %vm1871_vm0 = vcmp.gt.f32.partialorder %v1133_v54, 0.0  ;;  %v2067_v59 = vmul.f32 0.2, %v1133_v54  ;;  %3592 = vrot.lane.b32.xlu1 %v7152_v38, %s7979_s17  ;;  %7656 = vmatmul.mubr.msk.bf16.gmra.mrb[120].mxu0 %vm737_vm2, %v7834_v43  ;;  %v7109_v60 = vpack.c.bf16 %v2657_v56, %v8364_v17  ;;  %v7838_v43 = vld [vmem:[%s11322_s0 + $0x208] sm:$0xff]  }
  0xfa   :  { %v2462_v61 = vmul.f32 %v8296_v12, %v2262_v58  ;;  %7659 = vmatprep.mubr.msk.bf16.mxu0 %vm737_vm2, %v7835_v52  ;;  %v7153_v1 = vpack.c.bf16 %v2659_v51, %v2657_v56  ;;  %v3051_v10 = vunpack.c.h.b16 %v2849_v4  ;;  %v8467_v51 = vadd.f32 %v8403_v55, %v8280_v2  ;;  %v7839_v56 = vld [vmem:[%s11322_s0 + $0x210] sm:$0xff]  }
  0xfb   :  { %v2263_v0 = vsel %vm1871_vm0, %v1133_v54, %v2067_v59  ;;  %3444 = vrot.lane.b32.xlu0 %v7109_v60, %s7980_s23 }
  0xfc   :  { %v2463_v5 = vmul.f32 %v8296_v12, %v2263_v0  ;;  %v7553_v7 = vpop.f32.mrb[16].mxu0  ;;  %v8431_v17 = vadd.f32 %v8304_v19, %v2462_v61  ;;  %v3418_v24 = vpack.c.b16 %v8327_v40, %v3051_v10  ;;  %vm1869_vm12 = vcmp.gt.f32.partialorder %v8467_v51, 0.0 }
  0xfd   :  { %3519 = vrot.lane.b32.xlu1 %v7128_v57, %s7978_s16  ;;  %v1146_v8 = vadd.f32 %v7553_v7, %v8280_v2  ;;  %v1137_v9 = vpop.f32.mrb[17].mxu0 }
  0xfe   :  { %v1138_v15 = vadd.f32 %v1137_v9, %v8280_v2  ;;  %v7554_v16 = vpop.f32.mrb[18].mxu0  ;;  %v8434_v18 = vadd.f32 %v8304_v19, %v2463_v5 }
  0xff   :  { %vm1874_vm1 = vcmp.gt.f32.partialorder %v1146_v8, 0.0  ;;  %v2070_v21 = vmul.f32 0.2, %v1146_v8  ;;  %v1149_v22 = vadd.f32 %v7554_v16, %v8280_v2  ;;  %v1140_v23 = vpop.f32.mrb[19].mxu0  ;;  %3594 = vrot.lane.b32.xlu0 %v7153_v1, %s7979_s17 }
 0x100   :  { %vm1872_vm3 = vcmp.gt.f32.partialorder %v1138_v15, 0.0  ;;  %v2068_v25 = vmul.f32 0.2, %v1138_v15  ;;  %v1141_v26 = vadd.f32 %v1140_v23, %v8280_v2  ;;  %v2851_v27 = vpack.c.bf16 %v8434_v18, %v8431_v17 }
 0x101   :  { %v2266_v28 = vsel %vm1874_vm1, %v1146_v8, %v2070_v21  ;;  %vm1875_vm4 = vcmp.gt.f32.partialorder %v1149_v22, 0.0  ;;  %v2071_v29 = vmul.f32 0.2, %v1149_v22  ;;  %3446 = vrot.lane.b32.xlu1 %v3418_v24, %s7980_s23  ;;  %7660 = vmatmul.mubr.msk.bf16.gmra.mrb[124].mxu0 %vm737_vm2, %v7836_v11 }
 0x102   :  { %v2466_v32 = vmul.f32 %v8296_v12, %v2266_v28  ;;  %v2264_v33 = vsel %vm1872_vm3, %v1138_v15, %v2068_v25  ;;  %vm1873_vm5 = vcmp.gt.f32.partialorder %v1141_v26, 0.0  ;;  %v2069_v34 = vmul.f32 0.2, %v1141_v26  ;;  %7663 = vmatprep.mubr.msk.bf16.mxu0 %vm737_vm2, %v7837_v20 }
 0x103   :  { %v2464_v35 = vmul.f32 %v8296_v12, %v2264_v33  ;;  %v2267_v36 = vsel %vm1875_vm4, %v1149_v22, %v2071_v29  ;;  %v6724_v37 = vcombine.low %v11333_v30, %v2851_v27  ;;  %v3055_v38 = vunpack.c.h.b16 %v2851_v27  ;;  %v7841_v29 = vld [vmem:[%s11322_s0 + $0x220] sm:$0xff]  }
 0x104   :  { %v2467_v39 = vmul.f32 %v8296_v12, %v2267_v36  ;;  %v2265_v41 = vsel %vm1873_vm5, %v1141_v26, %v2069_v34  ;;  %v7557_v42 = vpop.f32.mrb[20].mxu0  ;;  %v8454_v44 = vadd.f32 %v8304_v19, %v2466_v32  ;;  %v2260_v15 = vsel %vm1868_vm7, %v8427_v14, %v2064_v50  ;;  %v7840_v14 = vld [vmem:[%s11322_s0 + $0x218] sm:$0xff]  }
 0x105   :  { %v1162_v45 = vadd.f32 %v7557_v42, %v8280_v2  ;;  %3303 = vrot.lane.b32.xlu1 %v6724_v37, %s7976_s28  ;;  %v1153_v46 = vpop.f32.mrb[21].mxu0  ;;  %v3347_v47 = vpack.c.b16 %v3055_v38, %v8327_v40  ;;  %v2664_v48 = vadd.f32 %v8304_v19, %v2464_v35  ;;  %v2465_v49 = vmul.f32 %v8296_v12, %v2265_v41 }
 0x106   :  { %v1154_v52 = vadd.f32 %v1153_v46, %v8280_v2  ;;  %v7558_v53 = vpop.f32.mrb[22].mxu0  ;;  %v8471_v54 = vadd.f32 %v8304_v19, %v2467_v39  ;;  %v2065_v25 = vmul.f32 0.2, %v8467_v51 }
 0x107   :  { %vm1878_vm8 = vcmp.gt.f32.partialorder %v1162_v45, 0.0  ;;  %v2074_v57 = vmul.f32 0.2, %v1162_v45  ;;  %v1165_v58 = vadd.f32 %v7558_v53, %v8280_v2  ;;  %3371 = vrot.lane.b32.xlu0 %v3347_v47, %s7977_s14  ;;  %v1156_v59 = vpop.f32.mrb[23].mxu0  ;;  %v7179_v55 = vpack.c.bf16 %v2664_v48, %v8431_v17 }
 0x108   :  { %vm1876_vm9 = vcmp.gt.f32.partialorder %v1154_v52, 0.0  ;;  %v2072_v60 = vmul.f32 0.2, %v1154_v52  ;;  %v1157_v61 = vadd.f32 %v1156_v59, %v8280_v2  ;;  %v2665_v62 = vadd.f32 %v8304_v19, %v2465_v49 }
 0x109   :  { %v2270_v0 = vsel %vm1878_vm8, %v1162_v45, %v2074_v57  ;;  %vm1879_vm10 = vcmp.gt.f32.partialorder %v1165_v58, 0.0  ;;  %v2075_v1 = vmul.f32 0.2, %v1165_v58  ;;  %3649 = vrot.lane.b32.xlu1 %v3347_v47, %s7981_s26  ;;  %7664 = vmatmul.mubr.msk.bf16.gmra.mrb[128].mxu0 %vm737_vm2, %v7838_v43  ;;  %v7066_v4 = vpack.c.bf16 %v8454_v44, %v2664_v48 }
 0x10a   :  { %v2470_v5 = vmul.f32 %v8296_v12, %v2270_v0  ;;  %v2268_v7 = vsel %vm1876_vm9, %v1154_v52, %v2072_v60  ;;  %vm1877_vm11 = vcmp.gt.f32.partialorder %v1157_v61, 0.0  ;;  %v2073_v8 = vmul.f32 0.2, %v1157_v61  ;;  %7667 = vmatprep.mubr.msk.bf16.mxu0 %vm737_vm2, %v7839_v56 }
 0x10b   :  { %v2468_v9 = vmul.f32 %v8296_v12, %v2268_v7  ;;  %v2271_v10 = vsel %vm1879_vm10, %v1165_v58, %v2075_v1  ;;  %3724 = vrot.lane.b32.xlu0 %v7179_v55, %s7982_s27  ;;  %v8489_v11 = vpack.c.bf16 %v2665_v62, %v8434_v18  ;;  %v7087_v13 = vpack.c.bf16 %v8471_v54, %v2665_v62  ;;  %v7842_v55 = vld [vmem:[%s11322_s0 + $0x228] sm:$0xff]   ;;  %v7843_v1 = vld [vmem:[%s11322_s0 + $0x230] sm:$0xff]  }
 0x10c   :  { %v2471_v16 = vmul.f32 %v8296_v12, %v2271_v10  ;;  %v2269_v17 = vsel %vm1877_vm11, %v1157_v61, %v2073_v8  ;;  %v7561_v20 = vpop.f32.mrb[24].mxu0  ;;  %v8497_v21 = vadd.f32 %v8304_v19, %v2470_v5  ;;  %v2261_v60 = vsel %vm1869_vm12, %v8467_v51, %v2065_v25 }
 0x10d   :  { %v2469_v22 = vmul.f32 %v8296_v12, %v2269_v17  ;;  %6882 = vmatprep.mubr.msk.bf16.mxu1 %vm3784_vm6, %v8489_v11  ;;  %v1178_v18 = vadd.f32 %v7561_v20, %v8280_v2  ;;  %3373 = vrot.lane.b32.xlu1 %v7087_v13, %s7977_s14  ;;  %v1169_v23 = vpop.f32.mrb[25].mxu0  ;;  %v2668_v24 = vadd.f32 %v8304_v19, %v2468_v9 }
 0x10e   :  { %v1170_v26 = vadd.f32 %v1169_v23, %v8280_v2  ;;  %v7562_v27 = vpop.f32.mrb[26].mxu0  ;;  %v8512_v28 = vadd.f32 %v8304_v19, %v2471_v16  ;;  %v2461_v17 = vmul.f32 %v8296_v12, %v2261_v60 }
 0x10f   :  { %vm1882_vm13 = vcmp.gt.f32.partialorder %v1178_v18, 0.0  ;;  %v2078_v32 = vmul.f32 0.2, %v1178_v18  ;;  %v1181_v33 = vadd.f32 %v7562_v27, %v8280_v2  ;;  %3305 = vrot.lane.b32.xlu0 %v7066_v4, %s7976_s28  ;;  %v1172_v34 = vpop.f32.mrb[27].mxu0  ;;  %v7180_v35 = vpack.c.bf16 %v2668_v24, %v8454_v44 }
 0x110   :  { %vm1880_vm14 = vcmp.gt.f32.partialorder %v1170_v26, 0.0  ;;  %v2076_v36 = vmul.f32 0.2, %v1170_v26  ;;  %v1173_v37 = vadd.f32 %v1172_v34, %v8280_v2  ;;  %v7067_v38 = vpack.c.bf16 %v8497_v21, %v2668_v24 }
 0x111   :  { %v2274_v39 = vsel %vm1882_vm13, %v1178_v18, %v2078_v32  ;;  %vm1883_vm15 = vcmp.gt.f32.partialorder %v1181_v33, 0.0  ;;  %v2079_v41 = vmul.f32 0.2, %v1181_v33  ;;  %7668 = vmatmul.mubr.msk.bf16.gmra.mrb[132].mxu0 %vm737_vm2, %v7840_v14  ;;  %3726 = vrot.lane.b32.xlu1 %v7180_v35, %s7982_s27  ;;  %v2669_v42 = vadd.f32 %v8304_v19, %v2469_v22  ;;  %v7844_v35 = vld [vmem:[%s11322_s0 + $0x238] sm:$0xff]  }
 0x112   :  { %v2474_v45 = vmul.f32 %v8296_v12, %v2274_v39  ;;  %v2272_v46 = vsel %vm1880_vm14, %v1170_v26, %v2076_v36  ;;  %vm1881_vm0 = vcmp.gt.f32.partialorder %v1173_v37, 0.0  ;;  %v2077_v44 = vmul.f32 0.2, %v1173_v37  ;;  %7671 = vmatprep.mubr.msk.bf16.mxu0 %vm737_vm2, %v7841_v29 }
 0x113   :  { %v2472_v47 = vmul.f32 %v8296_v12, %v2272_v46  ;;  %v2275_v43 = vsel %vm1883_vm15, %v1181_v33, %v2079_v41  ;;  %3651 = vrot.lane.b32.xlu0 %v7087_v13, %s7981_s26  ;;  %v7088_v48 = vpack.c.bf16 %v8512_v28, %v2669_v42  ;;  %v8531_v49 = vpack.c.bf16 %v2669_v42, %v8471_v54  ;;  %v7845_v42 = vld [vmem:[%s11322_s0 + $0x240] sm:$0xff]  }
 0x114   :  { %v2475_v50 = vmul.f32 %v8296_v12, %v2275_v43  ;;  %v2273_v52 = vsel %vm1881_vm0, %v1173_v37, %v2077_v44  ;;  %v7565_v53 = vpop.f32.mrb[28].mxu0  ;;  %v2460_v54 = vmul.f32 %v8296_v12, %v2260_v15  ;;  %v8556_v51 = vadd.f32 %v8304_v19, %v2474_v45 }
 0x115   :  { %v2672_v56 = vadd.f32 %v8304_v19, %v2472_v47  ;;  %v2473_v57 = vmul.f32 %v8296_v12, %v2273_v52  ;;  %v1194_v58 = vadd.f32 %v7565_v53, %v8280_v2  ;;  %v1185_v59 = vpop.f32.mrb[29].mxu0  ;;  %3307 = vrot.lane.b32.xlu1 %v7067_v38, %s7976_s28 }
 0x116   :  { %v1186_v61 = vadd.f32 %v1185_v59, %v8280_v2  ;;  %v7566_v62 = vpop.f32.mrb[30].mxu0  ;;  %v8547_v0 = vadd.f32 %v8304_v19, %v2475_v50  ;;  %v2660_v41 = vadd.f32 %v8304_v19, %v2460_v54 }
 0x117   :  { %v2673_v4 = vadd.f32 %v8304_v19, %v2473_v57  ;;  %v2082_v5 = vmul.f32 0.2, %v1194_v58  ;;  %v1197_v7 = vadd.f32 %v7566_v62, %v8280_v2  ;;  %3375 = vrot.lane.b32.xlu0 %v7088_v48, %s7977_s14  ;;  %v1188_v8 = vpop.f32.mrb[31].mxu0  ;;  %v7181_v13 = vpack.c.bf16 %v2672_v56, %v8497_v21 }
 0x118   :  { %vm1884_vm1 = vcmp.gt.f32.partialorder %v1186_v61, 0.0  ;;  %v2080_v9 = vmul.f32 0.2, %v1186_v61  ;;  %v1189_v10 = vadd.f32 %v1188_v8, %v8280_v2  ;;  %vm1886_vm3 = vcmp.gt.f32.partialorder %v1194_v58, 0.0 }
 0x119   :  { %vm1887_vm4 = vcmp.gt.f32.partialorder %v1197_v7, 0.0  ;;  %v2083_v15 = vmul.f32 0.2, %v1197_v7  ;;  %7672 = vmatmul.mubr.msk.bf16.gmra.mrb[136].mxu0 %vm737_vm2, %v7842_v55  ;;  %3653 = vrot.lane.b32.xlu1 %v7088_v48, %s7981_s26  ;;  %v7089_v16 = vpack.c.bf16 %v8547_v0, %v2673_v4  ;;  %v7068_v21 = vpack.c.bf16 %v8556_v51, %v2672_v56 }
 0x11a   :  { %v2276_v20 = vsel %vm1884_vm1, %v1186_v61, %v2080_v9  ;;  %vm1885_vm5 = vcmp.gt.f32.partialorder %v1189_v10, 0.0  ;;  %v2081_v22 = vmul.f32 0.2, %v1189_v10  ;;  %7675 = vmatprep.mubr.msk.bf16.mxu0 %vm737_vm2, %v7843_v1  ;;  %v2856_v14 = vpack.c.bf16 %v2673_v4, %v2672_v56  ;;  %v7846_v9 = vld [vmem:[%s11322_s0 + $0x248] sm:$0xff]  }
 0x11b   :  { %v2476_v18 = vmul.f32 %v8296_v12, %v2276_v20  ;;  %v2279_v23 = vsel %vm1887_vm4, %v1197_v7, %v2083_v15  ;;  %3728 = vrot.lane.b32.xlu0 %v7181_v13, %s7982_s27  ;;  %v2278_v24 = vsel %vm1886_vm3, %v1194_v58, %v2082_v5  ;;  %v8571_v29 = vpack.c.bf16 %v2673_v4, %v8512_v28  ;;  %v7847_v20 = vld [vmem:[%s11322_s0 + $0x250] sm:$0xff]  }
 0x11c   :  { %v2479_v25 = vmul.f32 %v8296_v12, %v2279_v23  ;;  %v2277_v26 = vsel %vm1885_vm5, %v1189_v10, %v2081_v22  ;;  %v7569_v27 = vpop.f32.mrb[32].mxu0  ;;  %v3065_v36 = vunpack.c.h.b16 %v2856_v14  ;;  %v2661_v28 = vadd.f32 %v8304_v19, %v2461_v17 }
 0x11d   :  { %v2477_v32 = vmul.f32 %v8296_v12, %v2277_v26  ;;  %v1210_v33 = vadd.f32 %v7569_v27, %v8280_v2  ;;  %v1201_v34 = vpop.f32.mrb[33].mxu0  ;;  %3377 = vrot.lane.b32.xlu1 %v7089_v16, %s7977_s14  ;;  %v2676_v37 = vadd.f32 %v8304_v19, %v2476_v18  ;;  %v2478_v45 = vmul.f32 %v8296_v12, %v2278_v24 }
 0x11e   :  { %v1202_v38 = vadd.f32 %v1201_v34, %v8280_v2  ;;  %v7570_v39 = vpop.f32.mrb[34].mxu0  ;;  %v8590_v47 = vadd.f32 %v8304_v19, %v2479_v25  ;;  %v3640_v53 = vpack.c.b16 %v8327_v40, %v3065_v36 }
 0x11f   :  { %vm1890_vm7 = vcmp.gt.f32.partialorder %v1210_v33, 0.0  ;;  %v1213_v46 = vadd.f32 %v7570_v39, %v8280_v2  ;;  %3309 = vrot.lane.b32.xlu0 %v7068_v21, %s7976_s28  ;;  %v1204_v44 = vpop.f32.mrb[35].mxu0  ;;  %v2677_v50 = vadd.f32 %v8304_v19, %v2477_v32  ;;  %v7129_v56 = vpack.c.bf16 %v2676_v37, %v2660_v41 }
 0x120   :  { %vm1888_vm8 = vcmp.gt.f32.partialorder %v1202_v38, 0.0  ;;  %v2084_v43 = vmul.f32 0.2, %v1202_v38  ;;  %v1205_v48 = vadd.f32 %v1204_v44, %v8280_v2  ;;  %v2086_v57 = vmul.f32 0.2, %v1210_v33  ;;  %v7848_v44 = vld [vmem:[%s11322_s0 + $0x258] sm:$0xff]  }
 0x121   :  { %vm1891_vm9 = vcmp.gt.f32.partialorder %v1213_v46, 0.0  ;;  %v2087_v52 = vmul.f32 0.2, %v1213_v46  ;;  %7676 = vmatmul.mubr.msk.bf16.gmra.mrb[140].mxu0 %vm737_vm2, %v7844_v35  ;;  %v7154_v60 = vpack.c.bf16 %v2677_v50, %v2661_v28  ;;  %v7110_v61 = vpack.c.bf16 %v8590_v47, %v2677_v50 }
 0x122   :  { %v2280_v58 = vsel %vm1888_vm8, %v1202_v38, %v2084_v43  ;;  %vm1889_vm10 = vcmp.gt.f32.partialorder %v1205_v48, 0.0  ;;  %v2085_v59 = vmul.f32 0.2, %v1205_v48  ;;  %7679 = vmatprep.mubr.msk.bf16.mxu0 %vm737_vm2, %v7845_v42  ;;  %v2678_v10 = vadd.f32 %v8304_v19, %v2478_v45 }
 0x123   :  { %v2480_v55 = vmul.f32 %v8296_v12, %v2280_v58  ;;  %v2283_v54 = vsel %vm1891_vm9, %v1213_v46, %v2087_v52  ;;  %3655 = vrot.lane.b32.xlu0 %v3640_v53, %s7981_s26  ;;  %3596 = vrot.lane.b32.xlu1 %v7154_v60, %s7979_s17  ;;  %v2282_v15 = vsel %vm1890_vm7, %v1210_v33, %v2086_v57 }
 0x124   :  { %v2483_v62 = vmul.f32 %v8296_v12, %v2283_v54  ;;  %v2281_v1 = vsel %vm1889_vm10, %v1205_v48, %v2085_v59  ;;  %v7573_v4 = vpop.f32.mrb[36].mxu0  ;;  %v2482_v26 = vmul.f32 %v8296_v12, %v2282_v15 }
 0x125   :  { %v2481_v5 = vmul.f32 %v8296_v12, %v2281_v1  ;;  %v1226_v7 = vadd.f32 %v7573_v4, %v8280_v2  ;;  %v1217_v8 = vpop.f32.mrb[37].mxu0  ;;  %v2680_v13 = vadd.f32 %v8304_v19, %v2480_v55 }
 0x126   :  { %v1218_v16 = vadd.f32 %v1217_v8, %v8280_v2  ;;  %v7574_v17 = vpop.f32.mrb[38].mxu0  ;;  %v8617_v21 = vadd.f32 %v8304_v19, %v2483_v62  ;;  %v2682_v43 = vadd.f32 %v8304_v19, %v2482_v26 }
 0x127   :  { %v1229_v22 = vadd.f32 %v7574_v17, %v8280_v2  ;;  %3521 = vrot.lane.b32.xlu0 %v7129_v56, %s7978_s16  ;;  %v1220_v18 = vpop.f32.mrb[39].mxu0  ;;  %v7130_v23 = vpack.c.bf16 %v2680_v13, %v2678_v10  ;;  %v2681_v25 = vadd.f32 %v8304_v19, %v2481_v5  ;;  %vm1894_vm12 = vcmp.gt.f32.partialorder %v1226_v7, 0.0  ;;  %v7849_v56 = vld [vmem:[%s11322_s0 + $0x260] sm:$0xff]  }
 0x128   :  { %vm1892_vm11 = vcmp.gt.f32.partialorder %v1218_v16, 0.0  ;;  %v2088_v14 = vmul.f32 0.2, %v1218_v16  ;;  %v1221_v24 = vadd.f32 %v1220_v18, %v8280_v2  ;;  %v2090_v32 = vmul.f32 0.2, %v1226_v7 }
 0x129   :  { %vm1895_vm13 = vcmp.gt.f32.partialorder %v1229_v22, 0.0  ;;  %v2091_v27 = vmul.f32 0.2, %v1229_v22  ;;  %7680 = vmatmul.mubr.msk.bf16.gmra.mrb[144].mxu0 %vm737_vm2, %v7846_v9  ;;  %3523 = vrot.lane.b32.xlu1 %v7130_v23, %s7978_s16  ;;  %v7111_v37 = vpack.c.bf16 %v8617_v21, %v2681_v25  ;;  %v7155_v38 = vpack.c.bf16 %v2681_v25, %v8590_v47 }
 0x12a   :  { %v2284_v33 = vsel %vm1892_vm11, %v1218_v16, %v2088_v14  ;;  %vm1893_vm14 = vcmp.gt.f32.partialorder %v1221_v24, 0.0  ;;  %v2089_v34 = vmul.f32 0.2, %v1221_v24  ;;  %7683 = vmatprep.mubr.msk.bf16.mxu0 %vm737_vm2, %v7847_v20  ;;  %v2286_v47 = vsel %vm1894_vm12, %v1226_v7, %v2090_v32 }
 0x12b   :  { %v2484_v35 = vmul.f32 %v8296_v12, %v2284_v33  ;;  %v2287_v36 = vsel %vm1895_vm13, %v1229_v22, %v2091_v27  ;;  %3448 = vrot.lane.b32.xlu0 %v7110_v61, %s7980_s23  ;;  %v2486_v62 = vmul.f32 %v8296_v12, %v2286_v47 }
 0x12c   :  { %v2487_v39 = vmul.f32 %v8296_v12, %v2287_v36  ;;  %v2285_v28 = vsel %vm1893_vm14, %v1221_v24, %v2089_v34  ;;  %v7577_v41 = vpop.f32.mrb[40].mxu0  ;;  %v7851_v34 = vld [vmem:[%s11322_s0 + $0x270] sm:$0xff]  }
 0x12d   :  { %v2485_v42 = vmul.f32 %v8296_v12, %v2285_v28  ;;  %v1242_v45 = vadd.f32 %v7577_v41, %v8280_v2  ;;  %v1233_v46 = vpop.f32.mrb[41].mxu0  ;;  %3450 = vrot.lane.b32.xlu1 %v7111_v37, %s7980_s23  ;;  %v2684_v48 = vadd.f32 %v8304_v19, %v2484_v35  ;;  %v2686_v33 = vadd.f32 %v8304_v19, %v2486_v62 }
 0x12e   :  { %v1234_v50 = vadd.f32 %v1233_v46, %v8280_v2  ;;  %v7578_v52 = vpop.f32.mrb[42].mxu0  ;;  %v8641_v53 = vadd.f32 %v8304_v19, %v2487_v39 }
 0x12f   :  { %vm1898_vm15 = vcmp.gt.f32.partialorder %v1242_v45, 0.0  ;;  %v2094_v57 = vmul.f32 0.2, %v1242_v45  ;;  %v1245_v58 = vadd.f32 %v7578_v52, %v8280_v2  ;;  %3598 = vrot.lane.b32.xlu0 %v7155_v38, %s7979_s17  ;;  %v1236_v59 = vpop.f32.mrb[43].mxu0  ;;  %v7131_v55 = vpack.c.bf16 %v2684_v48, %v2682_v43 }
 0x130   :  { %vm1896_vm0 = vcmp.gt.f32.partialorder %v1234_v50, 0.0  ;;  %v2092_v54 = vmul.f32 0.2, %v1234_v50  ;;  %v1237_v60 = vadd.f32 %v1236_v59, %v8280_v2  ;;  %v2685_v61 = vadd.f32 %v8304_v19, %v2485_v42 }
 0x131   :  { %v2290_v1 = vsel %vm1898_vm15, %v1242_v45, %v2094_v57  ;;  %vm1899_vm1 = vcmp.gt.f32.partialorder %v1245_v58, 0.0  ;;  %v2095_v4 = vmul.f32 0.2, %v1245_v58  ;;  %7684 = vmatmul.mubr.msk.bf16.gmra.mrb[148].mxu0 %vm737_vm2, %v7848_v44 }
 0x132   :  { %v2490_v5 = vmul.f32 %v8296_v12, %v2290_v1  ;;  %v2288_v7 = vsel %vm1896_vm0, %v1234_v50, %v2092_v54  ;;  %vm1897_vm3 = vcmp.gt.f32.partialorder %v1237_v60, 0.0  ;;  %v2093_v8 = vmul.f32 0.2, %v1237_v60  ;;  %7687 = vmatprep.mubr.msk.bf16.mxu0 %vm737_vm2, %v7849_v56 }
 0x133   :  { %v2488_v9 = vmul.f32 %v8296_v12, %v2288_v7  ;;  %v2291_v10 = vsel %vm1899_vm1, %v1245_v58, %v2095_v4  ;;  %3525 = vrot.lane.b32.xlu0 %v7131_v55, %s7978_s16  ;;  %v7156_v13 = vpack.c.bf16 %v2685_v61, %v8617_v21  ;;  %v7112_v15 = vpack.c.bf16 %v8641_v53, %v2685_v61  ;;  %v7850_v21 = vld [vmem:[%s11322_s0 + $0x268] sm:$0xff]   ;;  %v7853_v4 = vld [vmem:[%s11322_s0 + $0x280] sm:$0xff]  }
 0x134   :  { %v8659_v16 = vadd.f32 %v8304_v19, %v2490_v5  ;;  %v2491_v17 = vmul.f32 %v8296_v12, %v2291_v10  ;;  %v2289_v20 = vsel %vm1897_vm3, %v1237_v60, %v2093_v8  ;;  %v7581_v22 = vpop.f32.mrb[44].mxu0  ;;  %v7852_v60 = vld [vmem:[%s11322_s0 + $0x278] sm:$0xff]  }
 0x135   :  { %v2489_v18 = vmul.f32 %v8296_v12, %v2289_v20  ;;  %3600 = vrot.lane.b32.xlu1 %v7156_v13, %s7979_s17  ;;  %v1258_v23 = vadd.f32 %v7581_v22, %v8280_v2  ;;  %v1249_v14 = vpop.f32.mrb[45].mxu0  ;;  %v2688_v24 = vadd.f32 %v8304_v19, %v2488_v9 }
 0x136   :  { %v8670_v25 = vadd.f32 %v8304_v19, %v2491_v17  ;;  %v1250_v26 = vadd.f32 %v1249_v14, %v8280_v2  ;;  %v7582_v27 = vpop.f32.mrb[46].mxu0  ;;  %v7182_v32 = vpack.c.bf16 %v8659_v16, %v8556_v51 }
 0x137   :  { %vm1902_vm4 = vcmp.gt.f32.partialorder %v1258_v23, 0.0  ;;  %v2098_v35 = vmul.f32 0.2, %v1258_v23  ;;  %v1261_v36 = vadd.f32 %v7582_v27, %v8280_v2  ;;  %3452 = vrot.lane.b32.xlu0 %v7112_v15, %s7980_s23  ;;  %v1252_v37 = vpop.f32.mrb[47].mxu0  ;;  %v2689_v38 = vadd.f32 %v8304_v19, %v2489_v18 }
 0x138   :  { %vm1900_vm5 = vcmp.gt.f32.partialorder %v1250_v26, 0.0  ;;  %v2096_v39 = vmul.f32 0.2, %v1250_v26  ;;  %v1253_v28 = vadd.f32 %v1252_v37, %v8280_v2  ;;  %v7132_v51 = vpack.c.bf16 %v2688_v24, %v2686_v33 }
 0x139   :  { %v2294_v41 = vsel %vm1902_vm4, %v1258_v23, %v2098_v35  ;;  %vm1903_vm7 = vcmp.gt.f32.partialorder %v1261_v36, 0.0  ;;  %v2099_v42 = vmul.f32 0.2, %v1261_v36  ;;  %3730 = vrot.lane.b32.xlu1 %v7182_v32, %s7982_s27  ;;  %7688 = vmatmul.mubr.msk.bf16.gmra.mrb[152].mxu0 %vm737_vm2, %v7850_v21  ;;  %v7157_v45 = vpack.c.bf16 %v2689_v38, %v8641_v53 }
 0x13a   :  { %v2494_v46 = vmul.f32 %v8296_v12, %v2294_v41  ;;  %v2292_v44 = vsel %vm1900_vm5, %v1250_v26, %v2096_v39  ;;  %vm1901_vm8 = vcmp.gt.f32.partialorder %v1253_v28, 0.0  ;;  %v2097_v43 = vmul.f32 0.2, %v1253_v28  ;;  %7691 = vmatprep.mubr.msk.bf16.mxu0 %vm737_vm2, %v7851_v34 }
 0x13b   :  { %v2492_v48 = vmul.f32 %v8296_v12, %v2292_v44  ;;  %v2295_v47 = vsel %vm1903_vm7, %v1261_v36, %v2099_v42  ;;  %3602 = vrot.lane.b32.xlu0 %v7157_v45, %s7979_s17  ;;  %v7204_v50 = vpack.c.bf16 %v8670_v25, %v8547_v0  ;;  %v2865_v52 = vpack.c.bf16 %v8670_v25, %v8659_v16  ;;  %v7855_v45 = vld [vmem:[%s11322_s0 + $0x290] sm:$0xff]  }
 0x13c   :  { %v2495_v53 = vmul.f32 %v8296_v12, %v2295_v47  ;;  %v2293_v56 = vsel %vm1901_vm8, %v1253_v28, %v2097_v43  ;;  %v7585_v57 = vpop.f32.mrb[48].mxu0  ;;  %v8696_v58 = vadd.f32 %v8304_v19, %v2494_v46  ;;  %v7854_v28 = vld [vmem:[%s11322_s0 + $0x288] sm:$0xff]  }
 0x13d   :  { %v2493_v59 = vmul.f32 %v8296_v12, %v2293_v56  ;;  %v1274_v55 = vadd.f32 %v7585_v57, %v8280_v2  ;;  %3527 = vrot.lane.b32.xlu1 %v7132_v51, %s7978_s16  ;;  %v1265_v54 = vpop.f32.mrb[49].mxu0  ;;  %v2692_v61 = vadd.f32 %v8304_v19, %v2492_v48 }
 0x13e   :  { %v1266_v62 = vadd.f32 %v1265_v54, %v8280_v2  ;;  %v7586_v1 = vpop.f32.mrb[50].mxu0  ;;  %v8710_v5 = vadd.f32 %v8304_v19, %v2495_v53 }
 0x13f   :  { %vm1906_vm9 = vcmp.gt.f32.partialorder %v1274_v55, 0.0  ;;  %v2102_v7 = vmul.f32 0.2, %v1274_v55  ;;  %v1277_v8 = vadd.f32 %v7586_v1, %v8280_v2  ;;  %v1268_v9 = vpop.f32.mrb[51].mxu0  ;;  %v7183_v10 = vpack.c.bf16 %v8696_v58, %v2692_v61 }
 0x140   :  { %vm1904_vm10 = vcmp.gt.f32.partialorder %v1266_v62, 0.0  ;;  %v2100_v13 = vmul.f32 0.2, %v1266_v62  ;;  %v1269_v15 = vadd.f32 %v1268_v9, %v8280_v2  ;;  %v7069_v17 = vpack.c.bf16 %v2692_v61, %v8659_v16 }
 0x141   :  { %v2298_v20 = vsel %vm1906_vm9, %v1274_v55, %v2102_v7  ;;  %vm1907_vm11 = vcmp.gt.f32.partialorder %v1277_v8, 0.0  ;;  %v2103_v22 = vmul.f32 0.2, %v1277_v8  ;;  %7692 = vmatmul.mubr.msk.bf16.gmra.mrb[156].mxu0 %vm737_vm2, %v7852_v60  ;;  %3732 = vrot.lane.b32.xlu0 %v7183_v10, %s7982_s27  ;;  %v2693_v18 = vadd.f32 %v8304_v19, %v2493_v59 }
 0x142   :  { %v2498_v23 = vmul.f32 %v8296_v12, %v2298_v20  ;;  %v2296_v14 = vsel %vm1904_vm10, %v1266_v62, %v2100_v13  ;;  %vm1905_vm12 = vcmp.gt.f32.partialorder %v1269_v15, 0.0  ;;  %v2101_v21 = vmul.f32 0.2, %v1269_v15  ;;  %3311 = vrot.lane.b32.xlu1 %v7069_v17, %s7976_s28  ;;  %7695 = vmatprep.mubr.msk.bf16.mxu0 %vm737_vm2, %v7853_v4 }
 0x143   :  { %v2496_v24 = vmul.f32 %v8296_v12, %v2296_v14  ;;  %v2299_v26 = vsel %vm1907_vm11, %v1277_v8, %v2103_v22  ;;  %v7090_v27 = vpack.c.bf16 %v2693_v18, %v8670_v25  ;;  %v8725_v32 = vpack.c.bf16 %v8710_v5, %v2693_v18  ;;  %v7857_v14 = vld [vmem:[%s11322_s0 + $0x2a0] sm:$0xff]  }
 0x144   :  { %v2499_v33 = vmul.f32 %v8296_v12, %v2299_v26  ;;  %v2297_v34 = vsel %vm1905_vm12, %v1269_v15, %v2101_v21  ;;  %v7589_v35 = vpop.f32.mrb[52].mxu0  ;;  %v8729_v36 = vadd.f32 %v8304_v19, %v2498_v23  ;;  %vm3853_vm10 = vcmask 261120  }
 0x145   :  { %v2497_v37 = vmul.f32 %v8296_v12, %v2297_v34  ;;  %v1290_v38 = vadd.f32 %v7589_v35, %v8280_v2  ;;  %v1281_v39 = vpop.f32.mrb[53].mxu0  ;;  %3379 = vrot.lane.b32.xlu0 %v7090_v27, %s7977_s14  ;;  %v2696_v51 = vadd.f32 %v8304_v19, %v2496_v24  ;;  %vm3900_vm12 = vcmask 392192  }
 0x146   :  { %v1282_v41 = vadd.f32 %v1281_v39, %v8280_v2  ;;  %3657 = vrot.lane.b32.xlu1 %v7090_v27, %s7981_s26  ;;  %v7590_v42 = vpop.f32.mrb[54].mxu0  ;;  %v8744_v46 = vadd.f32 %v8304_v19, %v2499_v33 }
 0x147   :  { %vm1910_vm13 = vcmp.gt.f32.partialorder %v1290_v38, 0.0  ;;  %v2106_v44 = vmul.f32 0.2, %v1290_v38  ;;  %v1293_v43 = vadd.f32 %v7590_v42, %v8280_v2  ;;  %v1284_v48 = vpop.f32.mrb[55].mxu0  ;;  %v7070_v47 = vpack.c.bf16 %v2696_v51, %v8696_v58 }
 0x148   :  { %vm1908_vm14 = vcmp.gt.f32.partialorder %v1282_v41, 0.0  ;;  %v2104_v53 = vmul.f32 0.2, %v1282_v41  ;;  %v1285_v56 = vadd.f32 %v1284_v48, %v8280_v2  ;;  %v7184_v57 = vpack.c.bf16 %v8729_v36, %v2696_v51 }
 0x149   :  { %v2302_v59 = vsel %vm1910_vm13, %v1290_v38, %v2106_v44  ;;  %vm1911_vm15 = vcmp.gt.f32.partialorder %v1293_v43, 0.0  ;;  %v2107_v55 = vmul.f32 0.2, %v1293_v43  ;;  %7696 = vmatmul.mubr.msk.bf16.gmra.mrb[160].mxu0 %vm737_vm2, %v7854_v28  ;;  %3313 = vrot.lane.b32.xlu0 %v7070_v47, %s7976_s28  ;;  %v2697_v54 = vadd.f32 %v8304_v19, %v2497_v37 }
 0x14a   :  { %v2502_v60 = vmul.f32 %v8296_v12, %v2302_v59  ;;  %v2300_v61 = vsel %vm1908_vm14, %v1282_v41, %v2104_v53  ;;  %vm1909_vm0 = vcmp.gt.f32.partialorder %v1285_v56, 0.0  ;;  %v2105_v58 = vmul.f32 0.2, %v1285_v56  ;;  %3734 = vrot.lane.b32.xlu1 %v7184_v57, %s7982_s27  ;;  %7699 = vmatprep.mubr.msk.bf16.mxu0 %vm737_vm2, %v7855_v45 }
 0x14b   :  { %v2500_v62 = vmul.f32 %v8296_v12, %v2300_v61  ;;  %v2303_v1 = vsel %vm1911_vm15, %v1293_v43, %v2107_v55  ;;  %v7091_v4 = vpack.c.bf16 %v2697_v54, %v8710_v5  ;;  %v8759_v7 = vpack.c.bf16 %v8744_v46, %v2697_v54  ;;  %v7856_v5 = vld [vmem:[%s11322_s0 + $0x298] sm:$0xff]   ;;  %v3302_v54 = vpop.permute.xlu0 %3301 }
 0x14c   :  { %v2503_v8 = vmul.f32 %v8296_v12, %v2303_v1  ;;  %v2301_v9 = vsel %vm1909_vm0, %v1285_v56, %v2105_v58  ;;  %v7593_v10 = vpop.f32.mrb[56].mxu0  ;;  %v8763_v13 = vadd.f32 %v8304_v19, %v2502_v60  ;;  %v3787_v58 = vsel %vm3784_vm6, %v8147_v31, %v3302_v54 }
 0x14d   :  { %v8766_v15 = vadd.f32 %v8304_v19, %v2500_v62  ;;  %v2501_v17 = vmul.f32 %v8296_v12, %v2301_v9  ;;  %v1306_v20 = vadd.f32 %v7593_v10, %v8280_v2  ;;  %v1297_v22 = vpop.f32.mrb[57].mxu0  ;;  %3659 = vrot.lane.b32.xlu0 %v7091_v4, %s7981_s26 }
 0x14e   :  { %v1298_v18 = vadd.f32 %v1297_v22, %v8280_v2  ;;  %3381 = vrot.lane.b32.xlu1 %v7091_v4, %s7977_s14  ;;  %v7594_v23 = vpop.f32.mrb[58].mxu0  ;;  %v8780_v21 = vadd.f32 %v8304_v19, %v2503_v8  ;;  %v7861_v8 = vld [vmem:[%s11322_s0 + $0x2b0] sm:$0xff]  }
 0x14f   :  { %v8783_v24 = vadd.f32 %v8304_v19, %v2501_v17  ;;  %vm1914_vm1 = vcmp.gt.f32.partialorder %v1306_v20, 0.0  ;;  %v2110_v26 = vmul.f32 0.2, %v1306_v20  ;;  %v1309_v27 = vadd.f32 %v7594_v23, %v8280_v2  ;;  %v1300_v33 = vpop.f32.mrb[59].mxu0 }
 0x150   :  { %vm1912_vm3 = vcmp.gt.f32.partialorder %v1298_v18, 0.0  ;;  %v2108_v34 = vmul.f32 0.2, %v1298_v18  ;;  %v1301_v35 = vadd.f32 %v1300_v33, %v8280_v2  ;;  %v7185_v37 = vpack.c.bf16 %v8763_v13, %v8766_v15 }
 0x151   :  { %v2306_v38 = vsel %vm1914_vm1, %v1306_v20, %v2110_v26  ;;  %vm1915_vm4 = vcmp.gt.f32.partialorder %v1309_v27, 0.0  ;;  %v2111_v39 = vmul.f32 0.2, %v1309_v27  ;;  %7700 = vmatmul.mubr.msk.bf16.gmra.mrb[164].mxu0 %vm737_vm2, %v7856_v5  ;;  %v7071_v28 = vpack.c.bf16 %v8766_v15, %v8729_v36 }
 0x152   :  { %v2506_v51 = vmul.f32 %v8296_v12, %v2306_v38  ;;  %v2304_v41 = vsel %vm1912_vm3, %v1298_v18, %v2108_v34  ;;  %vm1913_vm5 = vcmp.gt.f32.partialorder %v1301_v35, 0.0  ;;  %v2109_v42 = vmul.f32 0.2, %v1301_v35  ;;  %3736 = vrot.lane.b32.xlu0 %v7185_v37, %s7982_s27  ;;  %7703 = vmatprep.mubr.msk.bf16.mxu0 %vm737_vm2, %v7857_v14 }
 0x153   :  { %v2504_v45 = vmul.f32 %v8296_v12, %v2304_v41  ;;  %v2307_v44 = vsel %vm1915_vm4, %v1309_v27, %v2111_v39  ;;  %3315 = vrot.lane.b32.xlu1 %v7071_v28, %s7976_s28  ;;  %v7092_v43 = vpack.c.bf16 %v8783_v24, %v8744_v46  ;;  %v7205_v36 = vpack.c.bf16 %v8780_v21, %v8783_v24  ;;  %v7858_v46 = vld [vmem:[%s11322_s0 + $0x2a8] sm:$0xff]  }
 0x154   :  { %v2507_v48 = vmul.f32 %v8296_v12, %v2307_v44  ;;  %v2305_v47 = vsel %vm1913_vm5, %v1301_v35, %v2109_v42  ;;  %v7597_v53 = vpop.f32.mrb[60].mxu0  ;;  %v2706_v56 = vadd.f32 %v8304_v19, %v2506_v51  ;;  %v2870_v57 = vpack.c.bf16 %v8783_v24, %v8766_v15  ;;  %v8832_v51 = vpop.permute.xlu0 %3369 }
 0x155   :  { %v2505_v59 = vmul.f32 %v8296_v12, %v2305_v47  ;;  %v1322_v55 = vadd.f32 %v7597_v53, %v8280_v2  ;;  %v1313_v60 = vpop.f32.mrb[61].mxu0  ;;  %v2704_v61 = vadd.f32 %v8304_v19, %v2504_v45  ;;  %11356 = vst [vmem:[#allocation6_spill] sm:$0xff] %v8832_v51  ;;  %v7862_v53 = vld [vmem:[%s11322_s0 + $0x2b8] sm:$0xff]   ;;  %vm3951_vm1 = vcmask 523264  }
 0x156   :  { %v1314_v62 = vadd.f32 %v1313_v60, %v8280_v2  ;;  %3383 = vrot.lane.b32.xlu0 %v7092_v43, %s7977_s14  ;;  %v7598_v1 = vpop.f32.mrb[62].mxu0  ;;  %v8816_v4 = vadd.f32 %v8304_v19, %v2507_v48  ;;  %vm4002_vm4 = vcmask 654336  }
 0x157   :  { %vm1918_vm7 = vcmp.gt.f32.partialorder %v1322_v55, 0.0  ;;  %v2114_v9 = vmul.f32 0.2, %v1322_v55  ;;  %3661 = vrot.lane.b32.xlu1 %v7092_v43, %s7981_s26  ;;  %v1325_v10 = vadd.f32 %v7598_v1, %v8280_v2  ;;  %v1316_v17 = vpop.f32.mrb[63].mxu0  ;;  %v7133_v20 = vpack.c.bf16 %v2706_v56, %v2704_v61 }
 0x158   :  { %vm1916_vm8 = vcmp.gt.f32.partialorder %v1314_v62, 0.0  ;;  %v2112_v22 = vmul.f32 0.2, %v1314_v62  ;;  %v1317_v5 = vadd.f32 %v1316_v17, %v8280_v2  ;;  %v2705_v18 = vadd.f32 %v8304_v19, %v2505_v59 }
 0x159   :  { %v2310_v23 = vsel %vm1918_vm7, %v1322_v55, %v2114_v9  ;;  %vm1919_vm9 = vcmp.gt.f32.partialorder %v1325_v10, 0.0  ;;  %v2115_v14 = vmul.f32 0.2, %v1325_v10  ;;  %7704 = vmatmul.mubr.msk.bf16.gmra.mrb[168].mxu0 %vm737_vm2, %v7858_v46  ;;  %v8844_v59 = vsel %vm3853_vm10, %v3787_v58, %v8832_v51  ;;  %v7865_v46 = vld [vmem:[%s11322_s0 + $0x2c0] sm:$0xff]  }
 0x15a   :  { %v2510_v26 = vmul.f32 %v8296_v12, %v2310_v23  ;;  %v2308_v27 = vsel %vm1916_vm8, %v1314_v62, %v2112_v22  ;;  %vm1917_vm11 = vcmp.gt.f32.partialorder %v1317_v5, 0.0  ;;  %v2113_v33 = vmul.f32 0.2, %v1317_v5  ;;  %3529 = vrot.lane.b32.xlu0 %v7133_v20, %s7978_s16  ;;  %7707 = vmatprep.mubr.msk.bf16.mxu0 %vm737_vm2, %v7861_v8 }
 0x15b   :  { %v2508_v34 = vmul.f32 %v8296_v12, %v2308_v27  ;;  %v2311_v35 = vsel %vm1919_vm9, %v1325_v10, %v2115_v14  ;;  %v7158_v37 = vpack.c.bf16 %v8816_v4, %v2705_v18  ;;  %v2872_v38 = vpack.c.bf16 %v2705_v18, %v2704_v61 }
 0x15c   :  { %v2511_v39 = vmul.f32 %v8296_v12, %v2311_v35  ;;  %v2309_v28 = vsel %vm1917_vm11, %v1317_v5, %v2113_v33  ;;  %v7601_v41 = vpop.f32.mrb[64].mxu0  ;;  %v2710_v42 = vadd.f32 %v8304_v19, %v2510_v26  ;;  %v3516_v44 = vpop.permute.xlu1 %3515 }
 0x15d   :  { %v2509_v45 = vmul.f32 %v8296_v12, %v2309_v28  ;;  %3604 = vrot.lane.b32.xlu1 %v7158_v37, %s7979_s17  ;;  %v1338_v43 = vadd.f32 %v7601_v41, %v8280_v2  ;;  %v1329_v48 = vpop.f32.mrb[65].mxu0  ;;  %v3097_v47 = vunpack.c.h.b16 %v2872_v38  ;;  %v2708_v56 = vadd.f32 %v8304_v19, %v2508_v34 }
 0x15e   :  { %v1330_v55 = vadd.f32 %v1329_v48, %v8280_v2  ;;  %v7602_v54 = vpop.f32.mrb[66].mxu0  ;;  %v8848_v60 = vadd.f32 %v8304_v19, %v2511_v39 }
 0x15f   :  { %vm1922_vm13 = vcmp.gt.f32.partialorder %v1338_v43, 0.0  ;;  %v2118_v61 = vmul.f32 0.2, %v1338_v43  ;;  %v1341_v62 = vadd.f32 %v7602_v54, %v8280_v2  ;;  %v1332_v1 = vpop.f32.mrb[67].mxu0  ;;  %v3422_v8 = vpack.c.b16 %v3097_v47, %v8327_v40 }
 0x160   :  { %vm1920_vm14 = vcmp.gt.f32.partialorder %v1330_v55, 0.0  ;;  %v2116_v58 = vmul.f32 0.2, %v1330_v55  ;;  %v1333_v9 = vadd.f32 %v1332_v1, %v8280_v2  ;;  %v2709_v10 = vadd.f32 %v8304_v19, %v2509_v45  ;;  %v3591_v45 = vpop.permute.xlu0 %3590 }
 0x161   :  { %v2314_v17 = vsel %vm1922_vm13, %v1338_v43, %v2118_v61  ;;  %vm1923_vm15 = vcmp.gt.f32.partialorder %v1341_v62, 0.0  ;;  %v2119_v20 = vmul.f32 0.2, %v1341_v62  ;;  %3454 = vrot.lane.b32.xlu1 %v3422_v8, %s7980_s23  ;;  %7708 = vmatmul.mubr.msk.bf16.gmra.mrb[172].mxu0 %vm737_vm2, %v7862_v53  ;;  %v3441_v22 = vpop.permute.xlu1 %3440  ;;  %v7134_v5 = vpack.c.bf16 %v2710_v42, %v2708_v56  ;;  %v7869_v53 = vld [vmem:[%s11322_s0 + $0x2d0] sm:$0xff]  }
 0x162   :  { %v2514_v18 = vmul.f32 %v8296_v12, %v2314_v17  ;;  %v2312_v23 = vsel %vm1920_vm14, %v1330_v55, %v2116_v58  ;;  %vm1921_vm0 = vcmp.gt.f32.partialorder %v1333_v9, 0.0  ;;  %v2117_v14 = vmul.f32 0.2, %v1333_v9  ;;  %7711 = vmatprep.mubr.msk.bf16.mxu0 %vm737_vm2, %v7865_v46 }
 0x163   :  { %v2512_v26 = vmul.f32 %v8296_v12, %v2312_v23  ;;  %v2315_v27 = vsel %vm1923_vm15, %v1341_v62, %v2119_v20  ;;  %v7113_v33 = vpack.c.bf16 %v2709_v10, %v8816_v4  ;;  %v3902_v35 = vsel %vm3900_vm12, %v8844_v59, %v3441_v22  ;;  %v7866_v4 = vld [vmem:[%s11322_s0 + $0x2c8] sm:$0xff]  }
 0x164   :  { %v2313_v34 = vsel %vm1921_vm0, %v1333_v9, %v2117_v14  ;;  %v7605_v37 = vpop.f32.mrb[68].mxu0  ;;  %v7159_v38 = vpack.c.bf16 %v8848_v60, %v2709_v10  ;;  %v2515_v39 = vmul.f32 %v8296_v12, %v2315_v27  ;;  %v2714_v47 = vadd.f32 %v8304_v19, %v2514_v18  ;;  %v8891_v17 = vpop.permute.xlu0 %3517 }
 0x165   :  { %v2513_v28 = vmul.f32 %v8296_v12, %v2313_v34  ;;  %3456 = vrot.lane.b32.xlu0 %v7113_v33, %s7980_s23  ;;  %3531 = vrot.lane.b32.xlu1 %v7134_v5, %s7978_s16  ;;  %v1354_v41 = vadd.f32 %v7605_v37, %v8280_v2  ;;  %v1345_v42 = vpop.f32.mrb[69].mxu0  ;;  %v2712_v48 = vadd.f32 %v8304_v19, %v2512_v26  ;;  %v8886_v8 = vunpack.c.h.b16 %v2865_v52 }
 0x166   :  { %v7606_v43 = vpop.f32.mrb[70].mxu0  ;;  %v3953_v62 = vsel %vm3951_vm1, %v3902_v35, %v3516_v44  ;;  %v1346_v1 = vadd.f32 %v1345_v42, %v8280_v2  ;;  %v2715_v58 = vadd.f32 %v8304_v19, %v2515_v39  ;;  %v7870_v35 = vld [vmem:[%s11322_s0 + $0x2d8] sm:$0xff]   ;;  %vm4053_vm13 = vcmask 785408  }
 0x167   :  { %vm1926_vm3 = vcmp.gt.f32.partialorder %v1354_v41, 0.0  ;;  %v2122_v56 = vmul.f32 0.2, %v1354_v41  ;;  %v3443_v55 = vpop.permute.xlu1 %3442  ;;  %v1357_v54 = vadd.f32 %v7606_v43, %v8280_v2  ;;  %v1348_v46 = vpop.f32.mrb[71].mxu0  ;;  %v2713_v61 = vadd.f32 %v8304_v19, %v2513_v28 }
 0x168   :  { %v7135_v16 = vpack.c.bf16 %v2714_v47, %v2712_v48  ;;  %vm1924_vm7 = vcmp.gt.f32.partialorder %v1346_v1, 0.0  ;;  %v8900_v23 = vsel %vm4002_vm4, %v3953_v62, %v3591_v45  ;;  %v3261_v14 = vpack.c.b16 %v8886_v8, %v8327_v40 }
 0x169   :  { %v2318_v9 = vsel %vm1926_vm3, %v1354_v41, %v2122_v56  ;;  %vm1927_vm5 = vcmp.gt.f32.partialorder %v1357_v54, 0.0  ;;  %v2123_v10 = vmul.f32 0.2, %v1357_v54  ;;  %3606 = vrot.lane.b32.xlu0 %v7159_v38, %s7979_s17  ;;  %7712 = vmatmul.mubr.msk.bf16.gmra.mrb[176].mxu0 %vm737_vm2, %v7866_v4  ;;  %v7114_v52 = vpack.c.bf16 %v2713_v61, %v8848_v60  ;;  %v7873_v4 = vld [vmem:[%s11322_s0 + $0x2e0] sm:$0xff]  }
 0x16a   :  { %v2518_v44 = vmul.f32 %v8296_v12, %v2318_v9  ;;  %7715 = vmatprep.mubr.msk.bf16.mxu0 %vm737_vm2, %v7869_v53  ;;  %v2120_v26 = vmul.f32 0.2, %v1346_v1  ;;  %v8906_v27 = vsel %vm3900_vm12, %v8844_v59, %v3443_v55  ;;  %v2877_v34 = vpack.c.bf16 %v2715_v58, %v2714_v47 }
 0x16b   :  { %v2319_v20 = vsel %vm1927_vm5, %v1357_v54, %v2123_v10  ;;  %v8895_v22 = vpop.permute.xlu1 %3592  ;;  %3458 = vrot.lane.b32.xlu1 %v7114_v52, %s7980_s23  ;;  %v8918_v38 = vadd.f32 %v1348_v46, %v8280_v2  ;;  %v7160_v42 = vpack.c.bf16 %v2715_v58, %v2713_v61  ;;  %vm4104_vm15 = vcmask 916480  }
 0x16c   :  { %v2519_v5 = vmul.f32 %v8296_v12, %v2319_v20  ;;  %v7609_v18 = vpop.f32.mrb[72].mxu0  ;;  %v8915_v37 = vadd.f32 %v8304_v19, %v2518_v44  ;;  %v3107_v53 = vunpack.c.h.b16 %v2877_v34  ;;  %v8939_v44 = vsel %vm1924_vm7, %v1346_v1, %v2120_v26 }
 0x16d   :  { %3533 = vrot.lane.b32.xlu0 %v7135_v16, %s7978_s16  ;;  %v1370_v60 = vadd.f32 %v7609_v18, %v8280_v2  ;;  %v1361_v33 = vpop.f32.mrb[73].mxu0  ;;  %v8921_v28 = vpop.permute.xlu0 %3444  ;;  %vm1925_vm0 = vcmp.gt.f32.partialorder %v8918_v38, 0.0  ;;  %v2121_v26 = vmul.f32 0.2, %v8918_v38 }
 0x16e   :  { %v1362_v39 = vadd.f32 %v1361_v33, %v8280_v2  ;;  %v7610_v41 = vpop.f32.mrb[74].mxu0  ;;  %v8930_v56 = vadd.f32 %v8304_v19, %v2519_v5  ;;  %v3425_v62 = vpack.c.b16 %v8327_v40, %v3107_v53  ;;  %v7072_v5 = vpack.c.bf16 %v8915_v37, %v8763_v13 }
 0x16f   :  { %vm1930_vm8 = vcmp.gt.f32.partialorder %v1370_v60, 0.0  ;;  %v2126_v45 = vmul.f32 0.2, %v1370_v60  ;;  %v8926_v43 = vpop.permute.xlu1 %3519  ;;  %v1373_v48 = vadd.f32 %v7610_v41, %v8280_v2  ;;  %v1364_v47 = vpop.f32.mrb[75].mxu0  ;;  %3608 = vrot.lane.b32.xlu1 %v7160_v42, %s7979_s17  ;;  %v7874_v41 = vld [vmem:[%s11322_s0 + $0x2e8] sm:$0xff]  }
 0x170   :  { %vm1928_vm9 = vcmp.gt.f32.partialorder %v1362_v39, 0.0  ;;  %v2124_v55 = vmul.f32 0.2, %v1362_v39  ;;  %v1365_v54 = vadd.f32 %v1364_v47, %v8280_v2  ;;  %v7093_v33 = vpack.c.bf16 %v8930_v56, %v8780_v21 }
 0x171   :  { %v2322_v46 = vsel %vm1930_vm8, %v1370_v60, %v2126_v45  ;;  %vm1931_vm11 = vcmp.gt.f32.partialorder %v1373_v48, 0.0  ;;  %v2127_v61 = vmul.f32 0.2, %v1373_v48  ;;  %7716 = vmatmul.mubr.msk.bf16.gmra.mrb[180].mxu0 %vm737_vm2, %v7870_v35  ;;  %3460 = vrot.lane.b32.xlu0 %v3425_v62, %s7980_s23  ;;  %v2879_v1 = vpack.c.bf16 %v8930_v56, %v8915_v37  ;;  %v8954_v35 = vpop.permute.xlu0 %3594 }
 0x172   :  { %v2522_v58 = vmul.f32 %v8296_v12, %v2322_v46  ;;  %v2320_v9 = vsel %vm1928_vm9, %v1362_v39, %v2124_v55  ;;  %vm1929_vm14 = vcmp.gt.f32.partialorder %v1365_v54, 0.0  ;;  %v2125_v10 = vmul.f32 0.2, %v1365_v54  ;;  %7719 = vmatprep.mubr.msk.bf16.mxu0 %vm737_vm2, %v7873_v4  ;;  %v7876_v55 = vld [vmem:[%s11322_s0 + $0x2f0] sm:$0xff]  }
 0x173   :  { %v2520_v20 = vmul.f32 %v8296_v12, %v2320_v9  ;;  %v2323_v16 = vsel %vm1931_vm11, %v1373_v48, %v2127_v61  ;;  %v8943_v52 = vpop.permute.xlu1 %3446  ;;  %3385 = vrot.lane.b32.xlu1 %v7093_v33, %s7977_s14  ;;  %v3111_v47 = vunpack.c.h.b16 %v2879_v1 }
 0x174   :  { %v2523_v18 = vmul.f32 %v8296_v12, %v2323_v16  ;;  %v2321_v60 = vsel %vm1929_vm14, %v1365_v54, %v2125_v10  ;;  %v7613_v34 = vpop.f32.mrb[76].mxu0  ;;  %v8965_v53 = vadd.f32 %v8304_v19, %v2522_v58 }
 0x175   :  { %v1386_v39 = vadd.f32 %v7613_v34, %v8280_v2  ;;  %v1377_v13 = vpop.f32.mrb[77].mxu0  ;;  %v2720_v42 = vadd.f32 %v8304_v19, %v2520_v20  ;;  %v2521_v4 = vmul.f32 %v8296_v12, %v2321_v60  ;;  %3317 = vrot.lane.b32.xlu0 %v7072_v5, %s7976_s28  ;;  %v3641_v5 = vpack.c.b16 %v3111_v47, %v8327_v40 }
 0x176   :  { %v1378_v45 = vadd.f32 %v1377_v13, %v8280_v2  ;;  %v7614_v48 = vpop.f32.mrb[78].mxu0  ;;  %v8977_v20 = vadd.f32 %v8304_v19, %v2523_v18  ;;  %v2317_v18 = vsel %vm1925_vm0, %v8918_v38, %v2121_v26 }
 0x177   :  { %vm1934_vm3 = vcmp.gt.f32.partialorder %v1386_v39, 0.0  ;;  %v2130_v54 = vmul.f32 0.2, %v1386_v39  ;;  %v1389_v46 = vadd.f32 %v7614_v48, %v8280_v2  ;;  %v8972_v61 = vpop.permute.xlu1 %3303  ;;  %v1380_v62 = vpop.f32.mrb[79].mxu0  ;;  %v7186_v9 = vpack.c.bf16 %v2720_v42, %v8915_v37 }
 0x178   :  { %vm1932_vm5 = vcmp.gt.f32.partialorder %v1378_v45, 0.0  ;;  %v2128_v10 = vmul.f32 0.2, %v1378_v45  ;;  %v1381_v58 = vadd.f32 %v1380_v62, %v8280_v2  ;;  %v7073_v62 = vpack.c.bf16 %v8965_v53, %v2720_v42 }
 0x179   :  { %v2326_v16 = vsel %vm1934_vm3, %v1386_v39, %v2130_v54  ;;  %vm1935_vm7 = vcmp.gt.f32.partialorder %v1389_v46, 0.0  ;;  %v2131_v60 = vmul.f32 0.2, %v1389_v46  ;;  %v8980_v33 = vpop.permute.xlu0 %3371  ;;  %7720 = vmatmul.mubr.msk.bf16.gmra.mrb[184].mxu0 %vm737_vm2, %v7874_v41  ;;  %3738 = vrot.lane.b32.xlu1 %v7186_v9, %s7982_s27  ;;  %v8992_v41 = vadd.f32 %v8304_v19, %v2521_v4  ;;  %v7877_v4 = vld [vmem:[%s11322_s0 + $0x2f8] sm:$0xff]  }
 0x17a   :  { %v2526_v34 = vmul.f32 %v8296_v12, %v2326_v16  ;;  %v2324_v1 = vsel %vm1932_vm5, %v1378_v45, %v2128_v10  ;;  %vm1933_vm8 = vcmp.gt.f32.partialorder %v1381_v58, 0.0  ;;  %v2129_v37 = vmul.f32 0.2, %v1381_v58  ;;  %7723 = vmatprep.mubr.msk.bf16.mxu0 %vm737_vm2, %v7876_v55  ;;  %3663 = vrot.lane.b32.xlu0 %v3641_v5, %s7981_s26 }
 0x17b   :  { %v2524_v39 = vmul.f32 %v8296_v12, %v2324_v1  ;;  %v2327_v13 = vsel %vm1935_vm7, %v1389_v46, %v2131_v60  ;;  %v3650_v48 = vpop.permute.xlu1 %3649  ;;  %v7094_v26 = vpack.c.bf16 %v8977_v20, %v8992_v41  ;;  %v7878_v1 = vld [vmem:[%s11322_s0 + $0x300] sm:$0xff]  }
 0x17c   :  { %v2527_v45 = vmul.f32 %v8296_v12, %v2327_v13  ;;  %v2325_v47 = vsel %vm1933_vm8, %v1381_v58, %v2129_v37  ;;  %v4055_v54 = vsel %vm4053_vm13, %v8900_v23, %v3650_v48  ;;  %v7617_v55 = vpop.f32.mrb[80].mxu0  ;;  %v9010_v60 = vadd.f32 %v8304_v19, %v2526_v34 }
 0x17d   :  { %v2525_v38 = vmul.f32 %v8296_v12, %v2325_v47  ;;  %v1402_v46 = vadd.f32 %v7617_v55, %v8280_v2  ;;  %v3725_v9 = vpop.permute.xlu0 %3724  ;;  %v1393_v10 = vpop.f32.mrb[81].mxu0  ;;  %v2724_v58 = vadd.f32 %v8304_v19, %v2524_v39  ;;  %3319 = vrot.lane.b32.xlu1 %v7073_v62, %s7976_s28  ;;  %v3906_v55 = vsel %vm3900_vm12, %v8844_v59, %v8921_v28 }
 0x17e   :  { %v1394_v23 = vadd.f32 %v1393_v10, %v8280_v2  ;;  %v7618_v42 = vpop.f32.mrb[82].mxu0  ;;  %v4106_v16 = vsel %vm4104_vm15, %v4055_v54, %v3725_v9  ;;  %v9013_v5 = vadd.f32 %v8304_v19, %v2527_v45  ;;  %3387 = vrot.lane.b32.xlu0 %v7094_v26, %s7977_s14  ;;  %v3955_v59 = vsel %vm3951_vm1, %v8906_v27, %v8891_v17 }
 0x17f   :  { %vm1938_vm9 = vcmp.gt.f32.partialorder %v1402_v46, 0.0  ;;  %v2134_v37 = vmul.f32 0.2, %v1402_v46  ;;  %v1405_v39 = vadd.f32 %v7618_v42, %v8280_v2  ;;  %4331 = vmatmul.mubr.bf16.vlgmr.msra.gmra.mrb[0].mxu1 %v4106_v16  ;;  %v9020_v13 = vpop.permute.xlu1 %3373  ;;  %v1396_v48 = vpop.f32.mrb[83].mxu0  ;;  %v7187_v34 = vpack.c.bf16 %v2724_v58, %v8965_v53 }
 0x180   :  { %vm1936_vm11 = vcmp.gt.f32.partialorder %v1394_v23, 0.0  ;;  %v2132_v47 = vmul.f32 0.2, %v1394_v23  ;;  %v1397_v45 = vadd.f32 %v1396_v48, %v8280_v2  ;;  %6883 = vmatprep.mubr.msk.bf16.mxu1 %vm3784_vm6, %v8531_v49  ;;  %v7074_v54 = vpack.c.bf16 %v9010_v60, %v2724_v58 }
 0x181   :  { %vm1939_vm14 = vcmp.gt.f32.partialorder %v1405_v39, 0.0  ;;  %v2135_v62 = vmul.f32 0.2, %v1405_v39  ;;  %v9030_v9 = vpop.permute.xlu0 %3305  ;;  %7724 = vmatmul.mubr.msk.bf16.gmra.mrb[188].mxu0 %vm737_vm2, %v7877_v4  ;;  %v9034_v53 = vadd.f32 %v8304_v19, %v2525_v38  ;;  %v2330_v10 = vsel %vm1938_vm9, %v1402_v46, %v2134_v37  ;;  %3665 = vrot.lane.b32.xlu1 %v7094_v26, %s7981_s26 }
 0x182   :  { %v2328_v42 = vsel %vm1936_vm11, %v1394_v23, %v2132_v47  ;;  %vm1937_vm0 = vcmp.gt.f32.partialorder %v1397_v45, 0.0  ;;  %v2133_v16 = vmul.f32 0.2, %v1397_v45  ;;  %7727 = vmatprep.mubr.msk.bf16.mxu0 %vm737_vm2, %v7878_v1  ;;  %3740 = vrot.lane.b32.xlu0 %v7187_v34, %s7982_s27  ;;  %v9048_v4 = vmul.f32 %v8296_v12, %v8939_v44  ;;  %v7879_v44 = vld [vmem:[%s11322_s0 + $0x308] sm:$0xff]  }
 0x183   :  { %v2528_v28 = vmul.f32 %v8296_v12, %v2328_v42  ;;  %v2331_v58 = vsel %vm1939_vm14, %v1405_v39, %v2135_v62  ;;  %v3727_v38 = vpop.permute.xlu1 %3726  ;;  %v7095_v46 = vpack.c.bf16 %v9013_v5, %v9034_v53  ;;  %v4006_v26 = vsel %vm4002_vm4, %v3955_v59, %v8895_v22 }
 0x184   :  { %v2531_v23 = vmul.f32 %v8296_v12, %v2331_v58  ;;  %v2329_v1 = vsel %vm1937_vm0, %v1397_v45, %v2133_v16  ;;  %v7621_v17 = vpop.f32.mrb[84].mxu0  ;;  %v2517_v27 = vmul.f32 %v8296_v12, %v2317_v18  ;;  %v3957_v37 = vsel %vm3951_vm1, %v3906_v55, %v8926_v43 }
 0x185   :  { %v2530_v39 = vmul.f32 %v8296_v12, %v2330_v10  ;;  %v2529_v48 = vmul.f32 %v8296_v12, %v2329_v1  ;;  %v3652_v34 = vpop.permute.xlu0 %3651  ;;  %v1409_v47 = vpop.f32.mrb[85].mxu0  ;;  %v4008_v22 = vsel %vm4002_vm4, %v3957_v37, %v8954_v35  ;;  %v1418_v45 = vadd.f32 %v7621_v17, %v8280_v2  ;;  %3389 = vrot.lane.b32.xlu1 %v7095_v46, %s7977_s14 }
 0x186   :  { %v4057_v18 = vsel %vm4053_vm13, %v4006_v26, %v3652_v34  ;;  %v1410_v62 = vadd.f32 %v1409_v47, %v8280_v2  ;;  %v7622_v43 = vpop.f32.mrb[86].mxu0  ;;  %v2728_v55 = vadd.f32 %v8304_v19, %v2528_v28  ;;  %3321 = vrot.lane.b32.xlu0 %v7074_v54, %s7976_s28  ;;  %v9076_v59 = vadd.f32 %v8304_v19, %v2531_v23 }
 0x187   :  { %v9069_v10 = vadd.f32 %v8304_v19, %v2529_v48  ;;  %v1421_v42 = vadd.f32 %v7622_v43, %v8280_v2  ;;  %v1412_v16 = vpop.f32.mrb[87].mxu0  ;;  %v9073_v35 = vpop.permute.xlu1 %3307  ;;  %v4109_v1 = vsel %vm4104_vm15, %v4057_v18, %v3727_v38  ;;  %v9084_v54 = vadd.f32 %v8304_v19, %v2530_v39 }
 0x188   :  { %vm1940_vm3 = vcmp.gt.f32.partialorder %v1410_v62, 0.0  ;;  %v2136_v58 = vmul.f32 0.2, %v1410_v62  ;;  %v1413_v26 = vadd.f32 %v1412_v16, %v8280_v2  ;;  %4339 = vmatmul.mubr.bf16.gmra.mrb[4].mxu1 %v4109_v1  ;;  %v9087_v37 = vadd.f32 %v8304_v19, %v2517_v27 }
 0x189   :  { %vm1943_vm5 = vcmp.gt.f32.partialorder %v1421_v42, 0.0  ;;  %v2139_v28 = vmul.f32 0.2, %v1421_v42  ;;  %v9080_v17 = vpop.permute.xlu0 %3375  ;;  %7728 = vmatmul.mubr.msk.bf16.gmra.mrb[192].mxu0 %vm737_vm2, %v7879_v44  ;;  %v2138_v23 = vmul.f32 0.2, %v1418_v45  ;;  %6884 = vmatprep.mubr.msk.bf16.mxu1 %vm3784_vm6, %v8571_v29  ;;  %v9094_v38 = vsel %vm3784_vm6, %v8147_v31, %v8972_v61 }
 0x18a   :  { %v2332_v48 = vsel %vm1940_vm3, %v1410_v62, %v2136_v58  ;;  %vm1941_vm7 = vcmp.gt.f32.partialorder %v1413_v26, 0.0  ;;  %v2137_v34 = vmul.f32 0.2, %v1413_v26  ;;  %vm1942_vm8 = vcmp.gt.f32.partialorder %v1418_v45, 0.0  ;;  %3667 = vrot.lane.b32.xlu0 %v7095_v46, %s7981_s26 }
 0x18b   :  { %v2532_v47 = vmul.f32 %v8296_v12, %v2332_v48  ;;  %v7188_v27 = vpack.c.bf16 %v2728_v55, %v9010_v60  ;;  %v3654_v39 = vpop.permute.xlu1 %3653  ;;  %v2335_v44 = vsel %vm1943_vm5, %v1421_v42, %v2139_v28  ;;  %v7096_v16 = vpack.c.bf16 %v9076_v59, %v9069_v10 }
 0x18c   :  { %v2333_v18 = vsel %vm1941_vm7, %v1413_v26, %v2137_v34  ;;  %v4059_v62 = vsel %vm4053_vm13, %v4008_v22, %v3654_v39  ;;  %v7625_v43 = vpop.f32.mrb[88].mxu0  ;;  %v7075_v60 = vpack.c.bf16 %v9084_v54, %v2728_v55  ;;  %v2884_v48 = vpack.c.bf16 %v9069_v10, %v2728_v55 }
 0x18d   :  { %v2533_v61 = vmul.f32 %v8296_v12, %v2333_v18  ;;  %3742 = vrot.lane.b32.xlu1 %v7188_v27, %s7982_s27  ;;  %v1434_v58 = vadd.f32 %v7625_v43, %v8280_v2  ;;  %v3729_v1 = vpop.permute.xlu0 %3728  ;;  %v1425_v46 = vpop.f32.mrb[89].mxu0  ;;  %v2334_v42 = vsel %vm1942_vm8, %v1418_v45, %v2138_v23  ;;  %v2716_v34 = vadd.f32 %v8304_v19, %v9048_v4 }
 0x18e   :  { %v1426_v22 = vadd.f32 %v1425_v46, %v8280_v2  ;;  %v7626_v26 = vpop.f32.mrb[90].mxu0  ;;  %v4112_v28 = vsel %vm4104_vm15, %v4059_v62, %v3729_v1  ;;  %v2535_v27 = vmul.f32 %v8296_v12, %v2335_v44  ;;  %3391 = vrot.lane.b32.xlu0 %v7096_v16, %s7977_s14  ;;  %v3121_v43 = vunpack.c.h.b16 %v2884_v48 }
 0x18f   :  { %v1437_v39 = vadd.f32 %v7626_v26, %v8280_v2  ;;  %v1428_v18 = vpop.f32.mrb[91].mxu0  ;;  %v2732_v55 = vadd.f32 %v8304_v19, %v2532_v47  ;;  %v9119_v46 = vadd.f32 %v8304_v19, %v2533_v61  ;;  %v2534_v62 = vmul.f32 %v8296_v12, %v2334_v42 }
 0x190   :  { %vm1944_vm2 = vcmp.gt.f32.partialorder %v1426_v22, 0.0  ;;  %v2140_v45 = vmul.f32 0.2, %v1426_v22  ;;  %v1429_v23 = vadd.f32 %v1428_v18, %v8280_v2  ;;  %vm1946_vm9 = vcmp.gt.f32.partialorder %v1434_v58, 0.0  ;;  %4347 = vmatmul.mubr.bf16.gmra.mrb[8].mxu1 %v4112_v28  ;;  %v9134_v18 = vpop.permute.xlu1 %3377 }
 0x191   :  { %3323 = vrot.lane.b32.xlu1 %v7075_v60, %s7976_s28  ;;  %vm1947_vm11 = vcmp.gt.f32.partialorder %v1437_v39, 0.0  ;;  %v2143_v4 = vmul.f32 0.2, %v1437_v39  ;;  %v9123_v44 = vpop.permute.xlu0 %3309  ;;  %v2142_v16 = vmul.f32 0.2, %v1434_v58  ;;  %6885 = vmatprep.mubr.msk.bf16.mxu1 %vm3784_vm6, %v7204_v50  ;;  %v3642_v42 = vpack.c.b16 %v8327_v40, %v3121_v43 }
 0x192   :  { %v2336_v1 = vsel %vm1944_vm2, %v1426_v22, %v2140_v45  ;;  %vm1945_vm14 = vcmp.gt.f32.partialorder %v1429_v23, 0.0  ;;  %v2141_v47 = vmul.f32 0.2, %v1429_v23  ;;  %v7161_v60 = vpack.c.bf16 %v9119_v46, %v9087_v37 }
 0x193   :  { %v2536_v61 = vmul.f32 %v8296_v12, %v2336_v1  ;;  %v2339_v48 = vsel %vm1947_vm11, %v1437_v39, %v2143_v4  ;;  %v7136_v45 = vpack.c.bf16 %v2732_v55, %v2716_v34  ;;  %v9137_v30 = vadd.f32 %v8304_v19, %v2535_v27 }
 0x194   :  { %v2539_v26 = vmul.f32 %v8296_v12, %v2339_v48  ;;  %v2337_v28 = vsel %vm1945_vm14, %v1429_v23, %v2141_v47  ;;  %v7629_v22 = vpop.f32.mrb[92].mxu0  ;;  %3610 = vrot.lane.b32.xlu0 %v7161_v60, %s7979_s17  ;;  %v2734_v37 = vadd.f32 %v8304_v19, %v2534_v62  ;;  %v3857_v34 = vsel %vm3853_vm10, %v9094_v38, %v8980_v33 }
 0x195   :  { %v2537_v0 = vmul.f32 %v8296_v12, %v2337_v28  ;;  %3669 = vrot.lane.b32.xlu1 %v3642_v42, %s7981_s26  ;;  %v9142_v25 = vpop.permute.xlu0 %3655  ;;  %v1441_v50 = vpop.f32.mrb[93].mxu0  ;;  %v2736_v39 = vadd.f32 %v8304_v19, %v2536_v61  ;;  %v2338_v27 = vsel %vm1946_vm9, %v1434_v58, %v2142_v16  ;;  %v7115_v23 = vpack.c.bf16 %v9137_v30, %v9119_v46 }
 0x196   :  { %v1442_v43 = vadd.f32 %v1441_v50, %v8280_v2  ;;  %v7630_v55 = vpop.f32.mrb[94].mxu0  ;;  %v1450_v4 = vadd.f32 %v7629_v22, %v8280_v2  ;;  %v9156_v61 = vadd.f32 %v8304_v19, %v2539_v26  ;;  %v3597_v33 = vpop.permute.xlu1 %3596  ;;  %v3792_v46 = vsel %vm3784_vm6, %v8489_v11, %v9030_v9 }
 0x197   :  { %v1453_v1 = vadd.f32 %v7630_v55, %v8280_v2  ;;  %v1444_v47 = vpop.f32.mrb[95].mxu0  ;;  %v7137_v62 = vpack.c.bf16 %v2736_v39, %v2734_v37  ;;  %v2737_v58 = vadd.f32 %v8304_v19, %v2537_v0  ;;  %v3908_v60 = vsel %vm3900_vm12, %v3857_v34, %v8943_v52 }
 0x198   :  { %vm1948_vm0 = vcmp.gt.f32.partialorder %v1442_v43, 0.0  ;;  %v2144_v48 = vmul.f32 0.2, %v1442_v43  ;;  %v1445_v38 = vadd.f32 %v1444_v47, %v8280_v2  ;;  %v2538_v26 = vmul.f32 %v8296_v12, %v2338_v27 }
 0x199   :  { %3535 = vrot.lane.b32.xlu1 %v7136_v45, %s7978_s16  ;;  %vm1951_vm3 = vcmp.gt.f32.partialorder %v1453_v1, 0.0  ;;  %v2147_v16 = vmul.f32 0.2, %v1453_v1  ;;  %v3522_v42 = vpop.permute.xlu0 %3521  ;;  %3537 = vrot.lane.b32.xlu0 %v7137_v62, %s7978_s16  ;;  %v2146_v0 = vmul.f32 0.2, %v1450_v4  ;;  %v7116_v11 = vpack.c.bf16 %v9156_v61, %v2737_v58 }
 0x19a   :  { %v2340_v28 = vsel %vm1948_vm0, %v1442_v43, %v2144_v48  ;;  %vm1949_vm5 = vcmp.gt.f32.partialorder %v1445_v38, 0.0  ;;  %v2145_v22 = vmul.f32 0.2, %v1445_v38  ;;  %vm1950_vm7 = vcmp.gt.f32.partialorder %v1450_v4, 0.0 }
 0x19b   :  { %v2540_v50 = vmul.f32 %v8296_v12, %v2340_v28  ;;  %v2343_v37 = vsel %vm1951_vm3, %v1453_v1, %v2147_v16  ;;  %v9170_v45 = vpop.permute.xlu1 %3523  ;;  %v3859_v52 = vsel %vm3853_vm10, %v3792_v46, %v9020_v13  ;;  %v7162_v34 = vpack.c.bf16 %v2737_v58, %v9137_v30 }
 0x19c   :  { %v2341_v9 = vsel %vm1949_vm5, %v1445_v38, %v2145_v22  ;;  %v7633_v39 = vpop.f32.mrb[96].mxu0  ;;  %v2543_v27 = vmul.f32 %v8296_v12, %v2343_v37  ;;  %v3795_v62 = vsel %vm3784_vm6, %v8531_v49, %v9073_v35  ;;  %v3798_v30 = vsel %vm3784_vm6, %v8571_v29, %v9123_v44 }
 0x19d   :  { %3462 = vrot.lane.b32.xlu1 %v7115_v23, %s7980_s23  ;;  %v1466_v43 = vadd.f32 %v7633_v39, %v8280_v2  ;;  %v3449_v55 = vpop.permute.xlu0 %3448  ;;  %v1457_v1 = vpop.f32.mrb[97].mxu0  ;;  %3464 = vrot.lane.b32.xlu0 %v7116_v11, %s7980_s23  ;;  %v2740_v47 = vadd.f32 %v8304_v19, %v2540_v50  ;;  %v2738_v23 = vadd.f32 %v8304_v19, %v2538_v26 }
 0x19e   :  { %v1458_v13 = vadd.f32 %v1457_v1, %v8280_v2  ;;  %v7634_v48 = vpop.f32.mrb[98].mxu0  ;;  %v2342_v38 = vsel %vm1950_vm7, %v1450_v4, %v2146_v0  ;;  %v2541_v58 = vmul.f32 %v8296_v12, %v2341_v9  ;;  %v3959_v29 = vsel %vm3951_vm1, %v3908_v60, %v3522_v42 }
 0x19f   :  { %vm1954_vm8 = vcmp.gt.f32.partialorder %v1466_v43, 0.0  ;;  %v2150_v46 = vmul.f32 0.2, %v1466_v43  ;;  %v1460_v16 = vpop.f32.mrb[99].mxu0  ;;  %v1469_v49 = vadd.f32 %v7634_v48, %v8280_v2  ;;  %v7138_v26 = vpack.c.bf16 %v2740_v47, %v2738_v23  ;;  %v3451_v39 = vpop.permute.xlu1 %3450 }
 0x1a0   :  { %vm1952_vm2 = vcmp.gt.f32.partialorder %v1458_v13, 0.0  ;;  %v2148_v28 = vmul.f32 0.2, %v1458_v13  ;;  %v1461_v35 = vadd.f32 %v1460_v16, %v8280_v2  ;;  %v2743_v4 = vadd.f32 %v8304_v19, %v2543_v27 }
 0x1a1   :  { %v2346_v44 = vsel %vm1954_vm8, %v1466_v43, %v2150_v46  ;;  %3612 = vrot.lane.b32.xlu1 %v7162_v34, %s7979_s17  ;;  %v9194_v22 = vpop.permute.xlu0 %3598  ;;  %v3861_v0 = vsel %vm3853_vm10, %v3795_v62, %v9080_v17  ;;  %v2542_v11 = vmul.f32 %v8296_v12, %v2342_v38  ;;  %v2741_v42 = vadd.f32 %v8304_v19, %v2541_v58 }
 0x1a2   :  { %v2546_v50 = vmul.f32 %v8296_v12, %v2346_v44  ;;  %vm1953_vm9 = vcmp.gt.f32.partialorder %v1461_v35, 0.0  ;;  %v2149_v37 = vmul.f32 0.2, %v1461_v35  ;;  %v2344_v9 = vsel %vm1952_vm2, %v1458_v13, %v2148_v28 }
 0x1a3   :  { %v9204_v60 = vsel %vm3853_vm10, %v3798_v30, %v9134_v18  ;;  %v4010_v34 = vsel %vm4002_vm4, %v3959_v29, %v3597_v33  ;;  %v2151_v17 = vmul.f32 0.2, %v1469_v49  ;;  %v7163_v62 = vpack.c.bf16 %v2741_v42, %v9156_v61 }
 0x1a4   :  { %v9208_v27 = vadd.f32 %v8304_v19, %v2546_v50  ;;  %v2345_v43 = vsel %vm1953_vm9, %v1461_v35, %v2149_v37  ;;  %v7637_v1 = vpop.f32.mrb[100].mxu0  ;;  %v7117_v30 = vpack.c.bf16 %v2743_v4, %v2741_v42  ;;  %v3910_v33 = vsel %vm3900_vm12, %v3859_v52, %v3449_v55 }
 0x1a5   :  { %v2545_v47 = vmul.f32 %v8296_v12, %v2345_v43  ;;  %3539 = vrot.lane.b32.xlu1 %v7138_v26, %s7978_s16  ;;  %v1482_v13 = vadd.f32 %v7637_v1, %v8280_v2  ;;  %v9214_v48 = vpop.permute.xlu0 %3525  ;;  %v1473_v18 = vpop.f32.mrb[101].mxu0  ;;  %v2544_v23 = vmul.f32 %v8296_v12, %v2344_v9  ;;  %vm1955_vm11 = vcmp.gt.f32.partialorder %v1469_v49, 0.0  ;;  %3614 = vrot.lane.b32.xlu0 %v7163_v62, %s7979_s17 }
 0x1a6   :  { %v1474_v38 = vadd.f32 %v1473_v18, %v8280_v2  ;;  %v7638_v58 = vpop.f32.mrb[102].mxu0  ;;  %v7189_v28 = vpack.c.bf16 %v9208_v27, %v9084_v54  ;;  %v2742_v29 = vadd.f32 %v8304_v19, %v2542_v11  ;;  %v2347_v44 = vsel %vm1955_vm11, %v1469_v49, %v2151_v17 }
 0x1a7   :  { %vm1958_vm14 = vcmp.gt.f32.partialorder %v1482_v13, 0.0  ;;  %v2154_v46 = vmul.f32 0.2, %v1482_v13  ;;  %v9220_v16 = vpop.permute.xlu1 %3600  ;;  %v1476_v61 = vpop.f32.mrb[103].mxu0  ;;  %v2745_v35 = vadd.f32 %v8304_v19, %v2545_v47  ;;  %v3961_v26 = vsel %vm3951_vm1, %v3910_v33, %v9170_v45 }
 0x1a8   :  { %vm1956_vm0 = vcmp.gt.f32.partialorder %v1474_v38, 0.0  ;;  %v2152_v52 = vmul.f32 0.2, %v1474_v38  ;;  %v1477_v55 = vadd.f32 %v1476_v61, %v8280_v2  ;;  %v1485_v54 = vadd.f32 %v7638_v58, %v8280_v2 }
 0x1a9   :  { %v2350_v50 = vsel %vm1958_vm14, %v1482_v13, %v2154_v46  ;;  %3466 = vrot.lane.b32.xlu1 %v7117_v30, %s7980_s23  ;;  %v3453_v37 = vpop.permute.xlu0 %3452  ;;  %v7164_v9 = vpack.c.bf16 %v2745_v35, %v2743_v4  ;;  %3744 = vrot.lane.b32.xlu0 %v7189_v28, %s7982_s27  ;;  %v2744_v11 = vadd.f32 %v8304_v19, %v2544_v23 }
 0x1aa   :  { %v2348_v42 = vsel %vm1956_vm0, %v1474_v38, %v2152_v52  ;;  %vm1957_vm3 = vcmp.gt.f32.partialorder %v1477_v55, 0.0  ;;  %v2153_v43 = vmul.f32 0.2, %v1477_v55  ;;  %v2550_v1 = vmul.f32 %v8296_v12, %v2350_v50 }
 0x1ab   :  { %v2548_v47 = vmul.f32 %v8296_v12, %v2348_v42  ;;  %v3731_v49 = vpop.permute.xlu1 %3730  ;;  %v4061_v45 = vsel %vm4053_vm13, %v4010_v34, %v9142_v25  ;;  %v2547_v17 = vmul.f32 %v8296_v12, %v2347_v44  ;;  %v9239_v4 = vsel %vm3900_vm12, %v3861_v0, %v3451_v39 }
 0x1ac   :  { %v2349_v62 = vsel %vm1957_vm3, %v1477_v55, %v2153_v43  ;;  %v7641_v13 = vpop.f32.mrb[104].mxu0  ;;  %v4115_v18 = vsel %vm4104_vm15, %v4061_v45, %v3731_v49  ;;  %v7139_v38 = vpack.c.bf16 %v2744_v11, %v2742_v29  ;;  %v2155_v58 = vmul.f32 0.2, %v1485_v54 }
 0x1ad   :  { %v2549_v30 = vmul.f32 %v8296_v12, %v2349_v62  ;;  %3616 = vrot.lane.b32.xlu1 %v7164_v9, %s7979_s17  ;;  %v1498_v33 = vadd.f32 %v7641_v13, %v8280_v2  ;;  %4355 = vmatmul.mubr.bf16.gmra.mrb[12].mxu1 %v4115_v18  ;;  %v1489_v23 = vpop.f32.mrb[105].mxu0  ;;  %v9246_v34 = vpop.permute.xlu0 %3602  ;;  %v2748_v39 = vadd.f32 %v8304_v19, %v2548_v47  ;;  %vm1959_vm7 = vcmp.gt.f32.partialorder %v1485_v54, 0.0 }
 0x1ae   :  { %v1490_v25 = vadd.f32 %v1489_v23, %v8280_v2  ;;  %6886 = vmatprep.mubr.msk.bf16.mxu1 %vm3784_vm6, %v8725_v32  ;;  %v7642_v0 = vpop.f32.mrb[106].mxu0  ;;  %v9253_v46 = vpack.c.bf16 %v8992_v41, %v8930_v56  ;;  %3541 = vrot.lane.b32.xlu0 %v7139_v38, %s7978_s16  ;;  %v9258_v55 = vadd.f32 %v8304_v19, %v2550_v1 }
 0x1af   :  { %vm1962_vm5 = vcmp.gt.f32.partialorder %v1498_v33, 0.0  ;;  %v2158_v61 = vmul.f32 0.2, %v1498_v33  ;;  %v1501_v28 = vadd.f32 %v7642_v0, %v8280_v2  ;;  %v3528_v35 = vpop.permute.xlu1 %3527  ;;  %v1492_v52 = vpop.f32.mrb[107].mxu0  ;;  %v9262_v50 = vadd.f32 %v8304_v19, %v2547_v17 }
 0x1b0   :  { %vm1960_vm8 = vcmp.gt.f32.partialorder %v1490_v25, 0.0  ;;  %v2156_v29 = vmul.f32 0.2, %v1490_v25  ;;  %v1493_v44 = vadd.f32 %v1492_v52, %v8280_v2  ;;  %v7076_v41 = vpack.c.bf16 %v2748_v39, %v9208_v27 }
 0x1b1   :  { %v2354_v56 = vsel %vm1962_vm5, %v1498_v33, %v2158_v61  ;;  %v9266_v9 = vadd.f32 %v8304_v19, %v2549_v30  ;;  %v2351_v47 = vsel %vm1959_vm7, %v1485_v54, %v2155_v58  ;;  %v2159_v11 = vmul.f32 0.2, %v1501_v28 }
 0x1b2   :  { %v2554_v42 = vmul.f32 %v8296_v12, %v2354_v56  ;;  %v2352_v43 = vsel %vm1960_vm8, %v1490_v25, %v2156_v29  ;;  %vm1961_vm2 = vcmp.gt.f32.partialorder %v1493_v44, 0.0  ;;  %v2157_v1 = vmul.f32 0.2, %v1493_v44  ;;  %3325 = vrot.lane.b32.xlu0 %v7076_v41, %s7976_s28 }
 0x1b3   :  { %v2552_v49 = vmul.f32 %v8296_v12, %v2352_v43  ;;  %v7190_v45 = vpack.c.bf16 %v9258_v55, %v2748_v39  ;;  %v3733_v17 = vpop.permute.xlu0 %3732  ;;  %v4012_v62 = vsel %vm4002_vm4, %v3961_v26, %v9194_v22  ;;  %v3914_v13 = vsel %vm3900_vm12, %v9204_v60, %v3453_v37 }
 0x1b4   :  { %vm1963_vm9 = vcmp.gt.f32.partialorder %v1501_v28, 0.0  ;;  %v9276_v18 = vpop.permute.xlu1 %3311  ;;  %v7645_v30 = vpop.f32.mrb[108].mxu0  ;;  %v9279_v54 = vadd.f32 %v8304_v19, %v2554_v42  ;;  %v2353_v33 = vsel %vm1961_vm2, %v1493_v44, %v2157_v1  ;;  %v7097_v58 = vpack.c.bf16 %v9266_v9, %v9262_v50 }
 0x1b5   :  { %3746 = vrot.lane.b32.xlu1 %v7190_v45, %s7982_s27  ;;  %v1514_v38 = vadd.f32 %v7645_v30, %v8280_v2  ;;  %v1505_v23 = vpop.f32.mrb[109].mxu0  ;;  %v2752_v22 = vadd.f32 %v8304_v19, %v2552_v49  ;;  %v2551_v60 = vmul.f32 %v8296_v12, %v2351_v47  ;;  %v9292_v25 = vpack.c.bf16 %v9034_v53, %v8977_v20 }
 0x1b6   :  { %v1506_v26 = vadd.f32 %v1505_v23, %v8280_v2  ;;  %v9288_v37 = vpop.f32.mrb[110].mxu0  ;;  %v9296_v0 = vpack.c.bf16 %v9069_v10, %v9013_v5  ;;  %v2355_v39 = vsel %vm1963_vm9, %v1501_v28, %v2159_v11  ;;  %3671 = vrot.lane.b32.xlu0 %v7097_v58, %s7981_s26  ;;  %v2553_v56 = vmul.f32 %v8296_v12, %v2353_v33 }
 0x1b7   :  { %vm1966_vm11 = vcmp.gt.f32.partialorder %v1514_v38, 0.0  ;;  %v2162_v61 = vmul.f32 0.2, %v1514_v38  ;;  %v1508_v52 = vpop.f32.mrb[111].mxu0  ;;  %v9299_v29 = vpop.permute.xlu0 %3379  ;;  %v7191_v44 = vpack.c.bf16 %v9279_v54, %v2752_v22  ;;  %v3963_v5 = vsel %vm3951_vm1, %v9239_v4, %v9214_v48 }
 0x1b8   :  { %vm1964_vm14 = vcmp.gt.f32.partialorder %v1506_v26, 0.0  ;;  %v2160_v41 = vmul.f32 0.2, %v1506_v26  ;;  %v1509_v20 = vadd.f32 %v1508_v52, %v8280_v2  ;;  %v3658_v53 = vpop.permute.xlu1 %3657  ;;  %v3965_v10 = vsel %vm3951_vm1, %v3914_v13, %v3528_v35 }
 0x1b9   :  { %v2358_v28 = vsel %vm1966_vm11, %v1514_v38, %v2162_v61  ;;  %3393 = vrot.lane.b32.xlu1 %v7097_v58, %s7977_s14  ;;  %v4063_v42 = vsel %vm4053_vm13, %v4012_v62, %v3658_v53  ;;  %v2555_v43 = vmul.f32 %v8296_v12, %v2355_v39  ;;  %v7077_v48 = vpack.c.bf16 %v2752_v22, %v9258_v55 }
 0x1ba   :  { %v2356_v1 = vsel %vm1964_vm14, %v1506_v26, %v2160_v41  ;;  %vm1965_vm0 = vcmp.gt.f32.partialorder %v1509_v20, 0.0  ;;  %v2161_v47 = vmul.f32 0.2, %v1509_v20  ;;  %v2558_v49 = vmul.f32 %v8296_v12, %v2358_v28  ;;  %3748 = vrot.lane.b32.xlu0 %v7191_v44, %s7982_s27 }
 0x1bb   :  { %v2556_v11 = vmul.f32 %v8296_v12, %v2356_v1  ;;  %v4118_v4 = vsel %vm4104_vm15, %v4063_v42, %v3733_v17  ;;  %v9316_v35 = vpop.permute.xlu0 %3313  ;;  %v4014_v45 = vsel %vm4002_vm4, %v3963_v5, %v9220_v16  ;;  %v9321_v33 = vadd.f32 %v8304_v19, %v2551_v60 }
 0x1bc   :  { %v2357_v62 = vsel %vm1965_vm0, %v1509_v20, %v2161_v47  ;;  %4363 = vmatmul.mubr.bf16.gmra.mrb[16].mxu1 %v4118_v4  ;;  %v3735_v13 = vpop.permute.xlu1 %3734  ;;  %v7649_v30 = vpop.f32.mrb[112].mxu0  ;;  %v9324_v38 = vadd.f32 %v8304_v19, %v2553_v56  ;;  %v9333_v17 = vsel %vm4002_vm4, %v3965_v10, %v9246_v34  ;;  %v9336_v58 = vadd.f32 %v8304_v19, %v2555_v43 }
 0x1bd   :  { %v2557_v23 = vmul.f32 %v8296_v12, %v2357_v62  ;;  %3327 = vrot.lane.b32.xlu1 %v7077_v48, %s7976_s28  ;;  %6887 = vmatprep.mubr.msk.bf16.mxu1 %vm3784_vm6, %v8759_v7  ;;  %v1530_v55 = vadd.f32 %v7649_v30, %v8280_v2  ;;  %v1521_v16 = vpop.f32.mrb[113].mxu0  ;;  %v9339_v22 = vadd.f32 %v8304_v19, %v2556_v11 }
 0x1be   :  { %v1522_v60 = vadd.f32 %v1521_v16, %v8280_v2  ;;  %v7098_v26 = vpack.c.bf16 %v9324_v38, %v9321_v33  ;;  %v7650_v39 = vpop.f32.mrb[114].mxu0  ;;  %v9346_v34 = vadd.f32 %v8304_v19, %v2558_v49 }
 0x1bf   :  { %vm1970_vm3 = vcmp.gt.f32.partialorder %v1530_v55, 0.0  ;;  %v2166_v61 = vmul.f32 0.2, %v1530_v55  ;;  %v1533_v52 = vadd.f32 %v7650_v39, %v8280_v2  ;;  %v1524_v44 = vpop.f32.mrb[115].mxu0  ;;  %v3660_v56 = vpop.permute.xlu0 %3659  ;;  %v9349_v41 = vadd.f32 %v8304_v19, %v2557_v23 }
 0x1c0   :  { %vm1968_vm5 = vcmp.gt.f32.partialorder %v1522_v60, 0.0  ;;  %v2164_v20 = vmul.f32 0.2, %v1522_v60  ;;  %3395 = vrot.lane.b32.xlu0 %v7098_v26, %s7977_s14  ;;  %v1525_v53 = vadd.f32 %v1524_v44, %v8280_v2  ;;  %v9353_v5 = vpop.permute.xlu1 %3381  ;;  %v4065_v42 = vsel %vm4053_vm13, %v4014_v45, %v3660_v56 }
 0x1c1   :  { %v2362_v10 = vsel %vm1970_vm3, %v1530_v55, %v2166_v61  ;;  %3673 = vrot.lane.b32.xlu1 %v7098_v26, %s7981_s26  ;;  %vm1971_vm7 = vcmp.gt.f32.partialorder %v1533_v52, 0.0  ;;  %v2167_v28 = vmul.f32 0.2, %v1533_v52  ;;  %v7078_v48 = vpack.c.bf16 %v9339_v22, %v9279_v54 }
 0x1c2   :  { %v2562_v43 = vmul.f32 %v8296_v12, %v2362_v10  ;;  %v2360_v1 = vsel %vm1968_vm5, %v1522_v60, %v2164_v20  ;;  %vm1969_vm8 = vcmp.gt.f32.partialorder %v1525_v53, 0.0  ;;  %v2165_v47 = vmul.f32 0.2, %v1525_v53 }
 0x1c3   :  { %v2560_v49 = vmul.f32 %v8296_v12, %v2360_v1  ;;  %v2363_v11 = vsel %vm1971_vm7, %v1533_v52, %v2167_v28  ;;  %v7192_v4 = vpack.c.bf16 %v9346_v34, %v9339_v22  ;;  %v4121_v45 = vsel %vm4104_vm15, %v4065_v42, %v3735_v13 }
 0x1c4   :  { %v2762_v62 = vadd.f32 %v8304_v19, %v2562_v43  ;;  %v2563_v30 = vmul.f32 %v8296_v12, %v2363_v11  ;;  %v2361_v23 = vsel %vm1969_vm8, %v1525_v53, %v2165_v47  ;;  %v7653_v55 = vpop.f32.mrb[116].mxu0  ;;  %3329 = vrot.lane.b32.xlu0 %v7078_v48, %s7976_s28  ;;  %v9380_v13 = vsel %vm3784_vm6, %v3261_v14, %v9276_v18  ;;  %v3737_v53 = vpop.permute.xlu0 %3736 }
 0x1c5   :  { %v9367_v16 = vadd.f32 %v8304_v19, %v2560_v49  ;;  %v2561_v60 = vmul.f32 %v8296_v12, %v2361_v23  ;;  %3750 = vrot.lane.b32.xlu1 %v7192_v4, %s7982_s27  ;;  %v9372_v54 = vpop.permute.xlu1 %3315  ;;  %v1546_v26 = vadd.f32 %v7653_v55, %v8280_v2  ;;  %v1537_v39 = vpop.f32.mrb[117].mxu0  ;;  %4371 = vmatmul.mubr.bf16.gmra.mrb[20].mxu1 %v4121_v45 }
 0x1c6   :  { %v9383_v61 = vadd.f32 %v8304_v19, %v2563_v30  ;;  %v1538_v52 = vadd.f32 %v1537_v39, %v8280_v2  ;;  %v7099_v44 = vpack.c.bf16 %v9349_v41, %v9336_v58  ;;  %v7654_v56 = vpop.f32.mrb[118].mxu0  ;;  %6888 = vmatprep.mubr.msk.bf16.mxu1 %vm3784_vm6, %v7205_v36  ;;  %v9398_v43 = vadd.f32 %v9288_v37, %v8280_v2 }
 0x1c7   :  { %v2761_v20 = vadd.f32 %v8304_v19, %v2561_v60  ;;  %vm1974_vm2 = vcmp.gt.f32.partialorder %v1546_v26, 0.0  ;;  %v2170_v8 = vmul.f32 0.2, %v1546_v26  ;;  %v1549_v14 = vadd.f32 %v7654_v56, %v8280_v2  ;;  %v1540_v18 = vpop.f32.mrb[119].mxu0 }
 0x1c8   :  { %vm1972_vm9 = vcmp.gt.f32.partialorder %v1538_v52, 0.0  ;;  %v2168_v10 = vmul.f32 0.2, %v1538_v52  ;;  %v1541_v28 = vadd.f32 %v1540_v18, %v8280_v2  ;;  %v7140_v42 = vpack.c.bf16 %v2762_v62, %v9367_v16  ;;  %3675 = vrot.lane.b32.xlu0 %v7099_v44, %s7981_s26 }
 0x1c9   :  { %v2366_v1 = vsel %vm1974_vm2, %v1546_v26, %v2170_v8  ;;  %3397 = vrot.lane.b32.xlu1 %v7099_v44, %s7977_s14  ;;  %vm1975_vm11 = vcmp.gt.f32.partialorder %v1549_v14, 0.0  ;;  %v2171_v21 = vmul.f32 0.2, %v1549_v14  ;;  %v3662_v36 = vpop.permute.xlu1 %3661  ;;  %v7165_v62 = vpack.c.bf16 %v9383_v61, %v2761_v20 }
 0x1ca   :  { %v2566_v47 = vmul.f32 %v8296_v12, %v2366_v1  ;;  %v2364_v49 = vsel %vm1972_vm9, %v1538_v52, %v2168_v10  ;;  %vm1973_vm14 = vcmp.gt.f32.partialorder %v1541_v28, 0.0  ;;  %v2169_v11 = vmul.f32 0.2, %v1541_v28  ;;  %v9415_v52 = vpop.permute.xlu0 %3383 }
 0x1cb   :  { %v2564_v48 = vmul.f32 %v8296_v12, %v2364_v49  ;;  %v2367_v4 = vsel %vm1975_vm11, %v1549_v14, %v2171_v21  ;;  %v4067_v37 = vsel %vm4053_vm13, %v9333_v17, %v3662_v36  ;;  %vm1967_vm0 = vcmp.gt.f32.partialorder %v9398_v43, 0.0 }
 0x1cc   :  { %v9408_v30 = vadd.f32 %v8304_v19, %v2566_v47  ;;  %v2567_v23 = vmul.f32 %v8296_v12, %v2367_v4  ;;  %v2365_v45 = vsel %vm1973_vm14, %v1541_v28, %v2169_v11  ;;  %v4124_v55 = vsel %vm4104_vm15, %v4067_v37, %v3737_v53  ;;  %v7657_v60 = vpop.f32.mrb[120].mxu0  ;;  %3618 = vrot.lane.b32.xlu0 %v7165_v62, %s7979_s17 }
 0x1cd   :  { %v2764_v26 = vadd.f32 %v8304_v19, %v2564_v48  ;;  %v2565_v39 = vmul.f32 %v8296_v12, %v2365_v45  ;;  %3543 = vrot.lane.b32.xlu1 %v7140_v42, %s7978_s16  ;;  %v1562_v17 = vadd.f32 %v7657_v60, %v8280_v2  ;;  %v1553_v44 = vpop.f32.mrb[121].mxu0  ;;  %v2163_v56 = vmul.f32 0.2, %v9398_v43  ;;  %4379 = vmatmul.mubr.bf16.gmra.mrb[24].mxu1 %v4124_v55 }
 0x1ce   :  { %v9422_v53 = vadd.f32 %v8304_v19, %v2567_v23  ;;  %v1554_v8 = vadd.f32 %v1553_v44, %v8280_v2  ;;  %v7658_v14 = vpop.f32.mrb[122].mxu0  ;;  %v2900_v18 = vpack.c.bf16 %v2761_v20, %v9367_v16  ;;  %6889 = vmatprep.mubr.msk.bf16.mxu1 %vm3784_vm6, %v9253_v46  ;;  %v3530_v62 = vpop.permute.xlu0 %3529 }
 0x1cf   :  { %v2765_v10 = vadd.f32 %v8304_v19, %v2565_v39  ;;  %vm1978_vm3 = vcmp.gt.f32.partialorder %v1562_v17, 0.0  ;;  %v2174_v28 = vmul.f32 0.2, %v1562_v17  ;;  %v9429_v42 = vpop.permute.xlu1 %3604  ;;  %v1565_v1 = vadd.f32 %v7658_v14, %v8280_v2  ;;  %v1556_v21 = vpop.f32.mrb[123].mxu0 }
 0x1d0   :  { %vm1976_vm5 = vcmp.gt.f32.partialorder %v1554_v8, 0.0  ;;  %v2172_v36 = vmul.f32 0.2, %v1554_v8  ;;  %v1557_v47 = vadd.f32 %v1556_v21, %v8280_v2  ;;  %v3153_v49 = vunpack.c.h.b16 %v2900_v18 }
 0x1d1   :  { %v2370_v11 = vsel %vm1978_vm3, %v1562_v17, %v2174_v28  ;;  %vm1979_vm7 = vcmp.gt.f32.partialorder %v1565_v1, 0.0  ;;  %v2175_v16 = vmul.f32 0.2, %v1565_v1  ;;  %v7141_v20 = vpack.c.bf16 %v9408_v30, %v2764_v26 }
 0x1d2   :  { %v2570_v48 = vmul.f32 %v8296_v12, %v2370_v11  ;;  %v2368_v4 = vsel %vm1976_vm5, %v1554_v8, %v2172_v36  ;;  %vm1977_vm8 = vcmp.gt.f32.partialorder %v1557_v47, 0.0  ;;  %v2173_v37 = vmul.f32 0.2, %v1557_v47 }
 0x1d3   :  { %v2568_v23 = vmul.f32 %v8296_v12, %v2368_v4  ;;  %v2371_v45 = vsel %vm1979_vm7, %v1565_v1, %v2175_v16  ;;  %v3429_v55 = vpack.c.b16 %v3153_v49, %v8327_v40  ;;  %v3455_v60 = vpop.permute.xlu1 %3454  ;;  %v7118_v39 = vpack.c.bf16 %v2765_v10, %v9383_v61 }
 0x1d4   :  { %v3865_v17 = vsel %vm3853_vm10, %v9380_v13, %v9299_v29  ;;  %v9442_v30 = vadd.f32 %v8304_v19, %v2570_v48  ;;  %v2571_v26 = vmul.f32 %v8296_v12, %v2371_v45  ;;  %v2369_v44 = vsel %vm1977_vm8, %v1557_v47, %v2173_v37  ;;  %v7661_v8 = vpop.f32.mrb[124].mxu0 }
 0x1d5   :  { %v2359_v14 = vsel %vm1967_vm0, %v9398_v43, %v2163_v56  ;;  %v2768_v18 = vadd.f32 %v8304_v19, %v2568_v23  ;;  %v2569_v28 = vmul.f32 %v8296_v12, %v2369_v44  ;;  %3468 = vrot.lane.b32.xlu0 %v3429_v55, %s7980_s23  ;;  %3470 = vrot.lane.b32.xlu1 %v7118_v39, %s7980_s23  ;;  %v1569_v29 = vpop.f32.mrb[125].mxu0  ;;  %v9458_v43 = vunpack.c.h.b16 %v2870_v57 }
 0x1d6   :  { %v3916_v13 = vsel %vm3900_vm12, %v3865_v17, %v3455_v60  ;;  %v1578_v61 = vadd.f32 %v7661_v8, %v8280_v2  ;;  %v7662_v1 = vpop.f32.mrb[126].mxu0  ;;  %v7166_v21 = vpack.c.bf16 %v9422_v53, %v2765_v10  ;;  %v2771_v56 = vadd.f32 %v8304_v19, %v2571_v26 }
 0x1d7   :  { %v2769_v36 = vadd.f32 %v8304_v19, %v2569_v28  ;;  %v3457_v47 = vpop.permute.xlu0 %3456  ;;  %v1581_v49 = vadd.f32 %v7662_v1, %v8280_v2  ;;  %v7142_v11 = vpack.c.bf16 %v9442_v30, %v2768_v18  ;;  %v2559_v16 = vmul.f32 %v8296_v12, %v2359_v14  ;;  %v1572_v24 = vpop.f32.mrb[127].mxu0 }
 0x1d8   :  { %vm1982_vm2 = vcmp.gt.f32.partialorder %v1578_v61, 0.0  ;;  %v2178_v48 = vmul.f32 0.2, %v1578_v61  ;;  %v1570_v10 = vadd.f32 %v1569_v29, %v8280_v2  ;;  %v3967_v4 = vsel %vm3951_vm1, %v3916_v13, %v3530_v62  ;;  %v3532_v55 = vpop.permute.xlu1 %3531 }
 0x1d9   :  { %3545 = vrot.lane.b32.xlu0 %v7141_v20, %s7978_s16  ;;  %vm1983_vm9 = vcmp.gt.f32.partialorder %v1581_v49, 0.0  ;;  %v2179_v15 = vmul.f32 0.2, %v1581_v49  ;;  %3620 = vrot.lane.b32.xlu1 %v7166_v21, %s7979_s17  ;;  %v7119_v57 = vpack.c.bf16 %v2769_v36, %v9422_v53  ;;  %v3804_v45 = vsel %vm3784_vm6, %v8725_v32, %v9316_v35 }
 0x1da   :  { %v2374_v37 = vsel %vm1982_vm2, %v1578_v61, %v2178_v48  ;;  %v3807_v20 = vsel %vm3784_vm6, %v8759_v7, %v9372_v54  ;;  %v7167_v17 = vpack.c.bf16 %v2771_v56, %v2769_v36  ;;  %v9481_v53 = vadd.f32 %v8304_v19, %v2559_v16 }
 0x1db   :  { %v2375_v60 = vsel %vm1983_vm9, %v1581_v49, %v2179_v15  ;;  %v9478_v39 = vpop.permute.xlu0 %3606  ;;  %v3867_v62 = vsel %vm3853_vm10, %v3804_v45, %v9353_v5  ;;  %v9487_v26 = vsel %vm3853_vm10, %v3807_v20, %v9415_v52  ;;  %v2574_v7 = vmul.f32 %v8296_v12, %v2374_v37 }
 0x1dc   :  { %v2575_v32 = vmul.f32 %v8296_v12, %v2375_v60  ;;  %v7665_v35 = vpop.f32.mrb[128].mxu0  ;;  %v2176_v54 = vmul.f32 0.2, %v1570_v10  ;;  %v9496_v5 = vsel %vm4002_vm4, %v3967_v4, %v9429_v42  ;;  %vm1980_vm11 = vcmp.gt.f32.partialorder %v1570_v10, 0.0 }
 0x1dd   :  { %3472 = vrot.lane.b32.xlu0 %v7119_v57, %s7980_s23  ;;  %3547 = vrot.lane.b32.xlu1 %v7142_v11, %s7978_s16  ;;  %v1594_v44 = vadd.f32 %v7665_v35, %v8280_v2  ;;  %v1585_v8 = vpop.f32.mrb[129].mxu0  ;;  %v3918_v52 = vsel %vm3900_vm12, %v3867_v62, %v3457_v47  ;;  %v2905_v28 = vpack.c.bf16 %v2771_v56, %v9442_v30  ;;  %v9506_v1 = vpop.permute.xlu1 %3458 }
 0x1de   :  { %v1586_v14 = vadd.f32 %v1585_v8, %v8280_v2  ;;  %v7666_v18 = vpop.f32.mrb[130].mxu0  ;;  %v9502_v29 = vadd.f32 %v8304_v19, %v2575_v32  ;;  %v1573_v21 = vadd.f32 %v1572_v24, %v8280_v2  ;;  %v9511_v11 = vadd.f32 %v8304_v19, %v2574_v7 }
 0x1df   :  { %vm1986_vm14 = vcmp.gt.f32.partialorder %v1594_v44, 0.0  ;;  %v2182_v13 = vmul.f32 0.2, %v1594_v44  ;;  %v9504_v61 = vpop.permute.xlu0 %3533  ;;  %v1597_v42 = vadd.f32 %v7666_v18, %v8280_v2  ;;  %v1588_v47 = vpop.f32.mrb[131].mxu0  ;;  %v3163_v49 = vunpack.c.h.b16 %v2905_v28 }
 0x1e0   :  { %vm1984_vm0 = vcmp.gt.f32.partialorder %v1586_v14, 0.0  ;;  %v2180_v36 = vmul.f32 0.2, %v1586_v14  ;;  %v2372_v30 = vsel %vm1980_vm11, %v1570_v10, %v2176_v54  ;;  %v1589_v15 = vadd.f32 %v1588_v47, %v8280_v2 }
 0x1e1   :  { %vm1987_vm3 = vcmp.gt.f32.partialorder %v1597_v42, 0.0  ;;  %v2183_v56 = vmul.f32 0.2, %v1597_v42  ;;  %3622 = vrot.lane.b32.xlu0 %v7167_v17, %s7979_s17  ;;  %v2378_v16 = vsel %vm1986_vm14, %v1594_v44, %v2182_v13  ;;  %v3432_v57 = vpack.c.b16 %v8327_v40, %v3163_v49  ;;  %v9521_v45 = vpop.permute.xlu1 %3608 }
 0x1e2   :  { %v2376_v48 = vsel %vm1984_vm0, %v1586_v14, %v2180_v36  ;;  %v9518_v24 = vsel %vm3951_vm1, %v3918_v52, %v3532_v55  ;;  %v7100_v10 = vpack.c.bf16 %v9502_v29, %v9481_v53  ;;  %v9526_v20 = vmul.f32 %v8296_v12, %v2372_v30 }
 0x1e3   :  { %v2576_v4 = vmul.f32 %v8296_v12, %v2376_v48  ;;  %v2379_v37 = vsel %vm1987_vm3, %v1597_v42, %v2183_v56  ;;  %v2177_v60 = vmul.f32 0.2, %v1573_v21  ;;  %vm1985_vm5 = vcmp.gt.f32.partialorder %v1589_v15, 0.0  ;;  %3474 = vrot.lane.b32.xlu1 %v3432_v57, %s7980_s23  ;;  %v9531_v35 = vpop.permute.xlu0 %3460 }
 0x1e4   :  { %v2181_v17 = vmul.f32 0.2, %v1589_v15  ;;  %v7669_v62 = vpop.f32.mrb[132].mxu0  ;;  %v2578_v55 = vmul.f32 %v8296_v12, %v2378_v16  ;;  %v2579_v32 = vmul.f32 %v8296_v12, %v2379_v37  ;;  %v7079_v7 = vpack.c.bf16 %v9511_v11, %v9346_v34 }
 0x1e5   :  { %3399 = vrot.lane.b32.xlu0 %v7100_v10, %s7977_s14  ;;  %v1610_v54 = vadd.f32 %v7669_v62, %v8280_v2  ;;  %v1601_v44 = vpop.f32.mrb[133].mxu0  ;;  %v9538_v8 = vadd.f32 %v8304_v19, %v2576_v4  ;;  %v2907_v28 = vpack.c.bf16 %v9502_v29, %v9511_v11  ;;  %v9546_v49 = vpop.permute.xlu1 %3385  ;;  %vm1981_vm2 = vcmp.gt.f32.partialorder %v1573_v21, 0.0 }
 0x1e6   :  { %v2377_v52 = vsel %vm1985_vm5, %v1589_v15, %v2181_v17  ;;  %v1602_v14 = vadd.f32 %v1601_v44, %v8280_v2  ;;  %v7670_v18 = vpop.f32.mrb[134].mxu0  ;;  %v9552_v57 = vadd.f32 %v8304_v19, %v2579_v32  ;;  %v9558_v10 = vadd.f32 %v8304_v19, %v2578_v55 }
 0x1e7   :  { %v2577_v13 = vmul.f32 %v8296_v12, %v2377_v52  ;;  %vm1990_vm7 = vcmp.gt.f32.partialorder %v1610_v54, 0.0  ;;  %v2186_v42 = vmul.f32 0.2, %v1610_v54  ;;  %v1613_v36 = vadd.f32 %v7670_v18, %v8280_v2  ;;  %v1604_v34 = vpop.f32.mrb[135].mxu0  ;;  %3331 = vrot.lane.b32.xlu1 %v7079_v7, %s7976_s28  ;;  %v9549_v48 = vpop.permute.xlu0 %3317 }
 0x1e8   :  { %vm1988_vm8 = vcmp.gt.f32.partialorder %v1602_v14, 0.0  ;;  %v2184_v47 = vmul.f32 0.2, %v1602_v14  ;;  %v1605_v30 = vadd.f32 %v1604_v34, %v8280_v2  ;;  %v3167_v56 = vunpack.c.h.b16 %v2907_v28 }
 0x1e9   :  { %v2382_v16 = vsel %vm1990_vm7, %v1610_v54, %v2186_v42  ;;  %vm1991_vm9 = vcmp.gt.f32.partialorder %v1613_v36, 0.0  ;;  %v2187_v15 = vmul.f32 0.2, %v1613_v36  ;;  %v9555_v4 = vadd.f32 %v8304_v19, %v2577_v13 }
 0x1ea   :  { %v2380_v37 = vsel %vm1988_vm8, %v1602_v14, %v2184_v47  ;;  %vm1989_vm11 = vcmp.gt.f32.partialorder %v1605_v30, 0.0  ;;  %v2185_v7 = vmul.f32 0.2, %v1605_v30  ;;  %v2373_v54 = vsel %vm1981_vm2, %v1573_v21, %v2177_v60 }
 0x1eb   :  { %v2580_v17 = vmul.f32 %v8296_v12, %v2380_v37  ;;  %v2383_v62 = vsel %vm1991_vm9, %v1613_v36, %v2187_v15  ;;  %v2582_v44 = vmul.f32 %v8296_v12, %v2382_v16  ;;  %v3643_v52 = vpack.c.b16 %v3167_v56, %v8327_v40  ;;  %v3739_v18 = vpop.permute.xlu1 %3738 }
 0x1ec   :  { %v7193_v32 = vpack.c.bf16 %v9538_v8, %v9511_v11  ;;  %v7673_v28 = vpop.f32.mrb[136].mxu0  ;;  %v2583_v55 = vmul.f32 %v8296_v12, %v2383_v62  ;;  %v2381_v13 = vsel %vm1989_vm11, %v1605_v30, %v2185_v7  ;;  %v3664_v42 = vpop.permute.xlu0 %3663  ;;  %v7101_v60 = vpack.c.bf16 %v9552_v57, %v9555_v4 }
 0x1ed   :  { %v9566_v14 = vadd.f32 %v8304_v19, %v2580_v17  ;;  %v1626_v36 = vadd.f32 %v7673_v28, %v8280_v2  ;;  %v1617_v34 = vpop.f32.mrb[137].mxu0  ;;  %v2581_v21 = vmul.f32 %v8296_v12, %v2381_v13  ;;  %3677 = vrot.lane.b32.xlu1 %v3643_v52, %s7981_s26  ;;  %v4069_v11 = vsel %vm4053_vm13, %v9496_v5, %v3664_v42 }
 0x1ee   :  { %3752 = vrot.lane.b32.xlu0 %v7193_v32, %s7982_s27  ;;  %v7674_v47 = vpop.f32.mrb[138].mxu0  ;;  %v1618_v30 = vadd.f32 %v1617_v34, %v8280_v2  ;;  %v7080_v16 = vpack.c.bf16 %v9558_v10, %v9538_v8  ;;  %v9581_v37 = vadd.f32 %v8304_v19, %v2582_v44  ;;  %v4127_v17 = vsel %vm4104_vm15, %v4069_v11, %v3739_v18 }
 0x1ef   :  { %vm1994_vm14 = vcmp.gt.f32.partialorder %v1626_v36, 0.0  ;;  %v2190_v56 = vmul.f32 0.2, %v1626_v36  ;;  %v1620_v15 = vpop.f32.mrb[139].mxu0  ;;  %v1629_v62 = vadd.f32 %v7674_v47, %v8280_v2  ;;  %v9586_v7 = vpop.permute.xlu1 %3319  ;;  %v9589_v52 = vadd.f32 %v8304_v19, %v2583_v55  ;;  %4387 = vmatmul.mubr.bf16.gmra.mrb[28].mxu1 %v4127_v17 }
 0x1f0   :  { %v1621_v5 = vadd.f32 %v1620_v15, %v8280_v2  ;;  %vm1992_vm0 = vcmp.gt.f32.partialorder %v1618_v30, 0.0  ;;  %v2188_v28 = vmul.f32 0.2, %v1618_v30  ;;  %v9591_v13 = vpop.permute.xlu0 %3387  ;;  %v9594_v8 = vadd.f32 %v8304_v19, %v2581_v21  ;;  %6890 = vmatprep.mubr.msk.bf16.mxu1 %vm3784_vm6, %v9292_v25 }
 0x1f1   :  { %v2386_v32 = vsel %vm1994_vm14, %v1626_v36, %v2190_v56  ;;  %3401 = vrot.lane.b32.xlu1 %v7101_v60, %s7977_s14  ;;  %vm1995_vm3 = vcmp.gt.f32.partialorder %v1629_v62, 0.0  ;;  %v2191_v44 = vmul.f32 0.2, %v1629_v62  ;;  %v7194_v36 = vpack.c.bf16 %v9566_v14, %v9558_v10 }
 0x1f2   :  { %3333 = vrot.lane.b32.xlu0 %v7080_v16, %s7976_s28  ;;  %vm1993_vm5 = vcmp.gt.f32.partialorder %v1621_v5, 0.0  ;;  %v2586_v18 = vmul.f32 %v8296_v12, %v2386_v32  ;;  %v2384_v55 = vsel %vm1992_vm0, %v1618_v30, %v2188_v28  ;;  %v2189_v42 = vmul.f32 0.2, %v1621_v5 }
 0x1f3   :  { %v4020_v34 = vsel %vm4002_vm4, %v9518_v24, %v9478_v39  ;;  %v2584_v21 = vmul.f32 %v8296_v12, %v2384_v55  ;;  %v2387_v11 = vsel %vm1995_vm3, %v1629_v62, %v2191_v44  ;;  %v3666_v47 = vpop.permute.xlu1 %3665  ;;  %v7081_v16 = vpack.c.bf16 %v9581_v37, %v9566_v14 }
 0x1f4   :  { %v7677_v56 = vpop.f32.mrb[140].mxu0  ;;  %v2573_v30 = vmul.f32 %v8296_v12, %v2373_v54  ;;  %v2385_v15 = vsel %vm1993_vm5, %v1621_v5, %v2189_v42  ;;  %v3741_v17 = vpop.permute.xlu0 %3740  ;;  %v4071_v32 = vsel %vm4053_vm13, %v4020_v34, %v3666_v47  ;;  %v3920_v39 = vsel %vm3900_vm12, %v9487_v26, %v9506_v1 }
 0x1f5   :  { %v1642_v10 = vadd.f32 %v7677_v56, %v8280_v2  ;;  %v1633_v28 = vpop.f32.mrb[141].mxu0  ;;  %v2587_v24 = vmul.f32 %v8296_v12, %v2387_v11  ;;  %3754 = vrot.lane.b32.xlu1 %v7194_v36, %s7982_s27  ;;  %v9620_v62 = vadd.f32 %v8304_v19, %v2586_v18  ;;  %v2585_v5 = vmul.f32 %v8296_v12, %v2385_v15 }
 0x1f6   :  { %3679 = vrot.lane.b32.xlu0 %v7101_v60, %s7981_s26  ;;  %v1634_v14 = vadd.f32 %v1633_v28, %v8280_v2  ;;  %v7678_v54 = vpop.f32.mrb[142].mxu0  ;;  %v7102_v44 = vpack.c.bf16 %v9589_v52, %v9594_v8  ;;  %v9627_v1 = vadd.f32 %v8304_v19, %v2584_v21  ;;  %v4130_v42 = vsel %vm4104_vm15, %v4071_v32, %v3741_v17 }
 0x1f7   :  { %v1645_v55 = vadd.f32 %v7678_v54, %v8280_v2  ;;  %v1636_v26 = vpop.f32.mrb[143].mxu0  ;;  %v2194_v36 = vmul.f32 0.2, %v1642_v10  ;;  %4395 = vmatmul.mubr.bf16.gmra.mrb[32].mxu1 %v4130_v42  ;;  %v9633_v47 = vpop.permute.xlu1 %3389  ;;  %v9637_v56 = vadd.f32 %v8304_v19, %v9526_v20  ;;  %v9640_v21 = vadd.f32 %v8304_v19, %v2587_v24 }
 0x1f8   :  { %vm1996_vm7 = vcmp.gt.f32.partialorder %v1634_v14, 0.0  ;;  %v2192_v60 = vmul.f32 0.2, %v1634_v14  ;;  %v1637_v18 = vadd.f32 %v1636_v26, %v8280_v2  ;;  %v9631_v11 = vpop.permute.xlu0 %3321  ;;  %vm1998_vm2 = vcmp.gt.f32.partialorder %v1642_v10, 0.0  ;;  %6891 = vmatprep.mubr.msk.bf16.mxu1 %vm3784_vm6, %v9296_v0 }
 0x1f9   :  { %vm1999_vm8 = vcmp.gt.f32.partialorder %v1645_v55, 0.0  ;;  %v2195_v34 = vmul.f32 0.2, %v1645_v55  ;;  %3335 = vrot.lane.b32.xlu1 %v7081_v16, %s7976_s28  ;;  %v7206_v15 = vpack.c.bf16 %v9262_v50, %v9076_v59  ;;  %v9647_v17 = vadd.f32 %v8304_v19, %v2585_v5 }
 0x1fa   :  { %3403 = vrot.lane.b32.xlu0 %v7102_v44, %s7977_s14  ;;  %v2388_v32 = vsel %vm1996_vm7, %v1634_v14, %v2192_v60  ;;  %vm1997_vm9 = vcmp.gt.f32.partialorder %v1637_v18, 0.0  ;;  %v2193_v28 = vmul.f32 0.2, %v1637_v18  ;;  %v2773_v20 = vadd.f32 %v8304_v19, %v2573_v30 }
 0x1fb   :  { %v3971_v24 = vsel %vm3951_vm1, %v3920_v39, %v9504_v61  ;;  %v2391_v16 = vsel %vm1999_vm8, %v1645_v55, %v2195_v34  ;;  %v7195_v59 = vpack.c.bf16 %v9627_v1, %v9581_v37  ;;  %v2390_v14 = vsel %vm1998_vm2, %v1642_v10, %v2194_v36 }
 0x1fc   :  { %v7681_v54 = vpop.f32.mrb[144].mxu0  ;;  %v4022_v5 = vsel %vm4002_vm4, %v3971_v24, %v9521_v45  ;;  %v2389_v26 = vsel %vm1997_vm9, %v1637_v18, %v2193_v28  ;;  %v3668_v60 = vpop.permute.xlu0 %3667  ;;  %v7082_v23 = vpack.c.bf16 %v9620_v62, %v9627_v1  ;;  %v2588_v30 = vmul.f32 %v8296_v12, %v2388_v32 }
 0x1fd   :  { %v1649_v42 = vpop.f32.mrb[145].mxu0  ;;  %v2589_v61 = vmul.f32 %v8296_v12, %v2389_v26  ;;  %3681 = vrot.lane.b32.xlu1 %v7102_v44, %s7981_s26  ;;  %v4073_v37 = vsel %vm4053_vm13, %v4022_v5, %v3668_v60  ;;  %v2591_v45 = vmul.f32 %v8296_v12, %v2391_v16  ;;  %v1658_v55 = vadd.f32 %v7681_v54, %v8280_v2 }
 0x1fe   :  { %3756 = vrot.lane.b32.xlu0 %v7195_v59, %s7982_s27  ;;  %v7682_v39 = vpop.f32.mrb[146].mxu0  ;;  %v1650_v36 = vadd.f32 %v1649_v42, %v8280_v2  ;;  %v7103_v34 = vpack.c.bf16 %v9640_v21, %v9647_v17  ;;  %v2590_v16 = vmul.f32 %v8296_v12, %v2390_v14  ;;  %v2912_v54 = vpack.c.bf16 %v9647_v17, %v9627_v1 }
 0x1ff   :  { %v3743_v10 = vpop.permute.xlu1 %3742  ;;  %v1652_v18 = vpop.f32.mrb[147].mxu0  ;;  %v9673_v32 = vadd.f32 %v8304_v19, %v2589_v61  ;;  %v1661_v28 = vadd.f32 %v7682_v39, %v8280_v2  ;;  %v2788_v5 = vadd.f32 %v8304_v19, %v2588_v30  ;;  %v9689_v1 = vadd.f32 %v8304_v19, %v2591_v45 }
 0x200   :  { %v4133_v44 = vsel %vm4104_vm15, %v4073_v37, %v3743_v10  ;;  %v1653_v24 = vadd.f32 %v1652_v18, %v8280_v2  ;;  %vm2000_vm11 = vcmp.gt.f32.partialorder %v1650_v36, 0.0  ;;  %v2196_v59 = vmul.f32 0.2, %v1650_v36 }
 0x201   :  { %4403 = vmatmul.mubr.bf16.gmra.mrb[36].mxu1 %v4133_v44  ;;  %3405 = vrot.lane.b32.xlu1 %v7103_v34, %s7977_s14  ;;  %vm2003_vm14 = vcmp.gt.f32.partialorder %v1661_v28, 0.0  ;;  %v2199_v26 = vmul.f32 0.2, %v1661_v28  ;;  %v3177_v61 = vunpack.c.h.b16 %v2912_v54  ;;  %v7168_v37 = vpack.c.bf16 %v9673_v32, %v2773_v20  ;;  %v9696_v20 = vpop.permute.xlu0 %3391 }
 0x202   :  { %3337 = vrot.lane.b32.xlu0 %v7082_v23, %s7976_s28  ;;  %vm2001_vm0 = vcmp.gt.f32.partialorder %v1653_v24, 0.0  ;;  %v2392_v60 = vsel %vm2000_vm11, %v1650_v36, %v2196_v59  ;;  %v2197_v42 = vmul.f32 0.2, %v1653_v24  ;;  %6892 = vmatprep.mubr.msk.bf16.mxu1 %vm3784_vm6, %v7206_v15  ;;  %v2198_v30 = vmul.f32 0.2, %v1658_v55 }
 0x203   :  { %v9685_v14 = vpop.permute.xlu1 %3323  ;;  %v2592_v23 = vmul.f32 %v8296_v12, %v2392_v60  ;;  %v2395_v39 = vsel %vm2003_vm14, %v1661_v28, %v2199_v26  ;;  %vm2002_vm3 = vcmp.gt.f32.partialorder %v1658_v55, 0.0  ;;  %v3644_v36 = vpack.c.b16 %v8327_v40, %v3177_v61 }
 0x204   :  { %v7685_v10 = vpop.f32.mrb[148].mxu0  ;;  %v2393_v34 = vsel %vm2001_vm0, %v1653_v24, %v2197_v42  ;;  %v7143_v28 = vpack.c.bf16 %v2788_v5, %v9637_v56  ;;  %v11357_v24 = vpack.c.b16 %v8327_v40, %v9458_v43  ;;  %v2790_v60 = vadd.f32 %v8304_v19, %v2590_v16 }
 0x205   :  { %v1674_v18 = vadd.f32 %v7685_v10, %v8280_v2  ;;  %v1665_v15 = vpop.f32.mrb[149].mxu0  ;;  %v2792_v44 = vadd.f32 %v8304_v19, %v2592_v23  ;;  %v2593_v59 = vmul.f32 %v8296_v12, %v2393_v34  ;;  %3624 = vrot.lane.b32.xlu1 %v7168_v37, %s7979_s17  ;;  %v2595_v42 = vmul.f32 %v8296_v12, %v2395_v39 }
 0x206   :  { %v1666_v45 = vadd.f32 %v1665_v15, %v8280_v2  ;;  %v7686_v54 = vpop.f32.mrb[150].mxu0  ;;  %v3810_v26 = vsel %vm3784_vm6, %v11357_v24, %v9549_v48  ;;  %3683 = vrot.lane.b32.xlu0 %v3644_v36, %s7981_s26  ;;  %v2394_v23 = vsel %vm2002_vm3, %v1658_v55, %v2198_v30  ;;  %v9715_v34 = vpop.permute.xlu0 %3610  ;;  %v7120_v36 = vpack.c.bf16 %v9689_v1, %v9673_v32 }
 0x207   :  { %v9709_v61 = vpop.permute.xlu1 %3669  ;;  %v1677_v37 = vadd.f32 %v7686_v54, %v8280_v2  ;;  %v2202_v56 = vmul.f32 0.2, %v1674_v18  ;;  %v1668_v10 = vpop.f32.mrb[151].mxu0  ;;  %vm2006_vm7 = vcmp.gt.f32.partialorder %v1674_v18, 0.0  ;;  %v2793_v16 = vadd.f32 %v8304_v19, %v2593_v59 }
 0x208   :  { %vm2004_vm5 = vcmp.gt.f32.partialorder %v1666_v45, 0.0  ;;  %v2200_v5 = vmul.f32 0.2, %v1666_v45  ;;  %v1669_v48 = vadd.f32 %v1668_v10, %v8280_v2  ;;  %v7144_v15 = vpack.c.bf16 %v2792_v44, %v2790_v60 }
 0x209   :  { %vm2007_vm8 = vcmp.gt.f32.partialorder %v1677_v37, 0.0  ;;  %v2203_v43 = vmul.f32 0.2, %v1677_v37  ;;  %v9720_v55 = vadd.f32 %v8304_v19, %v2595_v42  ;;  %v2398_v51 = vsel %vm2006_vm7, %v1674_v18, %v2202_v56 }
 0x20a   :  { %v2396_v39 = vsel %vm2004_vm5, %v1666_v45, %v2200_v5  ;;  %3549 = vrot.lane.b32.xlu0 %v7143_v28, %s7978_s16  ;;  %vm2005_vm2 = vcmp.gt.f32.partialorder %v1669_v48, 0.0  ;;  %v2201_v54 = vmul.f32 0.2, %v1669_v48  ;;  %3551 = vrot.lane.b32.xlu1 %v7144_v15, %s7978_s16  ;;  %v3871_v45 = vsel %vm3853_vm10, %v3810_v26, %v9546_v49 }
 0x20b   :  { %v2399_v30 = vsel %vm2007_vm8, %v1677_v37, %v2203_v43  ;;  %v3536_v24 = vpop.permute.xlu1 %3535  ;;  %v2596_v10 = vmul.f32 %v8296_v12, %v2396_v39  ;;  %v2594_v32 = vmul.f32 %v8296_v12, %v2394_v23  ;;  %v9731_v5 = vpop.permute.xlu0 %3537  ;;  %v7169_v56 = vpack.c.bf16 %v2793_v16, %v9689_v1 }
 0x20c   :  { %v7689_v59 = vpop.f32.mrb[152].mxu0  ;;  %v2397_v44 = vsel %vm2005_vm2, %v1669_v48, %v2201_v54  ;;  %v2599_v28 = vmul.f32 %v8296_v12, %v2399_v30  ;;  %v2598_v39 = vmul.f32 %v8296_v12, %v2398_v51  ;;  %v7121_v23 = vpack.c.bf16 %v9720_v55, %v2793_v16 }
 0x20d   :  { %v1690_v60 = vadd.f32 %v7689_v59, %v8280_v2  ;;  %v1681_v42 = vpop.f32.mrb[153].mxu0  ;;  %v2597_v37 = vmul.f32 %v8296_v12, %v2397_v44  ;;  %v2796_v15 = vadd.f32 %v8304_v19, %v2596_v10  ;;  %v3813_v1 = vsel %vm3784_vm6, %v9253_v46, %v9586_v7 }
 0x20e   :  { %v1682_v18 = vadd.f32 %v1681_v42, %v8280_v2  ;;  %v7690_v43 = vpop.f32.mrb[154].mxu0  ;;  %3476 = vrot.lane.b32.xlu0 %v7120_v36, %s7980_s23  ;;  %3478 = vrot.lane.b32.xlu1 %v7121_v23, %s7980_s23  ;;  %v2794_v16 = vadd.f32 %v8304_v19, %v2594_v32  ;;  %v9748_v44 = vadd.f32 %v8304_v19, %v2599_v28 }
 0x20f   :  { %v3463_v49 = vpop.permute.xlu1 %3462  ;;  %vm2010_vm9 = vcmp.gt.f32.partialorder %v1690_v60, 0.0  ;;  %v2206_v26 = vmul.f32 0.2, %v1690_v60  ;;  %v1684_v48 = vpop.f32.mrb[155].mxu0  ;;  %v1693_v54 = vadd.f32 %v7690_v43, %v8280_v2  ;;  %v2797_v51 = vadd.f32 %v8304_v19, %v2597_v37 }
 0x210   :  { %vm2008_vm11 = vcmp.gt.f32.partialorder %v1682_v18, 0.0  ;;  %v2204_v30 = vmul.f32 0.2, %v1682_v18  ;;  %v1685_v36 = vadd.f32 %v1684_v48, %v8280_v2  ;;  %v9754_v43 = vsel %vm3784_vm6, %v9292_v25, %v9631_v11  ;;  %v9765_v11 = vpop.permute.xlu0 %3464 }
 0x211   :  { %v2402_v59 = vsel %vm2010_vm9, %v1690_v60, %v2206_v26  ;;  %v3922_v46 = vsel %vm3900_vm12, %v3871_v45, %v9531_v35  ;;  %v9762_v32 = vadd.f32 %v8304_v19, %v2598_v39  ;;  %vm2011_vm0 = vcmp.gt.f32.partialorder %v1693_v54, 0.0 }
 0x212   :  { %v2602_v10 = vmul.f32 %v8296_v12, %v2402_v59  ;;  %v2400_v42 = vsel %vm2008_vm11, %v1682_v18, %v2204_v30  ;;  %3626 = vrot.lane.b32.xlu0 %v7169_v56, %s7979_s17  ;;  %vm2009_vm14 = vcmp.gt.f32.partialorder %v1685_v36, 0.0  ;;  %v2205_v7 = vmul.f32 0.2, %v1685_v36 }
 0x213   :  { %v9759_v60 = vpop.permute.xlu1 %3612  ;;  %v2207_v28 = vmul.f32 0.2, %v1693_v54  ;;  %v7145_v37 = vpack.c.bf16 %v2796_v15, %v2794_v16  ;;  %v2600_v26 = vmul.f32 %v8296_v12, %v2400_v42  ;;  %v7170_v35 = vpack.c.bf16 %v2797_v51, %v9720_v55 }
 0x214   :  { %v7693_v18 = vpop.f32.mrb[156].mxu0  ;;  %v2401_v25 = vsel %vm2009_vm14, %v1685_v36, %v2205_v7  ;;  %v9770_v23 = vadd.f32 %v8304_v19, %v2602_v10  ;;  %v7122_v15 = vpack.c.bf16 %v9748_v44, %v2797_v51  ;;  %v3973_v59 = vsel %vm3951_vm1, %v3922_v46, %v3536_v24 }
 0x215   :  { %v1706_v45 = vadd.f32 %v7693_v18, %v8280_v2  ;;  %v1697_v56 = vpop.f32.mrb[157].mxu0  ;;  %v2601_v39 = vmul.f32 %v8296_v12, %v2401_v25  ;;  %v3873_v36 = vsel %vm3853_vm10, %v3813_v1, %v9591_v13  ;;  %3628 = vrot.lane.b32.xlu1 %v7170_v35, %s7979_s17  ;;  %v2800_v51 = vadd.f32 %v8304_v19, %v2600_v26 }
 0x216   :  { %11358 = vst [vmem:[#allocation7_spill] sm:$0xff] %v9770_v23  ;;  %v1698_v48 = vadd.f32 %v1697_v56, %v8280_v2  ;;  %v7694_v30 = vpop.f32.mrb[158].mxu0  ;;  %3553 = vrot.lane.b32.xlu0 %v7145_v37, %s7978_s16  ;;  %v2403_v24 = vsel %vm2011_vm0, %v1693_v54, %v2207_v28  ;;  %v4024_v18 = vsel %vm4002_vm4, %v3973_v59, %v9715_v34 }
 0x217   :  { %vm2014_vm3 = vcmp.gt.f32.partialorder %v1706_v45, 0.0  ;;  %v2210_v55 = vmul.f32 0.2, %v1706_v45  ;;  %v1700_v16 = vpop.f32.mrb[159].mxu0  ;;  %v2801_v10 = vadd.f32 %v8304_v19, %v2601_v39  ;;  %v9782_v7 = vadd.f32 %v7694_v30, %v8280_v2  ;;  %v9786_v46 = vpop.permute.xlu1 %3539 }
 0x218   :  { %vm2012_vm5 = vcmp.gt.f32.partialorder %v1698_v48, 0.0  ;;  %v2208_v42 = vmul.f32 0.2, %v1698_v48  ;;  %v9788_v1 = vpop.permute.xlu0 %3614  ;;  %v1701_v37 = vadd.f32 %v1700_v16, %v8280_v2  ;;  %v7196_v56 = vpack.c.bf16 %v9770_v23, %v9620_v62 }
 0x219   :  { %v2406_v13 = vsel %vm2014_vm3, %v1706_v45, %v2210_v55  ;;  %v3924_v26 = vsel %vm3900_vm12, %v3873_v36, %v3463_v49  ;;  %v2603_v45 = vmul.f32 %v8296_v12, %v2403_v24  ;;  %vm2015_vm8 = vcmp.gt.f32.partialorder %v9782_v7, 0.0 }
 0x21a   :  { %v2606_v25 = vmul.f32 %v8296_v12, %v2406_v13  ;;  %v2404_v35 = vsel %vm2012_vm5, %v1698_v48, %v2208_v42  ;;  %3480 = vrot.lane.b32.xlu0 %v7122_v15, %s7980_s23  ;;  %vm2013_vm7 = vcmp.gt.f32.partialorder %v1701_v37, 0.0  ;;  %v2209_v28 = vmul.f32 0.2, %v1701_v37  ;;  %3758 = vrot.lane.b32.xlu1 %v7196_v56, %s7982_s27 }
 0x21b   :  { %v2604_v54 = vmul.f32 %v8296_v12, %v2404_v35  ;;  %v7171_v34 = vpack.c.bf16 %v2801_v10, %v9748_v44  ;;  %v7146_v59 = vpack.c.bf16 %v2800_v51, %v9762_v32  ;;  %v2211_v55 = vmul.f32 0.2, %v9782_v7  ;;  %v9814_v10 = vpop.permute.xlu1 %3466 }
 0x21c   :  { %v9801_v39 = vadd.f32 %v8304_v19, %v2606_v25  ;;  %v7697_v62 = vpop.f32.mrb[160].mxu0  ;;  %v2405_v48 = vsel %vm2013_vm7, %v1701_v37, %v2209_v28  ;;  %v3745_v30 = vpop.permute.xlu0 %3744  ;;  %v4075_v42 = vsel %vm4053_vm13, %v4024_v18, %v9709_v61  ;;  %v9820_v32 = vpack.c.bf16 %v9321_v33, %v9266_v9 }
 0x21d   :  { %v2804_v49 = vadd.f32 %v8304_v19, %v2604_v54  ;;  %v1722_v15 = vadd.f32 %v7697_v62, %v8280_v2  ;;  %v1713_v36 = vpop.f32.mrb[161].mxu0  ;;  %v2605_v16 = vmul.f32 %v8296_v12, %v2405_v48  ;;  %v4136_v37 = vsel %vm4104_vm15, %v4075_v42, %v3745_v30 }
 0x21e   :  { %v1714_v24 = vadd.f32 %v1713_v36, %v8280_v2  ;;  %v7698_v44 = vpop.f32.mrb[162].mxu0  ;;  %3630 = vrot.lane.b32.xlu0 %v7171_v34, %s7979_s17  ;;  %3555 = vrot.lane.b32.xlu1 %v7146_v59, %s7978_s16  ;;  %v3875_v28 = vsel %vm3853_vm10, %v9754_v43, %v9633_v47  ;;  %v3819_v34 = vsel %vm3784_vm6, %v9296_v0, %v9685_v14 }
 0x21f   :  { %vm2018_vm2 = vcmp.gt.f32.partialorder %v1722_v15, 0.0  ;;  %v2214_v13 = vmul.f32 0.2, %v1722_v15  ;;  %v1716_v51 = vpop.f32.mrb[163].mxu0  ;;  %v9823_v25 = vadd.f32 %v8304_v19, %v2605_v16  ;;  %4411 = vmatmul.mubr.bf16.gmra.mrb[40].mxu1 %v4136_v37  ;;  %v1725_v18 = vadd.f32 %v7698_v44, %v8280_v2 }
 0x220   :  { %vm2016_vm9 = vcmp.gt.f32.partialorder %v1714_v24, 0.0  ;;  %v2212_v61 = vmul.f32 0.2, %v1714_v24  ;;  %6893 = vmatprep.mubr.msk.bf16.mxu1 %vm3784_vm6, %v9820_v32  ;;  %v9829_v56 = vpop.permute.xlu0 %3541  ;;  %v1717_v9 = vadd.f32 %v1716_v51, %v8280_v2  ;;  %v7197_v33 = vpack.c.bf16 %v9801_v39, %v2804_v49 }
 0x221   :  { %11359 = vst [vmem:[#allocation8_spill] sm:$0xff] %v9823_v25  ;;  %v2410_v35 = vsel %vm2018_vm2, %v1722_v15, %v2214_v13  ;;  %v7083_v54 = vpack.c.bf16 %v2804_v49, %v9770_v23  ;;  %v9841_v48 = vadd.f32 %v8304_v19, %v2603_v45  ;;  %v3926_v30 = vsel %vm3900_vm12, %v3875_v28, %v9765_v11  ;;  %v9845_v15 = vpop.permute.xlu1 %3616 }
 0x222   :  { %v2408_v62 = vsel %vm2016_vm9, %v1714_v24, %v2212_v61  ;;  %vm2017_vm11 = vcmp.gt.f32.partialorder %v1717_v9, 0.0  ;;  %v2213_v59 = vmul.f32 0.2, %v1717_v9  ;;  %3760 = vrot.lane.b32.xlu0 %v7197_v33, %s7982_s27  ;;  %v3975_v47 = vsel %vm3951_vm1, %v3924_v26, %v9731_v5 }
 0x223   :  { %v2407_v0 = vsel %vm2015_vm8, %v9782_v7, %v2211_v55  ;;  %v2610_v14 = vmul.f32 %v8296_v12, %v2410_v35  ;;  %v2608_v43 = vmul.f32 %v8296_v12, %v2408_v62  ;;  %3339 = vrot.lane.b32.xlu1 %v7083_v54, %s7976_s28  ;;  %v2215_v45 = vmul.f32 0.2, %v1725_v18 }
 0x224   :  { %v7701_v11 = vpop.f32.mrb[164].mxu0  ;;  %v2409_v49 = vsel %vm2017_vm11, %v1717_v9, %v2213_v59  ;;  %v9856_v36 = vpop.permute.xlu0 %3325  ;;  %v7104_v5 = vpack.c.bf16 %v9823_v25, %v9841_v48  ;;  %v4026_v7 = vsel %vm4002_vm4, %v3975_v47, %v9759_v60  ;;  %v3877_v26 = vsel %vm3853_vm10, %v3819_v34, %v9696_v20 }
 0x225   :  { %v1738_v16 = vadd.f32 %v7701_v11, %v8280_v2  ;;  %v1729_v42 = vpop.f32.mrb[165].mxu0  ;;  %vm2019_vm14 = vcmp.gt.f32.partialorder %v1725_v18, 0.0  ;;  %v3977_v44 = vsel %vm3951_vm1, %v3926_v30, %v9786_v46  ;;  %v2607_v13 = vmul.f32 %v8296_v12, %v2407_v0 }
 0x226   :  { %v1730_v55 = vadd.f32 %v1729_v42, %v8280_v2  ;;  %v9866_v24 = vpop.f32.mrb[166].mxu0  ;;  %3407 = vrot.lane.b32.xlu0 %v7104_v5, %s7977_s14  ;;  %v2808_v60 = vadd.f32 %v8304_v19, %v2608_v43  ;;  %v2609_v20 = vmul.f32 %v8296_v12, %v2409_v49  ;;  %v9876_v9 = vadd.f32 %v8304_v19, %v2610_v14 }
 0x227   :  { %v3747_v37 = vpop.permute.xlu1 %3746  ;;  %vm2022_vm0 = vcmp.gt.f32.partialorder %v1738_v16, 0.0  ;;  %v2218_v51 = vmul.f32 0.2, %v1738_v16  ;;  %v1732_v61 = vpop.f32.mrb[167].mxu0  ;;  %3685 = vrot.lane.b32.xlu1 %v7104_v5, %s7981_s26  ;;  %v2411_v46 = vsel %vm2019_vm14, %v1725_v18, %v2215_v45  ;;  %v4028_v34 = vsel %vm4002_vm4, %v3977_v44, %v9788_v1 }
 0x228   :  { %vm2020_vm3 = vcmp.gt.f32.partialorder %v1730_v55, 0.0  ;;  %v2216_v35 = vmul.f32 0.2, %v1730_v55  ;;  %v1733_v54 = vadd.f32 %v1732_v61, %v8280_v2  ;;  %v3672_v28 = vpop.permute.xlu0 %3671  ;;  %v9886_v47 = vsel %vm3900_vm12, %v3877_v26, %v9814_v10 }
 0x229   :  { %v2414_v33 = vsel %vm2022_vm0, %v1738_v16, %v2218_v51  ;;  %v4077_v59 = vsel %vm4053_vm13, %v4026_v7, %v3672_v28  ;;  %v9892_v43 = vadd.f32 %v8304_v19, %v2607_v13  ;;  %v2611_v1 = vmul.f32 %v8296_v12, %v2411_v46 }
 0x22a   :  { %v2614_v62 = vmul.f32 %v8296_v12, %v2414_v33  ;;  %v2412_v30 = vsel %vm2020_vm3, %v1730_v55, %v2216_v35  ;;  %vm2021_vm5 = vcmp.gt.f32.partialorder %v1733_v54, 0.0  ;;  %v2217_v18 = vmul.f32 0.2, %v1733_v54 }
 0x22b   :  { %v2612_v0 = vmul.f32 %v8296_v12, %v2412_v30  ;;  %v9889_v14 = vpop.permute.xlu1 %3393  ;;  %11360 = vst [vmem:[#allocation9_spill] sm:$0xff] %v9892_v43  ;;  %v9896_v11 = vadd.f32 %v8304_v19, %v2609_v20  ;;  %v7084_v45 = vpack.c.bf16 %v2808_v60, %v9801_v39  ;;  %v7198_v10 = vpack.c.bf16 %v9876_v9, %v2808_v60 }
 0x22c   :  { %v7705_v49 = vpop.f32.mrb[168].mxu0  ;;  %v2413_v16 = vsel %vm2021_vm5, %v1733_v54, %v2217_v18  ;;  %v4139_v42 = vsel %vm4104_vm15, %v4077_v59, %v3747_v37  ;;  %v3749_v5 = vpop.permute.xlu0 %3748  ;;  %v9903_v7 = vpack.c.bf16 %v9336_v58, %v9324_v38  ;;  %v9906_v55 = vadd.f32 %v8304_v19, %v2614_v62 }
 0x22d   :  { %11361 = vst [vmem:[#allocation10_spill] sm:$0xff] %v9896_v11  ;;  %v1745_v26 = vpop.f32.mrb[169].mxu0  ;;  %v2812_v44 = vadd.f32 %v8304_v19, %v2612_v0  ;;  %3341 = vrot.lane.b32.xlu0 %v7084_v45, %s7976_s28  ;;  %4419 = vmatmul.mubr.bf16.gmra.mrb[44].mxu1 %v4139_v42  ;;  %v1754_v39 = vadd.f32 %v7705_v49, %v8280_v2 }
 0x22e   :  { %v7706_v13 = vpop.f32.mrb[170].mxu0  ;;  %v2613_v51 = vmul.f32 %v8296_v12, %v2413_v16  ;;  %3762 = vrot.lane.b32.xlu1 %v7198_v10, %s7982_s27  ;;  %6894 = vmatprep.mubr.msk.bf16.mxu1 %vm3784_vm6, %v9903_v7  ;;  %v1746_v58 = vadd.f32 %v1745_v26, %v8280_v2  ;;  %v9920_v60 = vadd.f32 %v8304_v19, %v2611_v1 }
 0x22f   :  { %v9915_v38 = vpop.permute.xlu1 %3327  ;;  %v1757_v37 = vadd.f32 %v7706_v13, %v8280_v2  ;;  %v1748_v61 = vpop.f32.mrb[171].mxu0  ;;  %vm2026_vm7 = vcmp.gt.f32.partialorder %v1754_v39, 0.0  ;;  %v2222_v20 = vmul.f32 0.2, %v1754_v39  ;;  %v7105_v35 = vpack.c.bf16 %v9896_v11, %v9892_v43 }
 0x230   :  { %11362 = vst [vmem:[#allocation11_spill] sm:$0xff] %v9920_v60  ;;  %vm2024_vm8 = vcmp.gt.f32.partialorder %v1746_v58, 0.0  ;;  %v2220_v46 = vmul.f32 0.2, %v1746_v58  ;;  %v1749_v28 = vadd.f32 %v1748_v61, %v8280_v2  ;;  %v7199_v30 = vpack.c.bf16 %v9906_v55, %v2812_v44 }
 0x231   :  { %vm2027_vm2 = vcmp.gt.f32.partialorder %v1757_v37, 0.0  ;;  %v2223_v33 = vmul.f32 0.2, %v1757_v37  ;;  %v2418_v54 = vsel %vm2026_vm7, %v1754_v39, %v2222_v20  ;;  %3687 = vrot.lane.b32.xlu0 %v7105_v35, %s7981_s26  ;;  %v7085_v59 = vpack.c.bf16 %v2812_v44, %v9876_v9 }
 0x232   :  { %v9926_v62 = vpop.permute.xlu0 %3395  ;;  %v9931_v0 = vadd.f32 %v8304_v19, %v2613_v51  ;;  %v2618_v18 = vmul.f32 %v8296_v12, %v2418_v54  ;;  %v2416_v1 = vsel %vm2024_vm8, %v1746_v58, %v2220_v46  ;;  %3409 = vrot.lane.b32.xlu1 %v7105_v35, %s7977_s14  ;;  %vm2025_vm9 = vcmp.gt.f32.partialorder %v1749_v28, 0.0 }
 0x233   :  { %v2419_v45 = vsel %vm2027_vm2, %v1757_v37, %v2223_v33  ;;  %v3674_v49 = vpop.permute.xlu1 %3673  ;;  %v2616_v16 = vmul.f32 %v8296_v12, %v2416_v1  ;;  %v2221_v42 = vmul.f32 0.2, %v1749_v28  ;;  %v7207_v44 = vpack.c.bf16 %v9481_v53, %v9349_v41 }
 0x234   :  { %11363 = vst [vmem:[#allocation12_spill] sm:$0xff] %v9931_v0  ;;  %v2619_v10 = vmul.f32 %v8296_v12, %v2419_v45  ;;  %v7709_v26 = vpop.f32.mrb[172].mxu0  ;;  %v2818_v39 = vadd.f32 %v8304_v19, %v2618_v18  ;;  %v4079_v9 = vsel %vm4053_vm13, %v4028_v34, %v3674_v49 }
 0x235   :  { %v1770_v13 = vadd.f32 %v7709_v26, %v8280_v2  ;;  %v1761_v51 = vpop.f32.mrb[173].mxu0  ;;  %v9943_v58 = vadd.f32 %v8304_v19, %v2616_v16  ;;  %v2417_v61 = vsel %vm2025_vm9, %v1749_v28, %v2221_v42  ;;  %3764 = vrot.lane.b32.xlu0 %v7199_v30, %s7982_s27  ;;  %v4142_v20 = vsel %vm4104_vm15, %v4079_v9, %v3749_v5 }
 0x236   :  { %v9946_v37 = vadd.f32 %v8304_v19, %v2619_v10  ;;  %v7710_v35 = vpop.f32.mrb[174].mxu0  ;;  %v2617_v34 = vmul.f32 %v8296_v12, %v2417_v61  ;;  %3343 = vrot.lane.b32.xlu1 %v7085_v59, %s7976_s28  ;;  %4427 = vmatmul.mubr.bf16.gmra.mrb[48].mxu1 %v4142_v20  ;;  %v9952_v53 = vpop.permute.xlu0 %3329  ;;  %v1762_v54 = vadd.f32 %v1761_v51, %v8280_v2 }
 0x237   :  { %v3751_v46 = vpop.permute.xlu1 %3750  ;;  %vm2030_vm11 = vcmp.gt.f32.partialorder %v1770_v13, 0.0  ;;  %v2226_v33 = vmul.f32 0.2, %v1770_v13  ;;  %v3979_v28 = vsel %vm3951_vm1, %v9886_v47, %v9829_v56  ;;  %6895 = vmatprep.mubr.msk.bf16.mxu1 %vm3784_vm6, %v7207_v44  ;;  %v9961_v5 = vpack.c.bf16 %v9931_v0, %v9920_v60  ;;  %v1764_v59 = vpop.f32.mrb[175].mxu0 }
 0x238   :  { %v1773_v30 = vadd.f32 %v7710_v35, %v8280_v2  ;;  %v2817_v18 = vadd.f32 %v8304_v19, %v2617_v34  ;;  %vm2028_vm14 = vcmp.gt.f32.partialorder %v1762_v54, 0.0  ;;  %v2224_v45 = vmul.f32 0.2, %v1762_v54 }
 0x239   :  { %v2422_v1 = vsel %vm2030_vm11, %v1770_v13, %v2226_v33  ;;  %v1765_v56 = vadd.f32 %v1764_v59, %v8280_v2  ;;  %v1741_v47 = vadd.f32 %v9866_v24, %v8280_v2  ;;  %v7147_v26 = vpack.c.bf16 %v2818_v39, %v9943_v58 }
 0x23a   :  { %v2622_v49 = vmul.f32 %v8296_v12, %v2422_v1  ;;  %vm2031_vm0 = vcmp.gt.f32.partialorder %v1773_v30, 0.0  ;;  %v2227_v16 = vmul.f32 0.2, %v1773_v30  ;;  %v2420_v10 = vsel %vm2028_vm14, %v1762_v54, %v2224_v45  ;;  %3689 = vrot.lane.b32.xlu1 %v9961_v5, %s7981_s26  ;;  %v3676_v42 = vpop.permute.xlu0 %3675 }
 0x23b   :  { %v7172_v9 = vpack.c.bf16 %v9946_v37, %v2817_v18  ;;  %v2620_v44 = vmul.f32 %v8296_v12, %v2420_v10  ;;  %vm2029_vm3 = vcmp.gt.f32.partialorder %v1765_v56, 0.0  ;;  %v4030_v51 = vsel %vm4002_vm4, %v3979_v28, %v9845_v15  ;;  %v9978_v34 = vpop.permute.xlu1 %3397  ;;  %3557 = vrot.lane.b32.xlu0 %v7147_v26, %s7978_s16 }
 0x23c   :  { %v2423_v13 = vsel %vm2031_vm0, %v1773_v30, %v2227_v16  ;;  %v7713_v61 = vpop.f32.mrb[176].mxu0  ;;  %v2225_v24 = vmul.f32 0.2, %v1765_v56  ;;  %v4081_v35 = vsel %vm4053_vm13, %v4030_v51, %v3676_v42  ;;  %v9983_v39 = vpack.c.bf16 %v9555_v4, %v9502_v29 }
 0x23d   :  { %v2623_v20 = vmul.f32 %v8296_v12, %v2423_v13  ;;  %v1777_v33 = vpop.f32.mrb[177].mxu0  ;;  %v9986_v54 = vadd.f32 %v8304_v19, %v2622_v49  ;;  %v9989_v15 = vadd.f32 %v8304_v19, %v2620_v44  ;;  %v4145_v28 = vsel %vm4104_vm15, %v4081_v35, %v3751_v46 }
 0x23e   :  { %11364 = vst [vmem:[#allocation13_spill] sm:$0xff] %v9983_v39  ;;  %v1786_v30 = vadd.f32 %v7713_v61, %v8280_v2  ;;  %v7714_v59 = vpop.f32.mrb[178].mxu0  ;;  %v2893_v1 = vpack.c.bf16 %v9262_v50, %v9208_v27  ;;  %v2421_v45 = vsel %vm2029_vm3, %v1765_v56, %v2225_v24  ;;  %4435 = vmatmul.mubr.bf16.gmra.mrb[52].mxu1 %v4145_v28  ;;  %v2219_v4 = vmul.f32 0.2, %v1741_v47  ;;  %v10005_v27 = vpop.permute.xlu0 %3618 }
 0x23f   :  { %3632 = vrot.lane.b32.xlu1 %v7172_v9, %s7979_s17  ;;  %v1778_v29 = vadd.f32 %v1777_v33, %v8280_v2  ;;  %v2621_v49 = vmul.f32 %v8296_v12, %v2421_v45  ;;  %6896 = vmatprep.mubr.msk.bf16.mxu1 %vm3784_vm6, %v9983_v39  ;;  %v1789_v46 = vadd.f32 %v7714_v59, %v8280_v2  ;;  %v1780_v16 = vpop.f32.mrb[179].mxu0  ;;  %vm2023_vm5 = vcmp.gt.f32.partialorder %v1741_v47, 0.0  ;;  %v10012_v13 = vpop.permute.xlu1 %3543 }
 0x240   :  { %v10003_v10 = vadd.f32 %v8304_v19, %v2623_v20  ;;  %v1781_v50 = vadd.f32 %v1780_v16, %v8280_v2  ;;  %v2230_v42 = vmul.f32 0.2, %v1786_v30  ;;  %v2928_v26 = vpack.c.bf16 %v2817_v18, %v9943_v58 }
 0x241   :  { %v2821_v56 = vadd.f32 %v8304_v19, %v2621_v49  ;;  %v7148_v9 = vpack.c.bf16 %v9986_v54, %v9989_v15  ;;  %v3139_v44 = vunpack.c.h.b16 %v2893_v1  ;;  %vm2034_vm7 = vcmp.gt.f32.partialorder %v1786_v30, 0.0 }
 0x242   :  { %v2228_v51 = vmul.f32 0.2, %v1778_v29  ;;  %v2415_v61 = vsel %vm2023_vm5, %v1741_v47, %v2219_v4  ;;  %vm2032_vm8 = vcmp.gt.f32.partialorder %v1778_v29, 0.0  ;;  %v2231_v20 = vmul.f32 0.2, %v1789_v46 }
 0x243   :  { %v3209_v24 = vunpack.c.h.b16 %v2928_v26  ;;  %vm2035_vm2 = vcmp.gt.f32.partialorder %v1789_v46, 0.0  ;;  %v2229_v33 = vmul.f32 0.2, %v1781_v50  ;;  %v7123_v28 = vpack.c.bf16 %v2821_v56, %v9946_v37 }
 0x244   :  { %v7717_v35 = vpop.f32.mrb[180].mxu0  ;;  %v7173_v58 = vpack.c.bf16 %v10003_v10, %v2821_v56  ;;  %v2426_v18 = vsel %vm2034_vm7, %v1786_v30, %v2230_v42  ;;  %vm2033_vm9 = vcmp.gt.f32.partialorder %v1781_v50, 0.0  ;;  %v2424_v45 = vsel %vm2032_vm8, %v1778_v29, %v2228_v51 }
 0x245   :  { %v1793_v59 = vpop.f32.mrb[181].mxu0  ;;  %v3436_v54 = vpack.c.b16 %v3209_v24, %v8327_v40  ;;  %v1802_v15 = vadd.f32 %v7717_v35, %v8280_v2  ;;  %3484 = vrot.lane.b32.xlu0 %v7123_v28, %s7980_s23  ;;  %v3268_v49 = vpack.c.b16 %v3139_v44, %v8327_v40  ;;  %v2615_v16 = vmul.f32 %v8296_v12, %v2415_v61 }
 0x246   :  { %v7718_v1 = vpop.f32.mrb[182].mxu0  ;;  %v2427_v37 = vsel %vm2035_vm2, %v1789_v46, %v2231_v20  ;;  %v2626_v56 = vmul.f32 %v8296_v12, %v2426_v18  ;;  %v2425_v42 = vsel %vm2033_vm9, %v1781_v50, %v2229_v33  ;;  %v2624_v51 = vmul.f32 %v8296_v12, %v2424_v45 }
 0x247   :  { %v3469_v47 = vpop.permute.xlu0 %3468  ;;  %v3471_v4 = vpop.permute.xlu1 %3470  ;;  %3482 = vrot.lane.b32.xlu1 %v3436_v54, %s7980_s23  ;;  %v1805_v26 = vadd.f32 %v7718_v1, %v8280_v2  ;;  %v3822_v29 = vsel %vm3784_vm6, %v3268_v49, %v9856_v36  ;;  %v2234_v24 = vmul.f32 0.2, %v1802_v15  ;;  %v3825_v46 = vsel %vm3784_vm6, %v9820_v32, %v9915_v38 }
 0x248   :  { %v1796_v30 = vpop.f32.mrb[183].mxu0  ;;  %v3879_v44 = vsel %vm3853_vm10, %v3822_v29, %v9889_v14  ;;  %v2627_v61 = vmul.f32 %v8296_v12, %v2427_v37  ;;  %vm2038_vm11 = vcmp.gt.f32.partialorder %v1802_v15, 0.0  ;;  %v10038_v36 = vadd.f32 %v8304_v19, %v2615_v16 }
 0x249   :  { %3634 = vrot.lane.b32.xlu0 %v7173_v58, %s7979_s17  ;;  %v3881_v35 = vsel %vm3853_vm10, %v3825_v46, %v9926_v62  ;;  %v3828_v14 = vsel %vm3784_vm6, %v9903_v7, %v9952_v53  ;;  %v2625_v32 = vmul.f32 %v8296_v12, %v2425_v42  ;;  %v10052_v28 = vadd.f32 %v8304_v19, %v2626_v56  ;;  %v3254_v7 = vld [vmem:[%s11325_s4] sm:$0x7] }
 0x24a   :  { %v10049_v33 = vsel %vm3853_vm10, %v3828_v14, %v9978_v34  ;;  %v1794_v58 = vadd.f32 %v1793_v59, %v8280_v2  ;;  %v2235_v18 = vmul.f32 0.2, %v1805_v26  ;;  %v10059_v53 = vadd.f32 %v8304_v19, %v2624_v51 }
 0x24b   :  { %v3546_v20 = vpop.permute.xlu0 %3545  ;;  %v10035_v50 = vpop.permute.xlu1 %3620  ;;  %3559 = vrot.lane.b32.xlu1 %v7148_v9, %s7978_s16  ;;  %v2430_v9 = vsel %vm2038_vm11, %v1802_v15, %v2234_v24  ;;  %vm2039_vm14 = vcmp.gt.f32.partialorder %v1805_v26, 0.0  ;;  %v10064_v1 = vadd.f32 %v8304_v19, %v2627_v61  ;;  %v3930_v59 = vsel %vm3900_vm12, %v3879_v44, %v3469_v47 }
 0x24c   :  { %v7721_v38 = vpop.f32.mrb[184].mxu0  ;;  %v3932_v45 = vsel %vm3900_vm12, %v3881_v35, %v3471_v4  ;;  %v10070_v37 = vadd.f32 %v8304_v19, %v2625_v32  ;;  %v10076_v29 = vrot.slane %v3254_v7, %v8270_v63  ;;  %v2630_v51 = vmul.f32 %v8296_v12, %v2430_v9 }
 0x24d   :  { %v1809_v62 = vpop.f32.mrb[185].mxu0  ;;  %v1818_v56 = vadd.f32 %v7721_v38, %v8280_v2  ;;  %v2232_v47 = vmul.f32 0.2, %v1794_v58  ;;  %v2431_v4 = vsel %vm2039_vm14, %v1805_v26, %v2235_v18  ;;  %vm2036_vm3 = vcmp.gt.f32.partialorder %v1794_v58, 0.0 }
 0x24e   :  { %v1810_v34 = vadd.f32 %v1809_v62, %v8280_v2  ;;  %v7722_v54 = vpop.f32.mrb[186].mxu0  ;;  %v1797_v44 = vadd.f32 %v1796_v30, %v8280_v2  ;;  %v10084_v14 = vsel %vm3951_vm1, %v3930_v59, %v10012_v13  ;;  %v10089_v62 = vrot.slane %v3254_v7, %v8282_v3 }
 0x24f   :  { %v3473_v49 = vpop.permute.xlu0 %3472  ;;  %v1821_v16 = vadd.f32 %v7722_v54, %v8280_v2  ;;  %v10073_v15 = vpop.permute.xlu1 %3547  ;;  %v2631_v18 = vmul.f32 %v8296_v12, %v2431_v4  ;;  %v2238_v9 = vmul.f32 0.2, %v1818_v56  ;;  %v10093_v54 = vrot.slane %v3254_v7, %v8288_v6 }
 0x250   :  { %vm2040_vm0 = vcmp.gt.f32.partialorder %v1810_v34, 0.0  ;;  %v1812_v42 = vpop.f32.mrb[187].mxu0  ;;  %v2236_v24 = vmul.f32 0.2, %v1810_v34  ;;  %v2830_v13 = vadd.f32 %v8304_v19, %v2630_v51  ;;  %vm2042_vm7 = vcmp.gt.f32.partialorder %v1818_v56, 0.0 }
 0x251   :  { %v2239_v46 = vmul.f32 0.2, %v1821_v16  ;;  %v1813_v61 = vadd.f32 %v1812_v42, %v8280_v2  ;;  %vm2043_vm5 = vcmp.gt.f32.partialorder %v1821_v16, 0.0  ;;  %v2233_v3 = vmul.f32 0.2, %v1797_v44 }
 0x252   :  { %v4332_v35 = vpop.f32.mrb[0].mxu1  ;;  %v2432_v32 = vsel %vm2040_vm0, %v1810_v34, %v2236_v24  ;;  %v10097_v34 = vsel %vm2036_vm3, %v1794_v58, %v2232_v47  ;;  %vm2037_vm2 = vcmp.gt.f32.partialorder %v1797_v44, 0.0 }
 0x253   :  { %v10086_v38 = vpop.permute.xlu0 %3622  ;;  %v4334_v26 = vpop.f32.mrb[1].mxu1  ;;  %v2237_v30 = vmul.f32 0.2, %v1813_v61  ;;  %vm2041_vm8 = vcmp.gt.f32.partialorder %v1813_v61, 0.0  ;;  %v2632_v4 = vmul.f32 %v8296_v12, %v2432_v32  ;;  %v2435_v23 = vsel %vm2043_vm5, %v1821_v16, %v2239_v46 }
 0x254   :  { %v4335_v42 = vpop.f32.mrb[2].mxu1  ;;  %v7725_v63 = vpop.f32.mrb[188].mxu0  ;;  %v3983_v26 = vsel %vm3951_vm1, %v3932_v45, %v3546_v20  ;;  %v4333_v51 = vadd.f32 %v4332_v35, %v10076_v29  ;;  %v2434_v45 = vsel %vm2042_vm7, %v1818_v56, %v2238_v9  ;;  %v2635_v46 = vmul.f32 %v8296_v12, %v2435_v23 }
 0x255   :  { %v4337_v59 = vpop.f32.mrb[3].mxu1  ;;  %v1825_v24 = vpop.f32.mrb[189].mxu0  ;;  %v1834_v58 = vadd.f32 %v7725_v63, %v8280_v2  ;;  %v10112_v20 = vsel %vm4002_vm4, %v3983_v26, %v10035_v50  ;;  %v2433_v16 = vsel %vm2041_vm8, %v1813_v61, %v2237_v30  ;;  %v4336_v35 = vadd.f32 %v4335_v42, %v10076_v29 }
 0x256   :  { %v10102_v7 = vpop.permute.xlu1 %3474  ;;  %v7726_v6 = vpop.f32.mrb[190].mxu0  ;;  %v1826_v47 = vadd.f32 %v1825_v24, %v8280_v2  ;;  %v10108_v59 = vadd.f32 %v8304_v19, %v2631_v18  ;;  %v10119_v32 = vsel %vm2037_vm2, %v1797_v44, %v2233_v3  ;;  %v2832_v18 = vadd.f32 %v8304_v19, %v2632_v4 }
 0x257   :  { %11365 = vst [vmem:[#allocation14_spill] sm:$0xff] %v10102_v7  ;;  %v1828_v0 = vpop.f32.mrb[191].mxu0  ;;  %v1837_v63 = vadd.f32 %v7726_v6, %v8280_v2  ;;  %v3934_v24 = vsel %vm3900_vm12, %v10049_v33, %v3473_v49  ;;  %v2634_v56 = vmul.f32 %v8296_v12, %v2434_v45  ;;  %v2633_v61 = vmul.f32 %v8296_v12, %v2433_v16  ;;  %v10128_v9 = vpop.permute.xlu0 %3399 }
 0x258   :  { %vm2044_vm9 = vcmp.gt.f32.partialorder %v1826_v47, 0.0  ;;  %v2240_v50 = vmul.f32 0.2, %v1826_v47  ;;  %vm4530_vm11 = vcmp.gt.f32.partialorder %v4333_v51, 0.0  ;;  %v2242_v23 = vmul.f32 0.2, %v1834_v58 }
 0x259   :  { %11366 = vst [vmem:[#allocation15_spill] sm:$0xff] %v10128_v9  ;;  %v4579_v30 = vmul.f32 0.2, %v4333_v51  ;;  %vm2046_vm14 = vcmp.gt.f32.partialorder %v1834_v58, 0.0  ;;  %v2935_v6 = vpack.c.bf16 %v10108_v59, %v2830_v13  ;;  %v10134_v33 = vadd.f32 %v8304_v19, %v2635_v46 }
 0x25a   :  { %v10124_v26 = vpop.permute.xlu1 %3331  ;;  %v2436_v3 = vsel %vm2044_vm9, %v1826_v47, %v2240_v50  ;;  %vm4531_vm0 = vcmp.gt.f32.partialorder %v4336_v35, 0.0  ;;  %v2243_v49 = vmul.f32 0.2, %v1837_v63  ;;  %v1829_v4 = vadd.f32 %v1828_v0, %v8280_v2 }
 0x25b   :  { %v4340_v44 = vpop.f32.mrb[4].mxu1  ;;  %v4580_v60 = vmul.f32 0.2, %v4336_v35  ;;  %vm2047_vm3 = vcmp.gt.f32.partialorder %v1837_v63, 0.0  ;;  %v3223_v11 = vunpack.c.h.b16 %v2935_v6  ;;  %v7200_v39 = vpack.c.bf16 %v2832_v18, %v2830_v13 }
 0x25c   :  { %v10131_v42 = vpop.f32.mrb[192].mxu0  ;;  %v4342_v45 = vpop.f32.mrb[5].mxu1  ;;  %v10140_v50 = vadd.f32 %v8304_v19, %v2633_v61  ;;  %v2438_v25 = vsel %vm2046_vm14, %v1834_v58, %v2242_v23  ;;  %v2636_v46 = vmul.f32 %v8296_v12, %v2436_v3  ;;  %v2241_v31 = vmul.f32 0.2, %v1829_v4 }
 0x25d   :  { %v1841_v16 = vpop.f32.mrb[193].mxu0  ;;  %v4343_v43 = vpop.f32.mrb[6].mxu1  ;;  %v3645_v0 = vpack.c.b16 %v3223_v11, %v8327_v40  ;;  %vm2045_vm5 = vcmp.gt.f32.partialorder %v1829_v4, 0.0  ;;  %3766 = vrot.lane.b32.xlu1 %v7200_v39, %s7982_s27  ;;  %v4032_v13 = vsel %vm4002_vm4, %v10084_v14, %v10005_v27  ;;  %v10152_v58 = vsel %vm3951_vm1, %v3934_v24, %v10073_v15 }
 0x25e   :  { %v10137_v47 = vpop.f32.mrb[194].mxu0  ;;  %v4345_v7 = vpop.f32.mrb[7].mxu1  ;;  %v4344_v61 = vadd.f32 %v4343_v43, %v10076_v29  ;;  %v2439_v23 = vsel %vm2047_vm3, %v1837_v63, %v2243_v49  ;;  %v2834_v39 = vadd.f32 %v8304_v19, %v2634_v56  ;;  %v4629_v3 = vsel %vm4531_vm0, %v4336_v35, %v4580_v60 }
 0x25f   :  { %v1844_v9 = vpop.f32.mrb[195].mxu0  ;;  %v3678_v18 = vpop.permute.xlu1 %3677  ;;  %v4628_v7 = vsel %vm4530_vm11, %v4333_v51, %v4579_v30  ;;  %v2638_v27 = vmul.f32 %v8296_v12, %v2438_v25  ;;  %3691 = vrot.lane.b32.xlu0 %v3645_v0, %s7981_s26  ;;  %v4341_v43 = vadd.f32 %v4340_v44, %v10076_v29  ;;  %v2836_v14 = vadd.f32 %v8304_v19, %v2636_v46 }
 0x260   :  { %v3753_v6 = vpop.permute.xlu0 %3752  ;;  %v4083_v11 = vsel %vm4053_vm13, %v4032_v13, %v3678_v18  ;;  %v2437_v15 = vsel %vm2045_vm5, %v1829_v4, %v2241_v31  ;;  %v1842_v51 = vadd.f32 %v1841_v16, %v8280_v2  ;;  %v7176_v63 = vpack.c.bf16 %v10134_v33, %v10140_v50 }
 0x261   :  { %v10168_v24 = vmul.f32 %v10089_v62, %v4628_v7  ;;  %v2639_v60 = vmul.f32 %v8296_v12, %v2439_v23  ;;  %v4582_v35 = vmul.f32 0.2, %v4344_v61  ;;  %v4148_v25 = vsel %vm4104_vm15, %v4083_v11, %v3753_v6 }
 0x262   :  { %v10177_v44 = vmul.f32 %v10089_v62, %v4629_v3  ;;  %vm4533_vm7 = vcmp.gt.f32.partialorder %v4344_v61, 0.0  ;;  %vm2048_vm8 = vcmp.gt.f32.partialorder %v1842_v51, 0.0  ;;  %v2244_v31 = vmul.f32 0.2, %v1842_v51  ;;  %3693 = vrot.lane.b32.xlu1 %v7176_v63, %s7981_s26  ;;  %4443 = vmatmul.mubr.bf16.gmra.mrb[56].mxu1 %v4148_v25 }
 0x263   :  { %v10172_v56 = vpop.permute.xlu1 %3401  ;;  %v4348_v49 = vpop.f32.mrb[8].mxu1  ;;  %v10181_v4 = vadd.f32 %v8304_v19, %v2638_v27  ;;  %v2637_v45 = vmul.f32 %v8296_v12, %v2437_v15  ;;  %3411 = vrot.lane.b32.xlu0 %v9961_v5, %s7977_s14  ;;  %v4581_v16 = vmul.f32 0.2, %v4341_v43  ;;  %v10188_v46 = vpack.c.bf16 %v9594_v8, %v9552_v57 }
 0x264   :  { %v10174_v30 = vpop.permute.xlu0 %3333  ;;  %v4350_v0 = vpop.f32.mrb[9].mxu1  ;;  %vm4532_vm2 = vcmp.gt.f32.partialorder %v4341_v43, 0.0  ;;  %v2440_v13 = vsel %vm2048_vm8, %v1842_v51, %v2244_v31  ;;  %v1845_v18 = vadd.f32 %v1844_v9, %v8280_v2  ;;  %v7201_v6 = vpack.c.bf16 %v2836_v14, %v2834_v39 }
 0x265   :  { %v4351_v7 = vpop.f32.mrb[10].mxu1  ;;  %v10192_v23 = vadd.f32 %v8304_v19, %v2639_v60  ;;  %v1850_v11 = vadd.f32 %v10131_v42, %v8280_v2  ;;  %v4631_v5 = vsel %vm4533_vm7, %v4344_v61, %v4582_v35  ;;  %v2640_v3 = vmul.f32 %v8296_v12, %v2440_v13  ;;  %6897 = vmatprep.mubr.msk.bf16.mxu1 %vm3784_vm6, %v10188_v46 }
 0x266   :  { %vm2049_vm9 = vcmp.gt.f32.partialorder %v1845_v18, 0.0  ;;  %v2245_v27 = vmul.f32 0.2, %v1845_v18  ;;  %v7124_v9 = vpack.c.bf16 %v10070_v37, %v10003_v10  ;;  %v4349_v39 = vadd.f32 %v4348_v49, %v10076_v29  ;;  %v4353_v14 = vpop.f32.mrb[11].mxu1 }
 0x267   :  { %v3755_v8 = vpop.permute.xlu1 %3754  ;;  %v10204_v15 = vadd.f32 %v8304_v19, %v2637_v45  ;;  %v4630_v42 = vsel %vm4532_vm2, %v4341_v43, %v4581_v16  ;;  %3768 = vrot.lane.b32.xlu0 %v7201_v6, %s7982_s27  ;;  %v4352_v51 = vadd.f32 %v4351_v7, %v10076_v29  ;;  %v4684_v63 = vmul.f32 %v10089_v62, %v4631_v5 }
 0x268   :  { %v3680_v57 = vpop.permute.xlu0 %3679  ;;  %v2840_v60 = vadd.f32 %v8304_v19, %v2640_v3  ;;  %3486 = vrot.lane.b32.xlu1 %v7124_v9, %s7980_s23  ;;  %vm4534_vm11 = vcmp.gt.f32.partialorder %v4349_v39, 0.0  ;;  %v4583_v10 = vmul.f32 0.2, %v4349_v39  ;;  %v2441_v35 = vsel %vm2049_vm9, %v1845_v18, %v2245_v27 }
 0x269   :  { %v4085_v61 = vsel %vm4053_vm13, %v10112_v20, %v3680_v57  ;;  %vm4535_vm14 = vcmp.gt.f32.partialorder %v4352_v51, 0.0  ;;  %v4584_v25 = vmul.f32 0.2, %v4352_v51  ;;  %v7149_v43 = vpack.c.bf16 %v10052_v28, %v10059_v53 }
 0x26a   :  { %v4632_v20 = vsel %vm4534_vm11, %v4349_v39, %v4583_v10  ;;  %v7174_v45 = vpack.c.bf16 %v10064_v1, %v10070_v37  ;;  %v4151_v16 = vsel %vm4104_vm15, %v4085_v61, %v3755_v8  ;;  %v10225_v0 = vpack.c.bf16 %v9647_v17, %v9589_v52 }
 0x26b   :  { %v10218_v49 = vpop.permute.xlu1 %3335  ;;  %v4683_v13 = vmul.f32 %v10089_v62, %v4630_v42  ;;  %v4685_v18 = vmul.f32 %v10089_v62, %v4632_v20  ;;  %v4633_v6 = vsel %vm4535_vm14, %v4352_v51, %v4584_v25  ;;  %3561 = vrot.lane.b32.xlu0 %v7149_v43, %s7978_s16  ;;  %4451 = vmatmul.mubr.bf16.gmra.mrb[60].mxu1 %v4151_v16  ;;  %v2246_v28 = vmul.f32 0.2, %v1850_v11 }
 0x26c   :  { %v10216_v31 = vpop.permute.xlu0 %3403  ;;  %v10231_v53 = vadd.f32 %v10093_v54, %v4684_v63  ;;  %v4686_v37 = vmul.f32 %v10089_v62, %v4633_v6  ;;  %3636 = vrot.lane.b32.xlu1 %v7174_v45, %s7979_s17  ;;  %6898 = vmatprep.mubr.msk.bf16.mxu1 %vm3784_vm6, %v10225_v0  ;;  %v7177_v52 = vpack.c.bf16 %v10192_v23, %v10204_v15  ;;  %vm2050_vm0 = vcmp.gt.f32.partialorder %v1850_v11, 0.0 }
 0x26d   :  { %v4036_v17 = vsel %vm4002_vm4, %v10152_v58, %v10086_v38  ;;  %v2641_v7 = vmul.f32 %v8296_v12, %v2441_v35  ;;  %v7202_v5 = vpack.c.bf16 %v2840_v60, %v10181_v4  ;;  %v2628_v8 = vmul.f32 %v8296_v12, %v10097_v34 }
 0x26e   :  { %v10248_v27 = vadd.f32 %v10093_v54, %v10177_v44  ;;  %v10251_v9 = vadd.f32 %v10093_v54, %v4686_v37  ;;  %v2629_v38 = vmul.f32 %v8296_v12, %v10119_v32  ;;  %v10258_v58 = vadd.f32 %v10093_v54, %v10168_v24 }
 0x26f   :  { %v3682_v57 = vpop.permute.xlu1 %3681  ;;  %v10261_v4 = vadd.f32 %v10093_v54, %v4685_v18  ;;  %3695 = vrot.lane.b32.xlu0 %v7177_v52, %s7981_s26  ;;  %v10265_v34 = vadd.f32 %v10093_v54, %v4683_v13  ;;  %v2442_v44 = vsel %vm2050_vm0, %v1850_v11, %v2246_v28  ;;  %v10272_v42 = vadd.f32 %v8304_v19, %v2641_v7 }
 0x270   :  { %v3757_v3 = vpop.permute.xlu0 %3756  ;;  %v4087_v39 = vsel %vm4053_vm13, %v4036_v17, %v3682_v57  ;;  %3770 = vrot.lane.b32.xlu1 %v7202_v5, %s7982_s27  ;;  %v7238_v32 = vpack.c.bf16 %v10231_v53, %v10248_v27  ;;  %v7086_v24 = vpack.c.bf16 %v9906_v55, %v9906_v55  ;;  %v7107_v61 = vpack.c.bf16 %v10038_v36, %v10038_v36 }
 0x271   :  { %v4154_v14 = vsel %vm4104_vm15, %v4087_v39, %v3757_v3  ;;  %v4785_v11 = vpack.c.bf16 %v10251_v9, %v10261_v4  ;;  %v7208_v63 = vpack.c.bf16 %v9841_v48, %v9640_v21  ;;  %v2828_v60 = vadd.f32 %v8304_v19, %v2628_v8  ;;  %v7880_v3 = vld [vmem:[%s11326_s5 + $0x40] sm:$0xff]  }
 0x272   :  { %v4783_v10 = vpack.c.bf16 %v10248_v27, %v10258_v58  ;;  %v7226_v35 = vpack.c.bf16 %v10251_v9, %v10231_v53  ;;  %v2898_v55 = vpack.c.bf16 %v9349_v41, %v9339_v22  ;;  %v2642_v25 = vmul.f32 %v8296_v12, %v2442_v44  ;;  %v7881_v39 = vld [vmem:[%s11326_s5] sm:$0xff]   ;;  %7353 = vmatprep.subr.bf16.mxu1 %v7880_v3 }
 0x273   :  { %3345 = vrot.lane.b32.xlu0 %v7086_v24, %s7976_s28  ;;  %4459 = vmatmul.mubr.bf16.gmra.mrb[64].mxu1 %v4154_v14  ;;  %v10295_v21 = vpop.permute.xlu1 %3405  ;;  %v7210_v43 = vpack.c.bf16 %v10140_v50, %v10108_v59  ;;  %v7125_v20 = vpack.c.bf16 %v10064_v1, %v10064_v1  ;;  %v2829_v45 = vadd.f32 %v8304_v19, %v2629_v38  ;;  %v4838_v8 = vunpack.c.h.b16 %v4785_v11 }
 0x274   :  { %v10278_v51 = vpop.permute.xlu0 %3337  ;;  %3413 = vrot.lane.b32.xlu1 %v7107_v61, %s7977_s14  ;;  %6899 = vmatprep.mubr.msk.bf16.mxu1 %vm3784_vm6, %v7208_v63  ;;  %v7211_v16 = vpack.c.bf16 %v10204_v15, %v10134_v33  ;;  %v7212_v22 = vpack.c.bf16 %v10272_v42, %v10192_v23  ;;  %v7150_v41 = vpack.c.bf16 %v2828_v60, %v2828_v60  ;;  %v3149_v6 = vunpack.c.h.b16 %v2898_v55  ;;  %v7882_v61 = vld [vmem:[%s11326_s5 + $0x48] sm:$0xff]  }
 0x275   :  { %v7230_v18 = vpack.c.bf16 %v10265_v34, %v10258_v58  ;;  %v7175_v28 = vpack.c.bf16 %v2829_v45, %v2829_v45  ;;  %v2842_v37 = vadd.f32 %v8304_v19, %v2642_v25  ;;  %v7178_v52 = vpack.c.bf16 %v10272_v42, %v10272_v42  ;;  %7354 = vmatpush3.bf16.msra.mxu1 %v7881_v39  ;;  %v7883_v63 = vld [vmem:[%s11326_s5 + $0x8] sm:$0xff]  }
 0x276   :  { %v3271_v7 = vpack.c.b16 %v8327_v40, %v3149_v6  ;;  %7355 = vmatprep.subr.bf16.mxu1 %v7882_v61  ;;  %v11367_v55 = vld [vmem:[#allocation15_spill] sm:$0xff] }
 0x277   :  { %3488 = vrot.lane.b32.xlu0 %v7125_v20, %s7980_s23  ;;  %v3625_v1 = vpop.permute.xlu1 %3624  ;;  %v7203_v57 = vpack.c.bf16 %v2842_v37, %v2842_v37  ;;  %v4996_v20 = vpack.c.b16 %v8327_v40, %v4838_v8 }
 0x278   :  { %v10306_v13 = vpop.permute.xlu0 %3683  ;;  %3563 = vrot.lane.b32.xlu1 %v7150_v41, %s7978_s16  ;;  %v3831_v38 = vsel %vm3784_vm6, %v3271_v7, %v10124_v26  ;;  %v11369_v7 = vld [vmem:[#allocation2_spill] sm:$0xff] }
 0x279   :  { %v3885_v25 = vsel %vm3853_vm10, %v3831_v38, %v11367_v55  ;;  %7356 = vmatpush3.bf16.msra.mxu1 %v7883_v63  ;;  %v7884_v38 = vld [vmem:[%s11326_s5 + $0x50] sm:$0xff]   ;;  %v7887_v63 = vld [vmem:[%s11326_s5 + $0x18] sm:$0xff]  }
 0x27a   :  { %7357 = vmatprep.subr.bf16.mxu1 %v7884_v38 }
 0x27b   :  { %3638 = vrot.lane.b32.xlu0 %v7175_v28, %s7979_s17  ;;  %v4834_v28 = vunpack.c.h.b16 %v4783_v10 }
 0x27c   :  { %v3550_v17 = vpop.permute.xlu0 %3549  ;;  %3697 = vrot.lane.b32.xlu1 %v7178_v52, %s7981_s26  ;;  %v10318_v5 = vpop.permute.xlu1 %3551 }
 0x27d   :  { %v4963_v10 = vpack.c.b16 %v4834_v28, %v8327_v40 }
 0x27f   :  { %3772 = vrot.lane.b32.xlu0 %v7203_v57, %s7982_s27 }
 0x280   :  { %v4356_v27 = vpop.f32.mrb[12].mxu1  ;;  %v10328_v44 = vpop.permute.xlu0 %3476  ;;  %5003 = vrot.lane.b32.xlu1 %v7238_v32, %s7977_s14  ;;  %v11368_v32 = vld [vmem:[#allocation14_spill] sm:$0xff] }
 0x281   :  { %v4357_v14 = vadd.f32 %v4356_v27, %v10076_v29  ;;  %v4358_v24 = vpop.f32.mrb[13].mxu1  ;;  %v10344_v6 = vpop.permute.xlu1 %3478  ;;  %v3936_v52 = vsel %vm3900_vm12, %v3885_v25, %v11368_v32 }
 0x282   :  { %v4359_v11 = vpop.f32.mrb[14].mxu1  ;;  %v3987_v57 = vsel %vm3951_vm1, %v3936_v52, %v3550_v17  ;;  %v11372_v52 = vld [vmem:[#allocation13_spill] sm:$0xff] }
 0x283   :  { %vm4536_vm3 = vcmp.gt.f32.partialorder %v4357_v14, 0.0  ;;  %v4585_v26 = vmul.f32 0.2, %v4357_v14  ;;  %v4361_v60 = vpop.f32.mrb[15].mxu1  ;;  %5005 = vrot.lane.b32.xlu0 %v4996_v20, %s7977_s14  ;;  %v4360_v3 = vadd.f32 %v4359_v11, %v10076_v29  ;;  %v4038_v24 = vsel %vm4002_vm4, %v3987_v57, %v3625_v1  ;;  %v7886_v11 = vld [vmem:[%s11326_s5 + $0x58] sm:$0xff]   ;;  %v11370_v20 = vld [vmem:[#allocation8_spill] sm:$0xff] }
 0x284   :  { %v10342_v45 = vpop.permute.xlu0 %3626  ;;  %4949 = vrot.lane.b32.xlu1 %v11369_v7, %s7978_s16  ;;  %v4089_v1 = vsel %vm4053_vm13, %v4038_v24, %v10306_v13  ;;  %v3834_v13 = vsel %vm3784_vm6, %v11372_v52, %v10174_v30  ;;  %v7888_v24 = vld [vmem:[%s11326_s5 + $0x60] sm:$0xff]  }
 0x285   :  { %v4634_v41 = vsel %vm4536_vm3, %v4357_v14, %v4585_v26  ;;  %v7885_v14 = vld [vmem:[%s11326_s5 + $0x10] sm:$0xff]   ;;  %v4586_v61 = vmul.f32 0.2, %v4360_v3  ;;  %vm4537_vm5 = vcmp.gt.f32.partialorder %v4360_v3, 0.0  ;;  %v7889_v30 = vld [vmem:[%s11326_s5 + $0x20] sm:$0xff]  }
 0x286   :  { %v4687_v37 = vmul.f32 %v10089_v62, %v4634_v41  ;;  %7358 = vmatpush3.bf16.msra.mxu1 %v7885_v14  ;;  %v11371_v41 = vld [vmem:[#allocation9_spill] sm:$0xff] }
 0x287   :  { %v10360_v39 = vpop.permute.xlu1 %3628  ;;  %7359 = vmatprep.subr.bf16.mxu1 %v7886_v11  ;;  %v10389_v28 = vpack.c.bf16 %v11371_v41, %v11370_v20  ;;  %v4635_v9 = vsel %vm4537_vm5, %v4360_v3, %v4586_v61  ;;  %v7890_v3 = vld [vmem:[%s11326_s5 + $0x68] sm:$0xff]   ;;  %v3887_v61 = vsel %vm3853_vm10, %v3834_v13, %v10172_v56  ;;  %v7892_v56 = vld [vmem:[%s11326_s5 + $0x70] sm:$0xff]  }
 0x288   :  { %v10355_v8 = vadd.f32 %v10093_v54, %v4687_v37  ;;  %v10358_v27 = vpop.permute.xlu0 %3553  ;;  %4971 = vrot.lane.b32.xlu1 %v4963_v10, %s7981_s26  ;;  %v3938_v20 = vsel %vm3900_vm12, %v3887_v61, %v10328_v44  ;;  %v11373_v61 = vld [vmem:[#allocation10_spill] sm:$0xff] }
 0x289   :  { %v3989_v52 = vsel %vm3951_vm1, %v3938_v20, %v10318_v5 }
 0x28a   :  { %v7231_v17 = vpack.c.bf16 %v10355_v8, %v10261_v4  ;;  %7360 = vmatpush3.bf16.msra.mxu1 %v7887_v63  ;;  %v4688_v63 = vmul.f32 %v10089_v62, %v4635_v9 }
 0x28b   :  { %7361 = vmatprep.subr.bf16.mxu1 %v7888_v24 }
 0x28c   :  { %v10378_v26 = vpop.permute.xlu0 %3480  ;;  %v3759_v60 = vpop.permute.xlu1 %3758  ;;  %4973 = vrot.lane.b32.xlu1 %v7226_v35, %s7981_s26  ;;  %v4741_v13 = vadd.f32 %v10093_v54, %v4688_v63  ;;  %v11374_v63 = vld [vmem:[#allocation11_spill] sm:$0xff] }
 0x28d   :  { %v4157_v55 = vsel %vm4104_vm15, %v4089_v1, %v3759_v60 }
 0x28e   :  { %4467 = vmatmul.mubr.bf16.gmra.mrb[68].mxu1 %v4157_v55 }
 0x28f   :  { %v4364_v25 = vpop.f32.mrb[16].mxu1  ;;  %6900 = vmatprep.mubr.msk.bf16.mxu1 %vm3784_vm6, %v10389_v28  ;;  %7362 = vmatpush3.bf16.msra.mxu1 %v7889_v30 }
 0x290   :  { %v4365_v37 = vadd.f32 %v4364_v25, %v10076_v29  ;;  %v4366_v32 = vpop.f32.mrb[17].mxu1  ;;  %v10395_v57 = vpop.permute.xlu0 %3630  ;;  %v7891_v25 = vld [vmem:[%s11326_s5 + $0x28] sm:$0xff]   ;;  %7363 = vmatprep.subr.bf16.mxu1 %v7890_v3 }
 0x291   :  { %v4367_v53 = vpop.f32.mrb[18].mxu1  ;;  %v10399_v10 = vpop.permute.xlu1 %3555 }
 0x292   :  { %vm4538_vm7 = vcmp.gt.f32.partialorder %v4365_v37, 0.0  ;;  %v4587_v35 = vmul.f32 0.2, %v4365_v37  ;;  %v4368_v38 = vadd.f32 %v4367_v53, %v10076_v29  ;;  %v4369_v14 = vpop.f32.mrb[19].mxu1 }
 0x293   :  { %7364 = vmatpush3.bf16.msra.mxu1 %v7891_v25  ;;  %v4040_v14 = vsel %vm4002_vm4, %v3989_v52, %v10342_v45 }
 0x294   :  { %v4636_v11 = vsel %vm4538_vm7, %v4365_v37, %v4587_v35  ;;  %vm4539_vm8 = vcmp.gt.f32.partialorder %v4368_v38, 0.0  ;;  %v4588_v60 = vmul.f32 0.2, %v4368_v38  ;;  %v3761_v55 = vpop.permute.xlu0 %3760  ;;  %7365 = vmatprep.subr.bf16.mxu1 %v7892_v56  ;;  %v7894_v56 = vld [vmem:[%s11326_s5 + $0x78] sm:$0xff]  }
 0x295   :  { %v4689_v1 = vmul.f32 %v10089_v62, %v4636_v11  ;;  %v10420_v37 = vpop.permute.xlu1 %3339 }
 0x296   :  { %v4637_v41 = vsel %vm4539_vm8, %v4368_v38, %v4588_v60  ;;  %v3837_v38 = vsel %vm3784_vm6, %v10188_v46, %v10218_v49  ;;  %v7893_v46 = vld [vmem:[%s11326_s5 + $0x30] sm:$0xff]  }
 0x297   :  { %v4690_v32 = vmul.f32 %v10089_v62, %v4637_v41  ;;  %v4742_v53 = vadd.f32 %v10093_v54, %v4689_v1  ;;  %v10442_v1 = vpack.c.bf16 %v11374_v63, %v11373_v61  ;;  %7366 = vmatpush3.bf16.msra.mxu1 %v7893_v46 }
 0x298   :  { %v4372_v44 = vpop.f32.mrb[20].mxu1  ;;  %v10431_v35 = vpop.permute.xlu0 %3407  ;;  %7367 = vmatprep.subr.bf16.mxu1 %v7894_v56 }
 0x299   :  { %v4743_v9 = vadd.f32 %v10093_v54, %v4690_v32  ;;  %v4373_v24 = vadd.f32 %v4372_v44, %v10076_v29  ;;  %v4374_v5 = vpop.f32.mrb[21].mxu1  ;;  %v3686_v30 = vpop.permute.xlu1 %3685  ;;  %v3889_v32 = vsel %vm3853_vm10, %v3837_v38, %v10216_v31 }
 0x29a   :  { %v4375_v11 = vpop.f32.mrb[22].mxu1  ;;  %v4091_v60 = vsel %vm4053_vm13, %v4040_v14, %v3686_v30  ;;  %v7895_v14 = vld [vmem:[%s11326_s5 + $0x38] sm:$0xff]  }
 0x29b   :  { %v7217_v3 = vpack.c.bf16 %v4743_v9, %v4741_v13  ;;  %v4787_v25 = vpack.c.bf16 %v4743_v9, %v4742_v53  ;;  %vm4540_vm2 = vcmp.gt.f32.partialorder %v4373_v24, 0.0  ;;  %v4589_v49 = vmul.f32 0.2, %v4373_v24  ;;  %v4377_v20 = vpop.f32.mrb[23].mxu1  ;;  %7368 = vmatpush3.bf16.msra.mxu1 %v7895_v14 }
 0x29c   :  { %v4376_v45 = vadd.f32 %v4375_v11, %v10076_v29  ;;  %v4160_v41 = vsel %vm4104_vm15, %v4091_v60, %v3761_v55  ;;  %v3940_v13 = vsel %vm3900_vm12, %v3889_v32, %v10344_v6  ;;  %v11375_v9 = vmov 0  }
 0x29d   :  { %4475 = vmatmul.mubr.bf16.gmra.mrb[72].mxu1 %v4160_v41  ;;  %5031 = vrot.lane.b32.xlu0 %v7217_v3, %s7981_s26  ;;  %v4638_v52 = vsel %vm4540_vm2, %v4373_v24, %v4589_v49  ;;  %v10462_v44 = vcombine.low %v11375_v9, %v4787_v25  ;;  %v3991_v31 = vsel %vm3951_vm1, %v3940_v13, %v10358_v27 }
 0x29e   :  { %4931 = vrot.lane.b32.xlu1 %v7217_v3, %s7977_s14  ;;  %6901 = vmatprep.mubr.msk.bf16.mxu1 %vm3784_vm6, %v10442_v1  ;;  %v4691_v55 = vmul.f32 %v10089_v62, %v4638_v52  ;;  %v4590_v38 = vmul.f32 0.2, %v4376_v45  ;;  %vm4541_vm9 = vcmp.gt.f32.partialorder %v4376_v45, 0.0  ;;  %v4042_v3 = vsel %vm4002_vm4, %v3991_v31, %v10360_v39 }
 0x29f   :  { %v10469_v24 = vpop.permute.xlu0 %3341  ;;  %v3840_v41 = vsel %vm3784_vm6, %v10225_v0, %v10278_v51 }
 0x2a0   :  { %v4744_v5 = vadd.f32 %v10093_v54, %v4691_v55  ;;  %v3763_v6 = vpop.permute.xlu1 %3762  ;;  %v4380_v30 = vpop.f32.mrb[24].mxu1  ;;  %v4639_v63 = vsel %vm4541_vm9, %v4376_v45, %v4590_v38  ;;  %v11376_v55 = vld [vmem:[#allocation12_spill] sm:$0xff]  ;;  %v3891_v0 = vsel %vm3853_vm10, %v3840_v41, %v10295_v21 }
 0x2a1   :  { %5019 = vrot.lane.b32.xlu0 %v10462_v44, %s7978_s16  ;;  %v4381_v11 = vadd.f32 %v4380_v30, %v10076_v29  ;;  %v4382_v60 = vpop.f32.mrb[25].mxu1  ;;  %v4692_v45 = vmul.f32 %v10089_v62, %v4639_v63  ;;  %v7209_v14 = vpack.c.bf16 %v10038_v36, %v11376_v55  ;;  %v3942_v31 = vsel %vm3900_vm12, %v3891_v0, %v10378_v26 }
 0x2a2   :  { %v4383_v61 = vpop.f32.mrb[26].mxu1  ;;  %v10477_v27 = vpack.c.bf16 %v4744_v5, %v4742_v53 }
 0x2a3   :  { %vm4542_vm11 = vcmp.gt.f32.partialorder %v4381_v11, 0.0  ;;  %v4591_v25 = vmul.f32 0.2, %v4381_v11  ;;  %v3688_v46 = vpop.permute.xlu0 %3687  ;;  %v4384_v49 = vadd.f32 %v4383_v61, %v10076_v29  ;;  %v4385_v20 = vpop.f32.mrb[27].mxu1  ;;  %v4745_v36 = vadd.f32 %v10093_v54, %v4692_v45 }
 0x2a4   :  { %v4093_v56 = vsel %vm4053_vm13, %v4042_v3, %v3688_v46  ;;  %v10484_v32 = vpop.permute.xlu1 %3409  ;;  %4951 = vrot.lane.b32.xlu1 %v10477_v27, %s7978_s16 }
 0x2a5   :  { %v4640_v39 = vsel %vm4542_vm11, %v4381_v11, %v4591_v25  ;;  %vm4543_vm14 = vcmp.gt.f32.partialorder %v4384_v49, 0.0  ;;  %v4592_v53 = vmul.f32 0.2, %v4384_v49  ;;  %v4163_v13 = vsel %vm4104_vm15, %v4093_v56, %v3763_v6 }
 0x2a6   :  { %v4693_v52 = vmul.f32 %v10089_v62, %v4640_v39  ;;  %4483 = vmatmul.mubr.bf16.gmra.mrb[76].mxu1 %v4163_v13  ;;  %v3993_v6 = vsel %vm3951_vm1, %v3942_v31, %v10399_v10 }
 0x2a7   :  { %v4641_v51 = vsel %vm4543_vm14, %v4384_v49, %v4592_v53  ;;  %6902 = vmatprep.mubr.msk.bf16.mxu1 %vm3784_vm6, %v7209_v14  ;;  %v4044_v26 = vsel %vm4002_vm4, %v3993_v6, %v10395_v57  ;;  %v3765_v25 = vpop.permute.xlu0 %3764 }
 0x2a8   :  { %v4746_v38 = vadd.f32 %v10093_v54, %v4693_v52  ;;  %v4694_v30 = vmul.f32 %v10089_v62, %v4641_v51  ;;  %v10500_v11 = vpop.permute.xlu1 %3343 }
 0x2aa   :  { %v4747_v21 = vadd.f32 %v10093_v54, %v4694_v30  ;;  %v10506_v60 = vpack.c.bf16 %v4746_v38, %v4744_v5  ;;  %v11377_v5 = vld [vmem:[#allocation7_spill] sm:$0xff] }
 0x2ab   :  { %v2921_v49 = vpack.c.bf16 %v9841_v48, %v11377_v5 }
 0x2ac   :  { %v3690_v3 = vpop.permute.xlu1 %3689  ;;  %5021 = vrot.lane.b32.xlu1 %v10506_v60, %s7978_s16  ;;  %v7218_v61 = vpack.c.bf16 %v4747_v21, %v4745_v36  ;;  %v4789_v63 = vpack.c.bf16 %v4747_v21, %v4746_v38 }
 0x2ad   :  { %v4095_v46 = vsel %vm4053_vm13, %v4044_v26, %v3690_v3  ;;  %v3195_v53 = vunpack.c.h.b16 %v2921_v49  ;;  %v3558_v59 = vpop.permute.xlu0 %3557 }
 0x2ae   :  { %v4166_v10 = vsel %vm4104_vm15, %v4095_v46, %v3765_v25  ;;  %5033 = vrot.lane.b32.xlu0 %v7218_v61, %s7981_s26  ;;  %v10521_v57 = vcombine.low %v4789_v63, %v11375_v9 }
 0x2af   :  { %4491 = vmatmul.mubr.bf16.gmra.mrb[80].mxu1 %v4166_v10  ;;  %v3275_v51 = vpack.c.b16 %v3195_v53, %v8327_v40 }
 0x2b0   :  { %6903 = vmatprep.mubr.msk.bf16.mxu1 %vm3784_vm6, %v7210_v43  ;;  %4933 = vrot.lane.b32.xlu1 %v7218_v61, %s7977_s14 }
 0x2b1   :  { %v3633_v20 = vpop.permute.xlu1 %3632  ;;  %v3843_v30 = vsel %vm3784_vm6, %v3275_v51, %v10420_v37 }
 0x2b2   :  { %v3893_v21 = vsel %vm3853_vm10, %v3843_v30, %v10431_v35  ;;  %v1853_v35 = vadd.f32 %v10137_v47, %v8280_v2 }
 0x2b4   :  { %4953 = vrot.lane.b32.xlu1 %v10521_v57, %s7978_s16  ;;  %vm2051_vm2 = vcmp.gt.f32.partialorder %v1853_v35, 0.0 }
 0x2b7   :  { %v3485_v48 = vpop.permute.xlu0 %3484 }
 0x2b9   :  { %v3483_v13 = vpop.permute.xlu1 %3482 }
 0x2ba   :  { %v3944_v61 = vsel %vm3900_vm12, %v3893_v21, %v3483_v13 }
 0x2bd   :  { %v3560_v63 = vpop.permute.xlu1 %3559 }
 0x2c2   :  { %v4388_v41 = vpop.f32.mrb[28].mxu1 }
 0x2c3   :  { %v4389_v56 = vadd.f32 %v4388_v41, %v10076_v29  ;;  %v4390_v39 = vpop.f32.mrb[29].mxu1  ;;  %v3635_v41 = vpop.permute.xlu0 %3634 }
 0x2c4   :  { %v4391_v50 = vpop.f32.mrb[30].mxu1  ;;  %v3995_v39 = vsel %vm3951_vm1, %v3944_v61, %v3558_v59  ;;  %v2247_v59 = vmul.f32 0.2, %v1853_v35 }
 0x2c5   :  { %vm4544_vm0 = vcmp.gt.f32.partialorder %v4389_v56, 0.0  ;;  %v4593_v43 = vmul.f32 0.2, %v4389_v56  ;;  %v4392_v45 = vadd.f32 %v4391_v50, %v10076_v29  ;;  %v4393_v52 = vpop.f32.mrb[31].mxu1 }
 0x2c7   :  { %v4642_v14 = vsel %vm4544_vm0, %v4389_v56, %v4593_v43  ;;  %vm4545_vm3 = vcmp.gt.f32.partialorder %v4392_v45, 0.0  ;;  %v4594_v0 = vmul.f32 0.2, %v4392_v45 }
 0x2c8   :  { %v4695_v31 = vmul.f32 %v10089_v62, %v4642_v14 }
 0x2c9   :  { %v4643_v38 = vsel %vm4545_vm3, %v4392_v45, %v4594_v0  ;;  %v4046_v0 = vsel %vm4002_vm4, %v3995_v39, %v3633_v20 }
 0x2ca   :  { %v4696_v6 = vmul.f32 %v10089_v62, %v4643_v38  ;;  %v4396_v36 = vpop.f32.mrb[32].mxu1  ;;  %v10539_v25 = vadd.f32 %v10093_v54, %v4695_v31  ;;  %v3846_v38 = vsel %vm3784_vm6, %v10389_v28, %v10469_v24 }
 0x2cb   :  { %v4397_v26 = vadd.f32 %v4396_v36, %v10076_v29  ;;  %v4398_v3 = vpop.f32.mrb[33].mxu1  ;;  %v3895_v20 = vsel %vm3853_vm10, %v3846_v38, %v10484_v32 }
 0x2cc   :  { %v4749_v46 = vadd.f32 %v10093_v54, %v4696_v6  ;;  %v4399_v10 = vpop.f32.mrb[34].mxu1  ;;  %v3946_v28 = vsel %vm3900_vm12, %v3895_v20, %v3485_v48  ;;  %v7065_v20 = vpack.c.bf16 %v11376_v55, %v11376_v55 }
 0x2cd   :  { %vm4546_vm5 = vcmp.gt.f32.partialorder %v4397_v26, 0.0  ;;  %v4595_v37 = vmul.f32 0.2, %v4397_v26  ;;  %v4400_v5 = vadd.f32 %v4399_v10, %v10076_v29  ;;  %v4401_v49 = vpop.f32.mrb[35].mxu1  ;;  %v3997_v48 = vsel %vm3951_vm1, %v3946_v28, %v3560_v63 }
 0x2ce   :  { %v4790_v56 = vpack.c.bf16 %v4749_v46, %v10539_v25  ;;  %v3849_v63 = vsel %vm3784_vm6, %v10442_v1, %v10500_v11 }
 0x2cf   :  { %v4644_v53 = vsel %vm4546_vm5, %v4397_v26, %v4595_v37  ;;  %vm4547_vm7 = vcmp.gt.f32.partialorder %v4400_v5, 0.0  ;;  %v4596_v50 = vmul.f32 0.2, %v4400_v5  ;;  %v3767_v45 = vpop.permute.xlu1 %3766 }
 0x2d0   :  { %v4697_v43 = vmul.f32 %v10089_v62, %v4644_v53  ;;  %v4848_v52 = vunpack.c.h.b16 %v4790_v56 }
 0x2d1   :  { %v4645_v13 = vsel %vm4547_vm7, %v4400_v5, %v4596_v50  ;;  %v3692_v14 = vpop.permute.xlu0 %3691  ;;  %v2443_v50 = vsel %vm2051_vm2, %v1853_v35, %v2247_v59 }
 0x2d2   :  { %v10550_v51 = vadd.f32 %v10093_v54, %v4697_v43  ;;  %v4698_v2 = vmul.f32 %v10089_v62, %v4645_v13  ;;  %v4965_v31 = vpack.c.b16 %v4848_v52, %v8327_v40  ;;  %v4097_v30 = vsel %vm4053_vm13, %v4046_v0, %v3692_v14 }
 0x2d3   :  { %v4169_v26 = vsel %vm4104_vm15, %v4097_v30, %v3767_v45  ;;  %v4048_v43 = vsel %vm4002_vm4, %v3997_v48, %v3635_v41 }
 0x2d4   :  { %v4404_v47 = vpop.f32.mrb[36].mxu1  ;;  %v4751_v21 = vadd.f32 %v10093_v54, %v4698_v2  ;;  %4975 = vrot.lane.b32.xlu1 %v4965_v31, %s7981_s26  ;;  %v7232_v61 = vpack.c.bf16 %v10550_v51, %v10539_v25  ;;  %4499 = vmatmul.mubr.bf16.gmra.mrb[84].mxu1 %v4169_v26  ;;  %v3694_v24 = vpop.permute.xlu1 %3693 }
 0x2d5   :  { %v4405_v6 = vadd.f32 %v4404_v47, %v10076_v29  ;;  %v4406_v36 = vpop.f32.mrb[37].mxu1  ;;  %v3412_v32 = vpop.permute.xlu0 %3411  ;;  %6904 = vmatprep.mubr.msk.bf16.mxu1 %vm3784_vm6, %v7211_v16  ;;  %v4099_v52 = vsel %vm4053_vm13, %v4048_v43, %v3694_v24 }
 0x2d6   :  { %v4407_v3 = vpop.f32.mrb[38].mxu1  ;;  %v7239_v49 = vpack.c.bf16 %v4751_v21, %v4749_v46  ;;  %v2643_v46 = vmul.f32 %v8296_v12, %v2443_v50  ;;  %v3897_v41 = vsel %vm3853_vm10, %v3849_v63, %v3412_v32 }
 0x2d7   :  { %vm4548_vm8 = vcmp.gt.f32.partialorder %v4405_v6, 0.0  ;;  %v4597_v10 = vmul.f32 0.2, %v4405_v6  ;;  %v4408_v37 = vadd.f32 %v4407_v3, %v10076_v29  ;;  %v4409_v5 = vpop.f32.mrb[39].mxu1 }
 0x2d8   :  { %5007 = vrot.lane.b32.xlu0 %v7239_v49, %s7977_s14  ;;  %v2843_v31 = vadd.f32 %v8304_v19, %v2643_v46 }
 0x2d9   :  { %v4646_v56 = vsel %vm4548_vm8, %v4405_v6, %v4597_v10  ;;  %vm4549_vm9 = vcmp.gt.f32.partialorder %v4408_v37, 0.0  ;;  %v4598_v39 = vmul.f32 0.2, %v4408_v37  ;;  %v3769_v13 = vpop.permute.xlu0 %3768 }
 0x2da   :  { %v4699_v53 = vmul.f32 %v10089_v62, %v4646_v56  ;;  %v3487_v15 = vpop.permute.xlu1 %3486  ;;  %v4172_v16 = vsel %vm4104_vm15, %v4099_v52, %v3769_v13  ;;  %v7213_v36 = vpack.c.bf16 %v2843_v31, %v2843_v31 }
 0x2db   :  { %v4647_v45 = vsel %vm4549_vm9, %v4408_v37, %v4598_v39  ;;  %v3948_v0 = vsel %vm3900_vm12, %v3897_v41, %v3487_v15 }
 0x2dc   :  { %v4700_v33 = vmul.f32 %v10089_v62, %v4647_v45  ;;  %v10584_v14 = vadd.f32 %v10093_v54, %v4699_v53  ;;  %4507 = vmatmul.mubr.bf16.gmra.mrb[88].mxu1 %v4172_v16 }
 0x2dd   :  { %6905 = vmatprep.mubr.msk.bf16.mxu1 %vm3784_vm6, %v7212_v22  ;;  %v3562_v12 = vpop.permute.xlu0 %3561 }
 0x2de   :  { %v4753_v35 = vadd.f32 %v10093_v54, %v4700_v33  ;;  %v3999_v1 = vsel %vm3951_vm1, %v3948_v0, %v3562_v12  ;;  %v3637_v11 = vpop.permute.xlu1 %3636 }
 0x2df   :  { %v4050_v38 = vsel %vm4002_vm4, %v3999_v1, %v3637_v11 }
 0x2e0   :  { %v7227_v2 = vpack.c.bf16 %v4753_v35, %v4751_v21  ;;  %v4792_v47 = vpack.c.bf16 %v4753_v35, %v10584_v14 }
 0x2e1   :  { %v3696_v30 = vpop.permute.xlu0 %3695 }
 0x2e2   :  { %4977 = vrot.lane.b32.xlu1 %v7227_v2, %s7981_s26  ;;  %v4852_v59 = vunpack.c.h.b16 %v4792_v47  ;;  %v4101_v23 = vsel %vm4053_vm13, %v4050_v38, %v3696_v30  ;;  %v3771_v42 = vpop.permute.xlu1 %3770 }
 0x2e3   :  { %v4175_v22 = vsel %vm4104_vm15, %v4101_v23, %v3771_v42 }
 0x2e4   :  { %v4998_v6 = vpack.c.b16 %v8327_v40, %v4852_v59  ;;  %4515 = vmatmul.mubr.bf16.gmra.mrb[92].mxu1 %v4175_v22 }
 0x2e5   :  { %v3346_v21 = vpop.permute.xlu0 %3345  ;;  %6906 = vmatprep.mubr.msk.bf16.mxu1 %vm3784_vm6, %v7213_v36 }
 0x2e6   :  { %5009 = vrot.lane.b32.xlu0 %v4998_v6, %s7977_s14  ;;  %v3852_v19 = vsel %vm3784_vm6, %v7065_v20, %v3346_v21  ;;  %v3414_v26 = vpop.permute.xlu1 %3413 }
 0x2e7   :  { %v3899_v3 = vsel %vm3853_vm10, %v3852_v19, %v3414_v26 }
 0x2e9   :  { %v3489_v28 = vpop.permute.xlu0 %3488 }
 0x2ea   :  { %v3950_v24 = vsel %vm3900_vm12, %v3899_v3, %v3489_v28  ;;  %v3564_v10 = vpop.permute.xlu1 %3563 }
 0x2eb   :  { %v4001_v37 = vsel %vm3951_vm1, %v3950_v24, %v3564_v10 }
 0x2ed   :  { %v3639_v5 = vpop.permute.xlu0 %3638 }
 0x2ee   :  { %v4052_v32 = vsel %vm4002_vm4, %v4001_v37, %v3639_v5  ;;  %v3698_v49 = vpop.permute.xlu1 %3697 }
 0x2ef   :  { %v4103_v55 = vsel %vm4053_vm13, %v4052_v32, %v3698_v49 }
 0x2f1   :  { %v3773_v39 = vpop.permute.xlu0 %3772 }
 0x2f2   :  { %v4412_v56 = vpop.f32.mrb[40].mxu1  ;;  %v4178_v50 = vsel %vm4104_vm15, %v4103_v55, %v3773_v39  ;;  %v5004_v16 = vpop.permute.xlu1 %5003 }
 0x2f3   :  { %v4413_v48 = vadd.f32 %v4412_v56, %v10076_v29  ;;  %v4414_v53 = vpop.f32.mrb[41].mxu1  ;;  %4523 = vmatmul.mubr.bf16.gmra.mrb[96].mxu1 %v4178_v50 }
 0x2f4   :  { %v4415_v43 = vpop.f32.mrb[42].mxu1 }
 0x2f5   :  { %vm4550_vm6 = vcmp.gt.f32.partialorder %v4413_v48, 0.0  ;;  %v4599_v45 = vmul.f32 0.2, %v4413_v48  ;;  %v4417_v52 = vpop.f32.mrb[43].mxu1  ;;  %v4416_v46 = vadd.f32 %v4415_v43, %v10076_v29  ;;  %v10627_v21 = vpop.permute.xlu0 %5005 }
 0x2f6   :  { %v10620_v0 = vpop.permute.xlu1 %4949 }
 0x2f7   :  { %v4648_v13 = vsel %vm4550_vm6, %v4413_v48, %v4599_v45  ;;  %v4600_v35 = vmul.f32 0.2, %v4416_v46  ;;  %vm4551_vm12 = vcmp.gt.f32.partialorder %v4416_v46, 0.0 }
 0x2f8   :  { %v4701_v33 = vmul.f32 %v10089_v62, %v4648_v13 }
 0x2f9   :  { %v4649_v1 = vsel %vm4551_vm12, %v4416_v46, %v4600_v35  ;;  %v5104_v35 = vsel %vm3853_vm10, %v7230_v18, %v5004_v16 }
 0x2fa   :  { %v10615_v15 = vadd.f32 %v10093_v54, %v4701_v33  ;;  %v4702_v6 = vmul.f32 %v10089_v62, %v4649_v1  ;;  %v4972_v23 = vpop.permute.xlu1 %4971  ;;  %v11378_v33 = vld [vmem:[#allocation6_spill] sm:$0xff] }
 0x2fb   :  { %v5045_v46 = vsel %vm3853_vm10, %v11369_v7, %v11378_v33 }
 0x2fc   :  { %v7233_v63 = vpack.c.bf16 %v10615_v15, %v10584_v14  ;;  %v4755_v19 = vadd.f32 %v10093_v54, %v4702_v6 }
 0x2fe   :  { %v4974_v56 = vpop.permute.xlu1 %4973 }
 0x300   :  { %v4420_v41 = vpop.f32.mrb[44].mxu1 }
 0x301   :  { %v4421_v12 = vadd.f32 %v4420_v41, %v10076_v29  ;;  %v4422_v2 = vpop.f32.mrb[45].mxu1 }
 0x302   :  { %v4423_v47 = vpop.f32.mrb[46].mxu1 }
 0x303   :  { %vm4552_vm4 = vcmp.gt.f32.partialorder %v4421_v12, 0.0  ;;  %v4601_v11 = vmul.f32 0.2, %v4421_v12  ;;  %v4424_v31 = vadd.f32 %v4423_v47, %v10076_v29  ;;  %v4425_v59 = vpop.f32.mrb[47].mxu1  ;;  %v5065_v47 = vsel %vm3951_vm1, %v5045_v46, %v10620_v0 }
 0x305   :  { %v4650_v38 = vsel %vm4552_vm4, %v4421_v12, %v4601_v11  ;;  %vm4553_vm15 = vcmp.gt.f32.partialorder %v4424_v31, 0.0  ;;  %v4602_v30 = vmul.f32 0.2, %v4424_v31 }
 0x306   :  { %v4703_v42 = vmul.f32 %v10089_v62, %v4650_v38  ;;  %v5079_v38 = vsel %vm4053_vm13, %v5065_v47, %v4972_v23 }
 0x307   :  { %v4651_v22 = vsel %vm4553_vm15, %v4424_v31, %v4602_v30 }
 0x308   :  { %v4704_v36 = vmul.f32 %v10089_v62, %v4651_v22  ;;  %v4756_v24 = vadd.f32 %v10093_v54, %v4703_v42 }
 0x309   :  { %v4428_v20 = vpop.f32.mrb[48].mxu1 }
 0x30a   :  { %v4757_v26 = vadd.f32 %v10093_v54, %v4704_v36  ;;  %v4429_v3 = vadd.f32 %v4428_v20, %v10076_v29  ;;  %v4430_v28 = vpop.f32.mrb[49].mxu1 }
 0x30b   :  { %v4431_v10 = vpop.f32.mrb[50].mxu1 }
 0x30c   :  { %vm4554_vm11 = vcmp.gt.f32.partialorder %v4429_v3, 0.0  ;;  %v4603_v37 = vmul.f32 0.2, %v4429_v3  ;;  %v4432_v5 = vadd.f32 %v4431_v10, %v10076_v29  ;;  %v4433_v32 = vpop.f32.mrb[51].mxu1  ;;  %v7219_v49 = vpack.c.bf16 %v4757_v26, %v4755_v19 }
 0x30d   :  { %v4794_v55 = vpack.c.bf16 %v4757_v26, %v4756_v24 }
 0x30e   :  { %v4652_v39 = vsel %vm4554_vm11, %v4429_v3, %v4603_v37  ;;  %5035 = vrot.lane.b32.xlu0 %v7219_v49, %s7981_s26  ;;  %4935 = vrot.lane.b32.xlu1 %v7219_v49, %s7977_s14  ;;  %v4604_v50 = vmul.f32 0.2, %v4432_v5  ;;  %vm4555_vm14 = vcmp.gt.f32.partialorder %v4432_v5, 0.0 }
 0x30f   :  { %v5032_v48 = vpop.permute.xlu0 %5031  ;;  %v4705_v53 = vmul.f32 %v10089_v62, %v4652_v39  ;;  %v10638_v43 = vcombine.low %v11375_v9, %v4794_v55 }
 0x310   :  { %v4932_v13 = vpop.permute.xlu1 %4931  ;;  %v4653_v1 = vsel %vm4555_vm14, %v4432_v5, %v4604_v50  ;;  %v5107_v5 = vsel %vm3853_vm10, %v7231_v17, %v10627_v21 }
 0x311   :  { %v4758_v45 = vadd.f32 %v10093_v54, %v4705_v53  ;;  %v4436_v52 = vpop.f32.mrb[52].mxu1  ;;  %v5048_v6 = vsel %vm3853_vm10, %v10462_v44, %v4932_v13  ;;  %v4706_v36 = vmul.f32 %v10089_v62, %v4653_v1 }
 0x312   :  { %v4437_v41 = vadd.f32 %v4436_v52, %v10076_v29  ;;  %v4438_v12 = vpop.f32.mrb[53].mxu1  ;;  %5023 = vrot.lane.b32.xlu0 %v10638_v43, %s7978_s16 }
 0x313   :  { %v5020_v2 = vpop.permute.xlu0 %5019  ;;  %v4439_v11 = vpop.f32.mrb[54].mxu1  ;;  %v10654_v59 = vpack.c.bf16 %v4758_v45, %v4756_v24  ;;  %v4759_v28 = vadd.f32 %v10093_v54, %v4706_v36 }
 0x314   :  { %v5127_v31 = vsel %vm3951_vm1, %v5104_v35, %v5020_v2  ;;  %vm4556_vm0 = vcmp.gt.f32.partialorder %v4437_v41, 0.0  ;;  %v4605_v58 = vmul.f32 0.2, %v4437_v41  ;;  %v4440_v34 = vadd.f32 %v4439_v11, %v10076_v29  ;;  %v4441_v18 = vpop.f32.mrb[55].mxu1 }
 0x315   :  { %v5141_v16 = vsel %vm4053_vm13, %v5127_v31, %v5032_v48  ;;  %4955 = vrot.lane.b32.xlu1 %v10654_v59, %s7978_s16  ;;  %v5082_v48 = vsel %vm4053_vm13, %v5065_v47, %v4974_v56 }
 0x316   :  { %5327 = vmatprep.mubr.bf16.mxu1 %v5141_v16  ;;  %v4654_v30 = vsel %vm4556_vm0, %v4437_v41, %v4605_v58  ;;  %vm4557_vm3 = vcmp.gt.f32.partialorder %v4440_v34, 0.0  ;;  %v4606_v42 = vmul.f32 0.2, %v4440_v34  ;;  %v4952_v22 = vpop.permute.xlu1 %4951 }
 0x317   :  { %5328 = vmatmul.mubr.bf16.vlgmr.msra.gmra.mrb[100].mxu1 %v5079_v38  ;;  %v4707_v20 = vmul.f32 %v10089_v62, %v4654_v30  ;;  %v10666_v19 = vsel %vm3951_vm1, %v5048_v6, %v4952_v22 }
 0x318   :  { %v4655_v23 = vsel %vm4557_vm3, %v4440_v34, %v4606_v42 }
 0x319   :  { %v10669_v26 = vadd.f32 %v10093_v54, %v4707_v20  ;;  %v4708_v3 = vmul.f32 %v10089_v62, %v4655_v23 }
 0x31b   :  { %v4761_v44 = vadd.f32 %v10093_v54, %v4708_v3  ;;  %v10675_v24 = vpack.c.bf16 %v10669_v26, %v4758_v45 }
 0x31d   :  { %5025 = vrot.lane.b32.xlu0 %v10675_v24, %s7978_s16  ;;  %v7220_v10 = vpack.c.bf16 %v4761_v44, %v4759_v28  ;;  %v4796_v37 = vpack.c.bf16 %v4761_v44, %v10669_v26 }
 0x31e   :  { %v5022_v32 = vpop.permute.xlu1 %5021 }
 0x31f   :  { %4937 = vrot.lane.b32.xlu1 %v7220_v10, %s7977_s14  ;;  %v5129_v49 = vsel %vm3951_vm1, %v5107_v5, %v5022_v32 }
 0x320   :  { %v5034_v55 = vpop.permute.xlu0 %5033 }
 0x321   :  { %5037 = vrot.lane.b32.xlu0 %v7220_v10, %s7981_s26  ;;  %v5144_v39 = vsel %vm4053_vm13, %v5129_v49, %v5034_v55  ;;  %v10714_v49 = vcombine.low %v4796_v37, %v11375_v9 }
 0x322   :  { %5335 = vmatprep.mubr.bf16.mxu1 %v5144_v39 }
 0x323   :  { %5336 = vmatmul.mubr.bf16.gmra.mrb[104].mxu1 %v5082_v48 }
 0x335   :  { %v4444_v53 = vpop.f32.mrb[56].mxu1 }
 0x336   :  { %v4445_v50 = vadd.f32 %v4444_v53, %v10076_v29  ;;  %v4446_v4 = vpop.f32.mrb[57].mxu1 }
 0x337   :  { %v4447_v8 = vpop.f32.mrb[58].mxu1 }
 0x338   :  { %vm4558_vm5 = vcmp.gt.f32.partialorder %v4445_v50, 0.0  ;;  %v4607_v17 = vmul.f32 0.2, %v4445_v50  ;;  %v4448_v21 = vadd.f32 %v4447_v8, %v10076_v29  ;;  %v4449_v45 = vpop.f32.mrb[59].mxu1 }
 0x33a   :  { %v4656_v52 = vsel %vm4558_vm5, %v4445_v50, %v4607_v17  ;;  %vm4559_vm7 = vcmp.gt.f32.partialorder %v4448_v21, 0.0  ;;  %v4608_v13 = vmul.f32 0.2, %v4448_v21 }
 0x33b   :  { %v4709_v33 = vmul.f32 %v10089_v62, %v4656_v52 }
 0x33c   :  { %v4657_v46 = vsel %vm4559_vm7, %v4448_v21, %v4608_v13 }
 0x33d   :  { %v4710_v35 = vmul.f32 %v10089_v62, %v4657_v46  ;;  %v10695_v41 = vadd.f32 %v10093_v54, %v4709_v33 }
 0x33e   :  { %v4452_v56 = vpop.f32.mrb[60].mxu1 }
 0x33f   :  { %v4763_v12 = vadd.f32 %v10093_v54, %v4710_v35  ;;  %v4453_v2 = vadd.f32 %v4452_v56, %v10076_v29  ;;  %v4454_v47 = vpop.f32.mrb[61].mxu1 }
 0x340   :  { %v4455_v1 = vpop.f32.mrb[62].mxu1 }
 0x341   :  { %vm4560_vm8 = vcmp.gt.f32.partialorder %v4453_v2, 0.0  ;;  %v4609_v11 = vmul.f32 0.2, %v4453_v2  ;;  %v4456_v31 = vadd.f32 %v4455_v1, %v10076_v29  ;;  %v4457_v58 = vpop.f32.mrb[63].mxu1  ;;  %v4797_v34 = vpack.c.bf16 %v4763_v12, %v10695_v41 }
 0x343   :  { %v4658_v18 = vsel %vm4560_vm8, %v4453_v2, %v4609_v11  ;;  %vm4561_vm2 = vcmp.gt.f32.partialorder %v4456_v31, 0.0  ;;  %v4610_v16 = vmul.f32 0.2, %v4456_v31  ;;  %v4862_v38 = vunpack.c.h.b16 %v4797_v34 }
 0x344   :  { %v4711_v30 = vmul.f32 %v10089_v62, %v4658_v18 }
 0x345   :  { %v4659_v6 = vsel %vm4561_vm2, %v4456_v31, %v4610_v16  ;;  %v4967_v42 = vpack.c.b16 %v4862_v38, %v8327_v40 }
 0x346   :  { %v10704_v22 = vadd.f32 %v10093_v54, %v4711_v30  ;;  %v4712_v36 = vmul.f32 %v10089_v62, %v4659_v6  ;;  %v4460_v20 = vpop.f32.mrb[64].mxu1 }
 0x347   :  { %v4461_v23 = vadd.f32 %v4460_v20, %v10076_v29  ;;  %4979 = vrot.lane.b32.xlu1 %v4967_v42, %s7981_s26  ;;  %v4462_v26 = vpop.f32.mrb[65].mxu1 }
 0x348   :  { %v4765_v3 = vadd.f32 %v10093_v54, %v4712_v36  ;;  %v4463_v28 = vpop.f32.mrb[66].mxu1  ;;  %v7234_v44 = vpack.c.bf16 %v10704_v22, %v10695_v41 }
 0x349   :  { %vm4562_vm9 = vcmp.gt.f32.partialorder %v4461_v23, 0.0  ;;  %v4611_v10 = vmul.f32 0.2, %v4461_v23  ;;  %v4464_v5 = vadd.f32 %v4463_v28, %v10076_v29  ;;  %v4465_v32 = vpop.f32.mrb[67].mxu1 }
 0x34a   :  { %v7240_v55 = vpack.c.bf16 %v4765_v3, %v4763_v12  ;;  %v10742_v32 = vpop.permute.xlu1 %4933 }
 0x34b   :  { %v4660_v39 = vsel %vm4562_vm9, %v4461_v23, %v4611_v10  ;;  %vm4563_vm6 = vcmp.gt.f32.partialorder %v4464_v5, 0.0  ;;  %v4612_v48 = vmul.f32 0.2, %v4464_v5  ;;  %4957 = vrot.lane.b32.xlu1 %v10714_v49, %s7978_s16 }
 0x34c   :  { %v4713_v53 = vmul.f32 %v10089_v62, %v4660_v39  ;;  %5011 = vrot.lane.b32.xlu0 %v7240_v55, %s7977_s14 }
 0x34d   :  { %v4661_v50 = vsel %vm4563_vm6, %v4464_v5, %v4612_v48  ;;  %v5008_v5 = vpop.permute.xlu0 %5007 }
 0x34e   :  { %v4714_v4 = vmul.f32 %v10089_v62, %v4661_v50  ;;  %v10722_v8 = vadd.f32 %v10093_v54, %v4713_v53 }
 0x350   :  { %v4767_v37 = vadd.f32 %v10093_v54, %v4714_v4 }
 0x352   :  { %v7228_v17 = vpack.c.bf16 %v4767_v37, %v4765_v3  ;;  %v4799_v21 = vpack.c.bf16 %v4767_v37, %v10722_v8 }
 0x354   :  { %4981 = vrot.lane.b32.xlu1 %v7228_v17, %s7981_s26  ;;  %v4866_v45 = vunpack.c.h.b16 %v4799_v21 }
 0x356   :  { %v5000_v52 = vpack.c.b16 %v8327_v40, %v4866_v45 }
 0x358   :  { %5013 = vrot.lane.b32.xlu0 %v5000_v52, %s7977_s14  ;;  %v5010_v21 = vpop.permute.xlu0 %5009 }
 0x361   :  { %v4468_v13 = vpop.f32.mrb[68].mxu1 }
 0x362   :  { %v4469_v33 = vadd.f32 %v4468_v13, %v10076_v29  ;;  %v4470_v46 = vpop.f32.mrb[69].mxu1 }
 0x363   :  { %v4471_v35 = vpop.f32.mrb[70].mxu1  ;;  %v4954_v46 = vpop.permute.xlu1 %4953 }
 0x364   :  { %vm4564_vm12 = vcmp.gt.f32.partialorder %v4469_v33, 0.0  ;;  %v4613_v56 = vmul.f32 0.2, %v4469_v33  ;;  %v4473_v12 = vpop.f32.mrb[71].mxu1  ;;  %v4472_v11 = vadd.f32 %v4471_v35, %v10076_v29 }
 0x366   :  { %v4662_v2 = vsel %vm4564_vm12, %v4469_v33, %v4613_v56  ;;  %v4614_v58 = vmul.f32 0.2, %v4472_v11  ;;  %vm4565_vm4 = vcmp.gt.f32.partialorder %v4472_v11, 0.0 }
 0x367   :  { %v4715_v47 = vmul.f32 %v10089_v62, %v4662_v2 }
 0x368   :  { %v4663_v30 = vsel %vm4565_vm4, %v4472_v11, %v4614_v58 }
 0x369   :  { %v10732_v1 = vadd.f32 %v10093_v54, %v4715_v47  ;;  %v4716_v26 = vmul.f32 %v10089_v62, %v4663_v30 }
 0x36b   :  { %v7235_v31 = vpack.c.bf16 %v10732_v1, %v10722_v8  ;;  %v4769_v55 = vadd.f32 %v10093_v54, %v4716_v26 }
 0x370   :  { %v4476_v34 = vpop.f32.mrb[72].mxu1 }
 0x371   :  { %v4477_v18 = vadd.f32 %v4476_v34, %v10076_v29  ;;  %v4478_v16 = vpop.f32.mrb[73].mxu1  ;;  %v4976_v34 = vpop.permute.xlu1 %4975 }
 0x372   :  { %v4479_v38 = vpop.f32.mrb[74].mxu1  ;;  %v5085_v25 = vsel %vm4053_vm13, %v10666_v19, %v4976_v34 }
 0x373   :  { %vm4566_vm15 = vcmp.gt.f32.partialorder %v4477_v18, 0.0  ;;  %v4615_v6 = vmul.f32 0.2, %v4477_v18  ;;  %v4480_v42 = vadd.f32 %v4479_v38, %v10076_v29  ;;  %v4481_v36 = vpop.f32.mrb[75].mxu1  ;;  %v5110_v38 = vsel %vm3853_vm10, %v7232_v61, %v5008_v5 }
 0x375   :  { %v4664_v20 = vsel %vm4566_vm15, %v4477_v18, %v4615_v6  ;;  %vm4567_vm11 = vcmp.gt.f32.partialorder %v4480_v42, 0.0  ;;  %v4616_v23 = vmul.f32 0.2, %v4480_v42 }
 0x376   :  { %v4717_v3 = vmul.f32 %v10089_v62, %v4664_v20 }
 0x377   :  { %v4665_v28 = vsel %vm4567_vm11, %v4480_v42, %v4616_v23 }
 0x378   :  { %v4718_v10 = vmul.f32 %v10089_v62, %v4665_v28  ;;  %v4770_v39 = vadd.f32 %v10093_v54, %v4717_v3 }
 0x379   :  { %v4484_v53 = vpop.f32.mrb[76].mxu1 }
 0x37a   :  { %v4771_v48 = vadd.f32 %v10093_v54, %v4718_v10  ;;  %v4485_v50 = vadd.f32 %v4484_v53, %v10076_v29  ;;  %v4486_v4 = vpop.f32.mrb[77].mxu1 }
 0x37b   :  { %v4487_v45 = vpop.f32.mrb[78].mxu1 }
 0x37c   :  { %v7221_v37 = vpack.c.bf16 %v4771_v48, %v4769_v55  ;;  %v4801_v17 = vpack.c.bf16 %v4771_v48, %v4770_v39  ;;  %vm4568_vm14 = vcmp.gt.f32.partialorder %v4485_v50, 0.0  ;;  %v4617_v52 = vmul.f32 0.2, %v4485_v50  ;;  %v4489_v33 = vpop.f32.mrb[79].mxu1  ;;  %v7897_v48 = vld [vmem:[%s11326_s5 + $0x88] sm:$0xff]  }
 0x37d   :  { %v4488_v13 = vadd.f32 %v4487_v45, %v10076_v29  ;;  %v5113_v33 = vsel %vm3853_vm10, %v7233_v63, %v5010_v21 }
 0x37e   :  { %4939 = vrot.lane.b32.xlu1 %v7221_v37, %s7977_s14  ;;  %5039 = vrot.lane.b32.xlu0 %v7221_v37, %s7981_s26  ;;  %v4666_v35 = vsel %vm4568_vm14, %v4485_v50, %v4617_v52  ;;  %v10752_v56 = vcombine.low %v11375_v9, %v4801_v17 }
 0x37f   :  { %v4719_v12 = vmul.f32 %v10089_v62, %v4666_v35  ;;  %v4618_v2 = vmul.f32 0.2, %v4488_v13  ;;  %vm4569_vm0 = vcmp.gt.f32.partialorder %v4488_v13, 0.0  ;;  %v5051_v35 = vsel %vm3853_vm10, %v10506_v60, %v10742_v32 }
 0x380   :  { %v5036_v47 = vpop.permute.xlu0 %5035 }
 0x381   :  { %v4772_v11 = vadd.f32 %v10093_v54, %v4719_v12  ;;  %v4667_v30 = vsel %vm4569_vm0, %v4488_v13, %v4618_v2  ;;  %v4978_v13 = vpop.permute.xlu1 %4977 }
 0x382   :  { %5027 = vrot.lane.b32.xlu0 %v10752_v56, %s7978_s16  ;;  %5043 = vrot.lane.b32.xlu1 %v11369_v7, %s7981_s26  ;;  %v4492_v58 = vpop.f32.mrb[80].mxu1  ;;  %v4720_v51 = vmul.f32 %v10089_v62, %v4667_v30 }
 0x383   :  { %v4493_v18 = vadd.f32 %v4492_v58, %v10076_v29  ;;  %v4494_v16 = vpop.f32.mrb[81].mxu1  ;;  %v10765_v36 = vpack.c.bf16 %v4772_v11, %v4770_v39  ;;  %v7896_v39 = vld [vmem:[%s11326_s5 + $0x80] sm:$0xff]  }
 0x384   :  { %v4495_v6 = vpop.f32.mrb[82].mxu1  ;;  %v5024_v42 = vpop.permute.xlu0 %5023  ;;  %7731 = vmatprep.subr.bf16.mxu1 %v7896_v39  ;;  %v4773_v19 = vadd.f32 %v10093_v54, %v4720_v51 }
 0x385   :  { %vm4570_vm3 = vcmp.gt.f32.partialorder %v4493_v18, 0.0  ;;  %v4619_v20 = vmul.f32 0.2, %v4493_v18  ;;  %v4496_v23 = vadd.f32 %v4495_v6, %v10076_v29  ;;  %v4497_v26 = vpop.f32.mrb[83].mxu1  ;;  %v5131_v3 = vsel %vm3951_vm1, %v5110_v38, %v5024_v42  ;;  %7732 = vmatpush3.bf16.msra.mxu1 %v7896_v39 }
 0x386   :  { %v5147_v28 = vsel %vm4053_vm13, %v5131_v3, %v5036_v47  ;;  %7733 = vmatprep.subr.bf16.mxu1 %v7897_v48  ;;  %v5069_v47 = vsel %vm3951_vm1, %v5051_v35, %v4954_v46 }
 0x387   :  { %v4668_v10 = vsel %vm4570_vm3, %v4493_v18, %v4619_v20  ;;  %vm4571_vm5 = vcmp.gt.f32.partialorder %v4496_v23, 0.0  ;;  %v4620_v55 = vmul.f32 0.2, %v4496_v23  ;;  %5343 = vmatprep.mubr.bf16.mxu1 %v5147_v28  ;;  %v5088_v58 = vsel %vm4053_vm13, %v5069_v47, %v4978_v13 }
 0x388   :  { %v4721_v61 = vmul.f32 %v10089_v62, %v4668_v10  ;;  %5344 = vmatmul.mubr.bf16.gmra.mrb[108].mxu1 %v5085_v25 }
 0x389   :  { %v4669_v5 = vsel %vm4571_vm5, %v4496_v23, %v4620_v55  ;;  %7734 = vmatpush3.bf16.msra.mxu1 %v7897_v48 }
 0x38a   :  { %v10781_v53 = vadd.f32 %v10093_v54, %v4721_v61  ;;  %v4722_v50 = vmul.f32 %v10089_v62, %v4669_v5 }
 0x38c   :  { %v10786_v4 = vadd.f32 %v10093_v54, %v4722_v50  ;;  %v10789_v37 = vpack.c.bf16 %v10781_v53, %v4772_v11 }
 0x38e   :  { %5029 = vrot.lane.b32.xlu0 %v10789_v37, %s7978_s16  ;;  %v10794_v17 = vpack.c.bf16 %v10786_v4, %v4773_v19  ;;  %v4803_v45 = vpack.c.bf16 %v10786_v4, %v10781_v53 }
 0x38f   :  { %v5026_v52 = vpop.permute.xlu0 %5025 }
 0x390   :  { %v5133_v12 = vsel %vm3951_vm1, %v5113_v33, %v5026_v52 }
 0x392   :  { %5041 = vrot.lane.b32.xlu0 %v10794_v17, %s7981_s26 }
 0x393   :  { %v5038_v2 = vpop.permute.xlu0 %5037 }
 0x394   :  { %v5150_v11 = vsel %vm4053_vm13, %v5133_v12, %v5038_v2 }
 0x395   :  { %5351 = vmatprep.mubr.bf16.mxu1 %v5150_v11 }
 0x396   :  { %4959 = vrot.lane.b32.xlu0 %v10765_v36, %s7978_s16  ;;  %5352 = vmatmul.mubr.bf16.gmra.mrb[112].mxu1 %v5088_v58 }
 0x3a7   :  { %v4500_v14 = vpop.f32.mrb[84].mxu1 }
 0x3a8   :  { %v4501_v15 = vadd.f32 %v4500_v14, %v10076_v29  ;;  %v4502_v63 = vpop.f32.mrb[85].mxu1 }
 0x3a9   :  { %v4503_v21 = vpop.f32.mrb[86].mxu1 }
 0x3aa   :  { %vm4572_vm7 = vcmp.gt.f32.partialorder %v4501_v15, 0.0  ;;  %v4621_v60 = vmul.f32 0.2, %v4501_v15  ;;  %v4504_v32 = vadd.f32 %v4503_v21, %v10076_v29  ;;  %v4505_v34 = vpop.f32.mrb[87].mxu1 }
 0x3ac   :  { %v4670_v46 = vsel %vm4572_vm7, %v4501_v15, %v4621_v60  ;;  %vm4573_vm8 = vcmp.gt.f32.partialorder %v4504_v32, 0.0  ;;  %v4622_v18 = vmul.f32 0.2, %v4504_v32 }
 0x3ad   :  { %v4723_v16 = vmul.f32 %v10089_v62, %v4670_v46 }
 0x3ae   :  { %v4671_v38 = vsel %vm4573_vm8, %v4504_v32, %v4622_v18 }
 0x3af   :  { %v4724_v30 = vmul.f32 %v10089_v62, %v4671_v38  ;;  %v4508_v6 = vpop.f32.mrb[88].mxu1  ;;  %v10819_v23 = vadd.f32 %v10093_v54, %v4723_v16 }
 0x3b0   :  { %v4509_v42 = vadd.f32 %v4508_v6, %v10076_v29  ;;  %v4510_v20 = vpop.f32.mrb[89].mxu1 }
 0x3b1   :  { %v4777_v26 = vadd.f32 %v10093_v54, %v4724_v30  ;;  %v4511_v3 = vpop.f32.mrb[90].mxu1 }
 0x3b2   :  { %vm4574_vm2 = vcmp.gt.f32.partialorder %v4509_v42, 0.0  ;;  %v4623_v28 = vmul.f32 0.2, %v4509_v42  ;;  %v4512_v10 = vadd.f32 %v4511_v3, %v10076_v29  ;;  %v4513_v55 = vpop.f32.mrb[91].mxu1 }
 0x3b3   :  { %v4804_v25 = vpack.c.bf16 %v4777_v26, %v10819_v23 }
 0x3b4   :  { %v4672_v51 = vsel %vm4574_vm2, %v4509_v42, %v4623_v28  ;;  %vm4575_vm9 = vcmp.gt.f32.partialorder %v4512_v10, 0.0  ;;  %v4624_v61 = vmul.f32 0.2, %v4512_v10 }
 0x3b5   :  { %v4725_v5 = vmul.f32 %v10089_v62, %v4672_v51  ;;  %v4876_v14 = vunpack.c.h.b16 %v4804_v25 }
 0x3b6   :  { %v4673_v39 = vsel %vm4575_vm9, %v4512_v10, %v4624_v61  ;;  %v4936_v61 = vpop.permute.xlu1 %4935 }
 0x3b7   :  { %v10826_v48 = vadd.f32 %v10093_v54, %v4725_v5  ;;  %v4726_v50 = vmul.f32 %v10089_v62, %v4673_v39  ;;  %v4516_v19 = vpop.f32.mrb[92].mxu1  ;;  %v4969_v34 = vpack.c.b16 %v4876_v14, %v8327_v40 }
 0x3b8   :  { %v4517_v52 = vadd.f32 %v4516_v19, %v10076_v29  ;;  %v4518_v13 = vpop.f32.mrb[93].mxu1 }
 0x3b9   :  { %v4779_v33 = vadd.f32 %v10093_v54, %v4726_v50  ;;  %v4519_v35 = vpop.f32.mrb[94].mxu1  ;;  %v7236_v12 = vpack.c.bf16 %v10826_v48, %v10819_v23 }
 0x3ba   :  { %vm4576_vm6 = vcmp.gt.f32.partialorder %v4517_v52, 0.0  ;;  %v4625_v2 = vmul.f32 0.2, %v4517_v52  ;;  %v4520_v47 = vadd.f32 %v4519_v35, %v10076_v29  ;;  %v4521_v11 = vpop.f32.mrb[95].mxu1  ;;  %v4956_v50 = vpop.permute.xlu1 %4955 }
 0x3bb   :  { %v7241_v58 = vpack.c.bf16 %v4779_v33, %v4777_v26 }
 0x3bc   :  { %v4674_v15 = vsel %vm4576_vm6, %v4517_v52, %v4625_v2  ;;  %vm4577_vm12 = vcmp.gt.f32.partialorder %v4520_v47, 0.0  ;;  %v4626_v63 = vmul.f32 0.2, %v4520_v47  ;;  %v5054_v2 = vsel %vm3853_vm10, %v10638_v43, %v4936_v61 }
 0x3bd   :  { %v4727_v21 = vmul.f32 %v10089_v62, %v4674_v15  ;;  %5015 = vrot.lane.b32.xlu0 %v7241_v58, %s7977_s14  ;;  %v5071_v11 = vsel %vm3951_vm1, %v5054_v2, %v4956_v50  ;;  %v7910_v2 = vld [vmem:[%s11327_s9 + $0x50] sm:$0xff]  }
 0x3be   :  { %v4675_v60 = vsel %vm4577_vm12, %v4520_v47, %v4626_v63  ;;  %v5012_v5 = vpop.permute.xlu0 %5011 }
 0x3bf   :  { %v4728_v32 = vmul.f32 %v10089_v62, %v4675_v60  ;;  %v10839_v46 = vadd.f32 %v10093_v54, %v4727_v21 }
 0x3c1   :  { %v4781_v18 = vadd.f32 %v10093_v54, %v4728_v32  ;;  %4983 = vrot.lane.b32.xlu0 %v4969_v34, %s7981_s26 }
 0x3c3   :  { %v7229_v16 = vpack.c.bf16 %v4781_v18, %v4779_v33  ;;  %v4806_v38 = vpack.c.bf16 %v4781_v18, %v10839_v46 }
 0x3c5   :  { %4941 = vrot.lane.b32.xlu0 %v10794_v17, %s7977_s14  ;;  %v4880_v30 = vunpack.c.h.b16 %v4806_v38  ;;  %v10854_v17 = vcombine.low %v4803_v45, %v11375_v9 }
 0x3c6   :  { %v4524_v6 = vpop.f32.mrb[96].mxu1 }
 0x3c7   :  { %v4525_v42 = vadd.f32 %v4524_v6, %v10076_v29  ;;  %v4526_v20 = vpop.f32.mrb[97].mxu1  ;;  %v5002_v26 = vpack.c.b16 %v8327_v40, %v4880_v30 }
 0x3c8   :  { %v4527_v3 = vpop.f32.mrb[98].mxu1 }
 0x3c9   :  { %vm4578_vm4 = vcmp.gt.f32.partialorder %v4525_v42, 0.0  ;;  %v4627_v28 = vmul.f32 0.2, %v4525_v42  ;;  %4985 = vrot.lane.b32.xlu0 %v7229_v16, %s7981_s26  ;;  %5017 = vrot.lane.b32.xlu1 %v5002_v26, %s7977_s14  ;;  %v4528_v10 = vpop.f32.mrb[99].mxu1 }
 0x3ca   :  { %v5014_v52 = vpop.permute.xlu0 %5013 }
 0x3cb   :  { %v4676_v55 = vsel %vm4578_vm4, %v4525_v42, %v4627_v28  ;;  %v5119_v34 = vsel %vm3853_vm10, %v7235_v31, %v5014_v52 }
 0x3cc   :  { %v4729_v29 = vmul.f32 %v10089_v62, %v4676_v55  ;;  %v4938_v62 = vpop.permute.xlu1 %4937 }
 0x3cd   :  { %4961 = vrot.lane.b32.xlu1 %v10854_v17, %s7978_s16 }
 0x3ce   :  { %v4782_v25 = vadd.f32 %v10093_v54, %v4729_v29  ;;  %v5116_v54 = vsel %vm3853_vm10, %v7234_v44, %v5012_v5 }
 0x3d0   :  { %v7237_v51 = vpack.c.bf16 %v4782_v25, %v10839_v46  ;;  %v4980_v33 = vpop.permute.xlu1 %4979  ;;  %v5057_v46 = vsel %vm3853_vm10, %v10675_v24, %v4938_v62  ;;  %v7898_v62 = vld [vmem:[%s11327_s9 + $0x40] sm:$0xff]  }
 0x3d1   :  { %v5091_v15 = vsel %vm4053_vm13, %v5071_v11, %v4980_v33  ;;  %7489 = vmatprep.subr.bf16.mxu0 %v7898_v62  ;;  %v7902_v11 = vld [vmem:[%s11328_s7 + $0x40] sm:$0xff]  }
 0x3d2   :  { %7427 = vmatprep.subr.bf16.mxu1 %v7902_v11 }
 0x3d4   :  { %v4958_v60 = vpop.permute.xlu1 %4957 }
 0x3d5   :  { %v5073_v38 = vsel %vm3951_vm1, %v5057_v46, %v4958_v60  ;;  %v7905_v60 = vld [vmem:[%s11328_s7 + $0x8] sm:$0xff]   ;;  %v7911_v46 = vld [vmem:[%s11327_s9 + $0x10] sm:$0xff]  }
 0x3d8   :  { %v4982_v32 = vpop.permute.xlu1 %4981 }
 0x3d9   :  { %v5094_v6 = vsel %vm4053_vm13, %v5073_v38, %v4982_v32  ;;  %v7907_v32 = vld [vmem:[%s11328_s7 + $0x10] sm:$0xff]  }
 0x3ea   :  { %v7369_v39 = vpop.f32.mrb[100].mxu1 }
 0x3eb   :  { %v7370_v19 = vpop.f32.mrb[101].mxu1 }
 0x3ec   :  { %v10861_v13 = vadd.f32 %v7370_v19, %v7369_v39  ;;  %v7372_v53 = vpop.f32.mrb[102].mxu1 }
 0x3ed   :  { %v7373_v9 = vpop.f32.mrb[103].mxu1 }
 0x3ee   :  { %v10863_v4 = vadd.f32 %v7373_v9, %v7372_v53 }
 0x3f0   :  { %v5040_v45 = vpop.permute.xlu0 %5039  ;;  %v4940_v42 = vpop.permute.xlu1 %4939 }
 0x3f1   :  { %v5060_v31 = vsel %vm3853_vm10, %v10752_v56, %v4940_v42  ;;  %v7914_v42 = vld [vmem:[%s11328_s7 + $0x68] sm:$0xff]  }
 0x3f4   :  { %v5028_v35 = vpop.permute.xlu0 %5027  ;;  %v5044_v8 = vpop.permute.xlu1 %5043 }
 0x3f5   :  { %v5135_v47 = vsel %vm3951_vm1, %v5116_v54, %v5028_v35  ;;  %v7900_v54 = vld [vmem:[%s11327_s9 + $0x48] sm:$0xff]  }
 0x3f6   :  { %v5153_v58 = vsel %vm4053_vm13, %v5135_v47, %v5040_v45  ;;  %v7375_v14 = vpop.f32.mrb[104].mxu1  ;;  %v7899_v45 = vld [vmem:[%s11327_s9] sm:$0xff]   ;;  %v7901_v35 = vld [vmem:[%s11327_s9 + $0x8] sm:$0xff]  }
 0x3f7   :  { %5359 = vmatprep.mubr.bf16.mxu1 %v5153_v58  ;;  %v7376_v63 = vpop.f32.mrb[105].mxu1  ;;  %7490 = vmatpush3.bf16.msra.mxu0 %v7899_v45 }
 0x3f8   :  { %5360 = vmatmul.mubr.bf16.gmra.mrb[116].mxu1 %v5091_v15  ;;  %v10875_v21 = vadd.f32 %v7376_v63, %v7375_v14  ;;  %v7378_v41 = vpop.f32.mrb[106].mxu1  ;;  %7491 = vmatprep.subr.bf16.mxu0 %v7900_v54  ;;  %v7903_v15 = vld [vmem:[%s11328_s7] sm:$0xff]  }
 0x3f9   :  { %v7379_v22 = vpop.f32.mrb[107].mxu1 }
 0x3fa   :  { %v10877_v44 = vadd.f32 %v7379_v22, %v7378_v41  ;;  %v7904_v41 = vld [vmem:[%s11328_s7 + $0x48] sm:$0xff]  }
 0x3fb   :  { %7492 = vmatpush3.bf16.msra.mxu0 %v7901_v35 }
 0x3fc   :  { %7493 = vmatprep.subr.bf16.mxu0 %v7910_v2 }
 0x3ff   :  { %7494 = vmatpush3.bf16.msra.mxu0 %v7911_v46 }
 0x400   :  { %v5030_v43 = vpop.permute.xlu0 %5029 }
 0x401   :  { %v5137_v18 = vsel %vm3951_vm1, %v5119_v34, %v5030_v43  ;;  %v7906_v43 = vld [vmem:[%s11328_s7 + $0x50] sm:$0xff]   ;;  %v7908_v34 = vld [vmem:[%s11328_s7 + $0x58] sm:$0xff]  }
 0x404   :  { %v5042_v16 = vpop.permute.xlu0 %5041 }
 0x405   :  { %v5156_v30 = vsel %vm4053_vm13, %v5137_v18, %v5042_v16  ;;  %v7909_v18 = vld [vmem:[%s11328_s7 + $0x18] sm:$0xff]   ;;  %v7912_v16 = vld [vmem:[%s11328_s7 + $0x60] sm:$0xff]  }
 0x406   :  { %5367 = vmatprep.mubr.bf16.mxu1 %v5156_v30  ;;  %v7913_v30 = vld [vmem:[%s11328_s7 + $0x20] sm:$0xff]  }
 0x407   :  { %5368 = vmatmul.mubr.bf16.gmra.mrb[120].mxu1 %v5094_v6 }
 0x408   :  { %v4960_v20 = vpop.permute.xlu0 %4959 }
 0x409   :  { %v5075_v28 = vsel %vm3951_vm1, %v5060_v31, %v4960_v20 }
 0x42f   :  { %v5016_v26 = vpop.permute.xlu0 %5015 }
 0x430   :  { %v5122_v24 = vsel %vm3853_vm10, %v7236_v12, %v5016_v26 }
 0x431   :  { %v5138_v1 = vsel %vm3951_vm1, %v5122_v24, %v10620_v0 }
 0x432   :  { %v5159_v3 = vsel %vm4053_vm13, %v5138_v1, %v5044_v8  ;;  %v7916_v1 = vld [vmem:[%s11328_s7 + $0x70] sm:$0xff]  }
 0x433   :  { %v4984_v10 = vpop.permute.xlu0 %4983  ;;  %5375 = vmatprep.mubr.bf16.mxu1 %v5159_v3  ;;  %v7917_v3 = vld [vmem:[%s11328_s7 + $0x30] sm:$0xff]  }
 0x434   :  { %v5097_v55 = vsel %vm4053_vm13, %v5075_v28, %v4984_v10  ;;  %v7918_v28 = vld [vmem:[%s11328_s7 + $0x78] sm:$0xff]  }
 0x435   :  { %5376 = vmatmul.mubr.bf16.gmra.mrb[124].mxu1 %v5097_v55  ;;  %v7919_v10 = vld [vmem:[%s11328_s7 + $0x38] sm:$0xff]  }
 0x437   :  { %v4942_v29 = vpop.permute.xlu0 %4941 }
 0x438   :  { %v5063_v56 = vsel %vm3853_vm10, %v10789_v37, %v4942_v29 }
 0x43b   :  { %v5018_v25 = vpop.permute.xlu1 %5017  ;;  %v4986_v5 = vpop.permute.xlu0 %4985 }
 0x43c   :  { %v5125_v23 = vsel %vm3853_vm10, %v7237_v51, %v5018_v25 }
 0x43d   :  { %v5139_v48 = vsel %vm3951_vm1, %v5125_v23, %v10620_v0 }
 0x43e   :  { %v5161_v12 = vsel %vm4053_vm13, %v5139_v48, %v5044_v8  ;;  %v7915_v8 = vld [vmem:[%s11328_s7 + $0x28] sm:$0xff]  }
 0x43f   :  { %5383 = vmatprep.mubr.bf16.mxu1 %v5161_v12  ;;  %v4962_v61 = vpop.permute.xlu1 %4961 }
 0x440   :  { %v5077_v39 = vsel %vm3951_vm1, %v5063_v56, %v4962_v61 }
 0x441   :  { %v5100_v50 = vsel %vm4053_vm13, %v5077_v39, %v4986_v5  ;;  %v4918_v5 = vld [vmem:[%s11329_s6] sm:$0x7] }
 0x442   :  { %5384 = vmatmul.mubr.bf16.gmra.mrb[128].mxu1 %v5100_v50 }
 0x443   :  { %7735 = vmatprep.mubr.msk.bf16.mxu1 %vm3853_vm10, %v10477_v27 }
 0x44a   :  { %7736 = vmatmul.mubr.msk.bf16.vlgmr.msra.gmra.mrb[132].mxu1 %vm3853_vm10, %v10521_v57 }
 0x44b   :  { %7739 = vmatprep.mubr.msk.bf16.mxu1 %vm3853_vm10, %v10654_v59  ;;  %7428 = vmatpush3.bf16.msra.mxu1 %v7903_v15  ;;  %v11381_v15 = vld [vmem:[#allocation5_spill] sm:$0xff] }
 0x44c   :  { %7429 = vmatprep.subr.bf16.mxu1 %v7904_v41 }
 0x44f   :  { %7430 = vmatpush3.bf16.msra.mxu1 %v7905_v60 }
 0x450   :  { %7431 = vmatprep.subr.bf16.mxu1 %v7906_v43 }
 0x452   :  { %7740 = vmatmul.mubr.msk.bf16.gmra.mrb[136].mxu1 %vm3853_vm10, %v10714_v49 }
 0x453   :  { %7743 = vmatprep.mubr.msk.bf16.mxu1 %vm3853_vm10, %v10765_v36  ;;  %7432 = vmatpush3.bf16.msra.mxu1 %v7907_v32 }
 0x454   :  { %7433 = vmatprep.subr.bf16.mxu1 %v7908_v34 }
 0x457   :  { %7434 = vmatpush3.bf16.msra.mxu1 %v7909_v18 }
 0x458   :  { %7435 = vmatprep.subr.bf16.mxu1 %v7912_v16 }
 0x45a   :  { %7744 = vmatmul.mubr.msk.bf16.gmra.mrb[140].mxu1 %vm3853_vm10, %v10854_v17 }
 0x45b   :  { %v7381_v37 = vpop.f32.mrb[108].mxu1  ;;  %7747 = vmatprep.mubr.msk.bf16.mxu1 %vm3853_vm10, %v11369_v7  ;;  %7436 = vmatpush3.bf16.msra.mxu1 %v7913_v30 }
 0x45c   :  { %v7382_v51 = vpop.f32.mrb[109].mxu1  ;;  %7437 = vmatprep.subr.bf16.mxu1 %v7914_v42 }
 0x45d   :  { %v10920_v19 = vadd.f32 %v7382_v51, %v7381_v37  ;;  %v7384_v27 = vpop.f32.mrb[110].mxu1 }
 0x45e   :  { %v7385_v57 = vpop.f32.mrb[111].mxu1 }
 0x45f   :  { %v10924_v52 = vadd.f32 %v7385_v57, %v7384_v27  ;;  %7438 = vmatpush3.bf16.msra.mxu1 %v7915_v8  ;;  %v11379_v27 = vld [vmem:[#allocation3_spill] sm:$0xff] }
 0x460   :  { %7439 = vmatprep.subr.bf16.mxu1 %v7916_v1  ;;  %v11018_v57 = vrot.slane %v4918_v5, %v11379_v27 }
 0x462   :  { %7748 = vmatmul.mubr.msk.bf16.gmra.mrb[144].mxu1 %vm3853_vm10, %v11369_v7  ;;  %v5341_v45 = vadd.f32 %v10877_v44, %v11018_v57  ;;  %v5346_v16 = vadd.f32 %v10920_v19, %v11018_v57  ;;  %v5349_v8 = vadd.f32 %v10924_v52, %v11018_v57 }
 0x463   :  { %7440 = vmatpush3.bf16.msra.mxu1 %v7917_v3 }
 0x464   :  { %7441 = vmatprep.subr.bf16.mxu1 %v7918_v28 }
 0x467   :  { %7442 = vmatpush3.bf16.msra.mxu1 %v7919_v10 }
 0x469   :  { %v7387_v59 = vpop.f32.mrb[112].mxu1 }
 0x46a   :  { %v7388_v49 = vpop.f32.mrb[113].mxu1 }
 0x46b   :  { %v10928_v36 = vadd.f32 %v7388_v49, %v7387_v59  ;;  %v7390_v53 = vpop.f32.mrb[114].mxu1  ;;  %v5338_v59 = vadd.f32 %v10875_v21, %v11018_v57 }
 0x46c   :  { %v7391_v9 = vpop.f32.mrb[115].mxu1 }
 0x46d   :  { %v10930_v17 = vadd.f32 %v7391_v9, %v7390_v53  ;;  %v5330_v53 = vadd.f32 %v10861_v13, %v11018_v57  ;;  %v5354_v18 = vadd.f32 %v10928_v36, %v11018_v57 }
 0x46f   :  { %v5357_v19 = vadd.f32 %v10930_v17, %v11018_v57 }
 0x4cb   :  { %v7393_v33 = vpop.f32.mrb[116].mxu1 }
 0x4cc   :  { %v7394_v47 = vpop.f32.mrb[117].mxu1 }
 0x4cd   :  { %v10950_v58 = vadd.f32 %v7394_v47, %v7393_v33  ;;  %v7396_v14 = vpop.f32.mrb[118].mxu1  ;;  %v11380_v33 = vld [vmem:[#allocation4_spill] sm:$0xff]  ;;  %v5333_v47 = vadd.f32 %v10863_v4, %v11018_v57 }
 0x4ce   :  { %v7397_v63 = vpop.f32.mrb[119].mxu1  ;;  %v11027_v54 = vrot.slane %v4918_v5, %v11380_v33 }
 0x4cf   :  { %v10958_v22 = vadd.f32 %v7397_v63, %v7396_v14  ;;  %v11032_v63 = vrot.slane %v4918_v5, %v11381_v15  ;;  %v5362_v3 = vadd.f32 %v10950_v58, %v11018_v57 }
 0x4da   :  { %v7399_v38 = vpop.f32.mrb[120].mxu1 }
 0x4db   :  { %v7400_v6 = vpop.f32.mrb[121].mxu1 }
 0x4dc   :  { %v10987_v20 = vadd.f32 %v7400_v6, %v7399_v38  ;;  %v7402_v26 = vpop.f32.mrb[122].mxu1  ;;  %v7920_v38 = vld [vmem:[%s11328_s7 + $0xc0] sm:$0xff]  }
 0x4dd   :  { %v7403_v24 = vpop.f32.mrb[123].mxu1  ;;  %7455 = vmatprep.subr.bf16.mxu1 %v7920_v38 }
 0x4de   :  { %v10995_v31 = vadd.f32 %v7403_v24, %v7402_v26  ;;  %v5370_v52 = vadd.f32 %v10987_v20, %v11018_v57 }
 0x4e0   :  { %v5373_v5 = vadd.f32 %v10995_v31, %v11018_v57 }
 0x508   :  { %v7405_v55 = vpop.f32.mrb[124].mxu1 }
 0x509   :  { %v7406_v29 = vpop.f32.mrb[125].mxu1 }
 0x50a   :  { %v11006_v25 = vadd.f32 %v7406_v29, %v7405_v55  ;;  %v7408_v23 = vpop.f32.mrb[126].mxu1 }
 0x50b   :  { %v7409_v48 = vpop.f32.mrb[127].mxu1 }
 0x50c   :  { %v11008_v12 = vadd.f32 %v7409_v48, %v7408_v23 }
 0x515   :  { %v7411_v56 = vpop.f32.mrb[128].mxu1 }
 0x516   :  { %v7412_v61 = vpop.f32.mrb[129].mxu1 }
 0x517   :  { %v11013_v39 = vadd.f32 %v7412_v61, %v7411_v56  ;;  %v7414_v50 = vpop.f32.mrb[130].mxu1 }
 0x518   :  { %v7415_v37 = vpop.f32.mrb[131].mxu1 }
 0x519   :  { %v11015_v51 = vadd.f32 %v7415_v37, %v7414_v50 }
 0x51d   :  { %v7737_v49 = vpop.f32.mrb[132].mxu1 }
 0x51e   :  { %v5435_v9 = vadd.f32 %v7737_v49, %v5338_v59  ;;  %v5426_v62 = vpop.f32.mrb[133].mxu1 }
 0x51f   :  { %v5427_v35 = vadd.f32 %v5426_v62, %v5330_v53  ;;  %v7738_v2 = vpop.f32.mrb[134].mxu1 }
 0x520   :  { %vm5491_vm10 = vcmp.gt.f32.partialorder %v5435_v9, 0.0  ;;  %v5507_v11 = vmul.f32 0.2, %v5435_v9  ;;  %v5438_v21 = vadd.f32 %v7738_v2, %v5341_v45  ;;  %v5429_v14 = vpop.f32.mrb[135].mxu1 }
 0x521   :  { %vm5489_vm13 = vcmp.gt.f32.partialorder %v5427_v35, 0.0  ;;  %v5505_v13 = vmul.f32 0.2, %v5427_v35  ;;  %v5430_v41 = vadd.f32 %v5429_v14, %v5333_v47 }
 0x522   :  { %v5523_v60 = vsel %vm5491_vm10, %v5435_v9, %v5507_v11  ;;  %vm5492_vm15 = vcmp.gt.f32.partialorder %v5438_v21, 0.0  ;;  %v5508_v44 = vmul.f32 0.2, %v5438_v21 }
 0x523   :  { %v5543_v43 = vmul.f32 %v11027_v54, %v5523_v60  ;;  %v5521_v32 = vsel %vm5489_vm13, %v5427_v35, %v5505_v13  ;;  %vm5490_vm11 = vcmp.gt.f32.partialorder %v5430_v41, 0.0  ;;  %v5506_v34 = vmul.f32 0.2, %v5430_v41 }
 0x524   :  { %v5541_v4 = vmul.f32 %v11027_v54, %v5521_v32  ;;  %v5524_v46 = vsel %vm5492_vm15, %v5438_v21, %v5508_v44 }
 0x525   :  { %v11044_v30 = vadd.f32 %v11032_v63, %v5543_v43  ;;  %v5544_v6 = vmul.f32 %v11027_v54, %v5524_v46  ;;  %v5522_v42 = vsel %vm5490_vm11, %v5430_v41, %v5506_v34  ;;  %v7741_v26 = vpop.f32.mrb[136].mxu1 }
 0x526   :  { %v5542_v24 = vmul.f32 %v11027_v54, %v5522_v42  ;;  %v5451_v36 = vadd.f32 %v7741_v26, %v5354_v18  ;;  %v5442_v1 = vpop.f32.mrb[137].mxu1  ;;  %v11055_v28 = vadd.f32 %v11032_v63, %v5541_v4  ;;  %v5365_v4 = vadd.f32 %v10958_v22, %v11018_v57 }
 0x527   :  { %v11058_v10 = vadd.f32 %v11032_v63, %v5544_v6  ;;  %v5443_v55 = vadd.f32 %v5442_v1, %v5346_v16  ;;  %v7742_v29 = vpop.f32.mrb[138].mxu1 }
 0x528   :  { %v11063_v23 = vadd.f32 %v11032_v63, %v5542_v24  ;;  %vm5495_vm14 = vcmp.gt.f32.partialorder %v5451_v36, 0.0  ;;  %v5511_v17 = vmul.f32 0.2, %v5451_v36  ;;  %v5454_v48 = vadd.f32 %v7742_v29, %v5357_v19  ;;  %v5445_v56 = vpop.f32.mrb[139].mxu1 }
 0x529   :  { %vm5493_vm0 = vcmp.gt.f32.partialorder %v5443_v55, 0.0  ;;  %v5509_v58 = vmul.f32 0.2, %v5443_v55  ;;  %v5446_v61 = vadd.f32 %v5445_v56, %v5349_v8  ;;  %v7244_v21 = vpack.c.bf16 %v11044_v30, %v11055_v28 }
 0x52a   :  { %v5527_v50 = vsel %vm5495_vm14, %v5451_v36, %v5511_v17  ;;  %vm5496_vm3 = vcmp.gt.f32.partialorder %v5454_v48, 0.0  ;;  %v5512_v37 = vmul.f32 0.2, %v5454_v48  ;;  %v5577_v59 = vpack.c.bf16 %v11063_v23, %v11055_v28  ;;  %v7948_v28 = vld [vmem:[%s11327_s9 + $0x78] sm:$0xff]  }
 0x52b   :  { %v5547_v20 = vmul.f32 %v11027_v54, %v5527_v50  ;;  %v5525_v49 = vsel %vm5493_vm0, %v5443_v55, %v5509_v58  ;;  %vm5494_vm5 = vcmp.gt.f32.partialorder %v5446_v61, 0.0  ;;  %v5510_v53 = vmul.f32 0.2, %v5446_v61 }
 0x52c   :  { %v5545_v9 = vmul.f32 %v11027_v54, %v5525_v49  ;;  %v5528_v62 = vsel %vm5496_vm3, %v5454_v48, %v5512_v37  ;;  %v5594_v45 = vunpack.c.h.b16 %v5577_v59  ;;  %v7246_v35 = vpack.c.bf16 %v11058_v10, %v11063_v23  ;;  %v7944_v10 = vld [vmem:[%s11327_s9 + $0x68] sm:$0xff]  }
 0x52d   :  { %v5567_v31 = vadd.f32 %v11032_v63, %v5547_v20  ;;  %v5548_v2 = vmul.f32 %v11027_v54, %v5528_v62  ;;  %v5526_v47 = vsel %vm5494_vm5, %v5446_v61, %v5510_v53  ;;  %v7745_v11 = vpop.f32.mrb[140].mxu1  ;;  %v5386_v29 = vadd.f32 %v11013_v39, %v11018_v57  ;;  %v7945_v23 = vld [vmem:[%s11327_s9 + $0x28] sm:$0xff]  }
 0x52e   :  { %v11078_v14 = vadd.f32 %v11032_v63, %v5545_v9  ;;  %v5546_v13 = vmul.f32 %v11027_v54, %v5526_v47  ;;  %v5467_v41 = vadd.f32 %v7745_v11, %v5370_v52  ;;  %v5458_v60 = vpop.f32.mrb[141].mxu1  ;;  %v5687_v44 = vpack.c.b16 %v5594_v45, %v8327_v40 }
 0x52f   :  { %v5568_v43 = vadd.f32 %v11032_v63, %v5548_v2  ;;  %v5459_v32 = vadd.f32 %v5458_v60, %v5362_v3  ;;  %v7746_v34 = vpop.f32.mrb[142].mxu1  ;;  %v5378_v61 = vadd.f32 %v11006_v25, %v11018_v57  ;;  %v5389_v39 = vadd.f32 %v11015_v51, %v11018_v57 }
 0x530   :  { %v11086_v46 = vadd.f32 %v11032_v63, %v5546_v13  ;;  %vm5499_vm7 = vcmp.gt.f32.partialorder %v5467_v41, 0.0  ;;  %v5515_v18 = vmul.f32 0.2, %v5467_v41  ;;  %v5470_v16 = vadd.f32 %v7746_v34, %v5373_v5  ;;  %v5461_v38 = vpop.f32.mrb[143].mxu1  ;;  %5689 = vrot.lane.b32.xlu1 %v5687_v44, %s7978_s16 }
 0x531   :  { %vm5497_vm8 = vcmp.gt.f32.partialorder %v5459_v32, 0.0  ;;  %v5513_v6 = vmul.f32 0.2, %v5459_v32  ;;  %v5462_v42 = vadd.f32 %v5461_v38, %v5365_v4  ;;  %v7242_v26 = vpack.c.bf16 %v5567_v31, %v11078_v14 }
 0x532   :  { %v5531_v8 = vsel %vm5499_vm7, %v5467_v41, %v5515_v18  ;;  %vm5500_vm2 = vcmp.gt.f32.partialorder %v5470_v16, 0.0  ;;  %v5516_v24 = vmul.f32 0.2, %v5470_v16  ;;  %v11091_v36 = vpack.c.bf16 %v5568_v43, %v11086_v46 }
 0x533   :  { %v5551_v22 = vmul.f32 %v11027_v54, %v5531_v8  ;;  %v5529_v1 = vsel %vm5497_vm8, %v5459_v32, %v5513_v6  ;;  %vm5498_vm9 = vcmp.gt.f32.partialorder %v5462_v42, 0.0  ;;  %v5514_v19 = vmul.f32 0.2, %v5462_v42 }
 0x534   :  { %v5549_v3 = vmul.f32 %v11027_v54, %v5529_v1  ;;  %v5532_v55 = vsel %vm5500_vm2, %v5470_v16, %v5516_v24  ;;  %5684 = vrot.lane.b32.xlu1 %v7242_v26, %s7978_s16  ;;  %v5579_v52 = vpack.c.bf16 %v11086_v46, %v11078_v14  ;;  %v5381_v9 = vadd.f32 %v11008_v12, %v11018_v57  ;;  %v7937_v1 = vld [vmem:[%s11327_s9 + $0x18] sm:$0xff]   ;;  %v7930_v14 = vld [vmem:[%s11328_s7 + $0xe8] sm:$0xff]  }
 0x535   :  { %v11101_v17 = vadd.f32 %v11032_v63, %v5551_v22  ;;  %v5552_v48 = vmul.f32 %v11027_v54, %v5532_v55  ;;  %v5530_v56 = vsel %vm5498_vm9, %v5462_v42, %v5514_v19  ;;  %v7749_v58 = vpop.f32.mrb[144].mxu1  ;;  %v7942_v19 = vld [vmem:[%s11327_s9 + $0x60] sm:$0xff]   ;;  %v7947_v55 = vld [vmem:[%s11327_s9 + $0x30] sm:$0xff]   ;;  %vm6502_vm14 = vcmask 7168  }
 0x536   :  { %v5550_v5 = vmul.f32 %v11027_v54, %v5530_v56  ;;  %v5483_v50 = vadd.f32 %v7749_v58, %v5386_v29  ;;  %v5474_v37 = vpop.f32.mrb[145].mxu1  ;;  %v11110_v59 = vadd.f32 %v11032_v63, %v5549_v3  ;;  %v7943_v3 = vld [vmem:[%s11327_s9 + $0x20] sm:$0xff]   ;;  %v7922_v58 = vld [vmem:[%s11328_s7 + $0xc8] sm:$0xff]   ;;  %vm6504_vm0 = vcmask 15360  }
 0x537   :  { %v5572_v20 = vadd.f32 %v11032_v63, %v5552_v48  ;;  %v5475_v49 = vadd.f32 %v5474_v37, %v5378_v61  ;;  %v7750_v53 = vpop.f32.mrb[146].mxu1  ;;  %v7921_v48 = vld [vmem:[%s11328_s7 + $0x80] sm:$0xff]   ;;  %v5706_v61 = vsel %vm3951_vm1, %v11369_v7, %v10620_v0  ;;  %v7925_v37 = vld [vmem:[%s11328_s7 + $0x90] sm:$0xff]   ;;  %v7927_v0 = vld [vmem:[%s11328_s7 + $0x98] sm:$0xff]  }
 0x538   :  { %v5570_v62 = vadd.f32 %v11032_v63, %v5550_v5  ;;  %vm5503_vm6 = vcmp.gt.f32.partialorder %v5483_v50, 0.0  ;;  %v5519_v25 = vmul.f32 0.2, %v5483_v50  ;;  %v5486_v45 = vadd.f32 %v7750_v53, %v5389_v39  ;;  %v5477_v31 = vpop.f32.mrb[147].mxu1  ;;  %v7923_v5 = vld [vmem:[%s11328_s7 + $0x88] sm:$0xff]  }
 0x539   :  { %vm5501_vm12 = vcmp.gt.f32.partialorder %v5475_v49, 0.0  ;;  %v5517_v2 = vmul.f32 0.2, %v5475_v49  ;;  %v5478_v47 = vadd.f32 %v5477_v31, %v5381_v9  ;;  %v7245_v16 = vpack.c.bf16 %v11101_v17, %v11110_v59  ;;  %v7933_v31 = vld [vmem:[%s11328_s7 + $0xb0] sm:$0xff]   ;;  %v7951_v17 = vld [vmem:[%s11327_s9 + $0x80] sm:$0xff]  }
 0x53a   :  { %v5535_v51 = vsel %vm5503_vm6, %v5483_v50, %v5519_v25  ;;  %vm5504_vm4 = vcmp.gt.f32.partialorder %v5486_v45, 0.0  ;;  %v5520_v11 = vmul.f32 0.2, %v5486_v45  ;;  %v5581_v13 = vpack.c.bf16 %v5570_v62, %v11110_v59  ;;  %v7924_v50 = vld [vmem:[%s11328_s7 + $0xd0] sm:$0xff]   ;;  %v7952_v59 = vld [vmem:[%s11327_s9 + $0xc8] sm:$0xff]  }
 0x53b   :  { %v5555_v41 = vmul.f32 %v11027_v54, %v5535_v51  ;;  %v5533_v60 = vsel %vm5501_vm12, %v5475_v49, %v5517_v2  ;;  %vm5502_vm10 = vcmp.gt.f32.partialorder %v5478_v47, 0.0  ;;  %v5518_v44 = vmul.f32 0.2, %v5478_v47  ;;  %v7934_v2 = vld [vmem:[%s11328_s7 + $0xf8] sm:$0xff]   ;;  %v7938_v51 = vld [vmem:[%s11328_s7 + $0x100] sm:$0xff]  }
 0x53c   :  { %v5553_v12 = vmul.f32 %v11027_v54, %v5533_v60  ;;  %v5536_v57 = vsel %vm5504_vm4, %v5486_v45, %v5520_v11  ;;  %v5602_v43 = vunpack.c.h.b16 %v5581_v13  ;;  %v7247_v32 = vpack.c.bf16 %v5572_v20, %v5570_v62  ;;  %v7928_v20 = vld [vmem:[%s11328_s7 + $0xe0] sm:$0xff]   ;;  %v7932_v45 = vld [vmem:[%s11328_s7 + $0xf0] sm:$0xff]  }
 0x53d   :  { %v5575_v34 = vadd.f32 %v11032_v63, %v5555_v41  ;;  %v5556_v4 = vmul.f32 %v11027_v54, %v5536_v57  ;;  %v5534_v18 = vsel %vm5502_vm10, %v5478_v47, %v5518_v44  ;;  %v5598_v39 = vunpack.c.h.b16 %v5579_v52  ;;  %v7929_v62 = vld [vmem:[%s11328_s7 + $0xa0] sm:$0xff]   ;;  %v7931_v52 = vld [vmem:[%s11328_s7 + $0xa8] sm:$0xff]   ;;  %v7935_v47 = vld [vmem:[%s11328_s7 + $0xb8] sm:$0xff]  }
 0x53e   :  { %v11124_v38 = vadd.f32 %v11032_v63, %v5553_v12  ;;  %v5554_v6 = vmul.f32 %v11027_v54, %v5534_v18  ;;  %v5688_v42 = vpack.c.b16 %v5602_v43, %v8327_v40  ;;  %v7936_v54 = vld [vmem:[%s11327_s9 + $0x58] sm:$0xff]   ;;  %v7939_v44 = vld [vmem:[%s11328_s7 + $0x108] sm:$0xff]   ;;  %v7940_v43 = vld [vmem:[%s11328_s7 + $0x110] sm:$0xff]  }
 0x53f   :  { %v11129_v26 = vadd.f32 %v11032_v63, %v5556_v4  ;;  %7495 = vmatprep.subr.bf16.mxu0 %v7936_v54  ;;  %v5682_v9 = vpack.c.b16 %v5598_v39, %v8327_v40  ;;  %v7954_v4 = vld [vmem:[%s11327_s9 + $0xd0] sm:$0xff]   ;;  %v7964_v54 = vld [vmem:[%s11327_s9 + $0xf8] sm:$0xff]  }
 0x540   :  { %v11132_v8 = vadd.f32 %v11032_v63, %v5554_v6  ;;  %5691 = vrot.lane.b32.xlu0 %v5688_v42, %s7978_s16  ;;  %v7248_v24 = vpack.c.bf16 %v5575_v34, %v11124_v38  ;;  %7496 = vmatpush3.bf16.msra.mxu0 %v7937_v1  ;;  %v7953_v34 = vld [vmem:[%s11327_s9 + $0x88] sm:$0xff]   ;;  %v7955_v18 = vld [vmem:[%s11327_s9 + $0x90] sm:$0xff]   ;;  %v7958_v6 = vld [vmem:[%s11327_s9 + $0xe0] sm:$0xff]  }
 0x541   :  { %7497 = vmatprep.subr.bf16.mxu0 %v7942_v19  ;;  %v7959_v42 = vld [vmem:[%s11327_s9 + $0xa0] sm:$0xff]   ;;  %v7965_v1 = vld [vmem:[%s11327_s9 + $0xb8] sm:$0xff]  }
 0x542   :  { %v7249_v22 = vpack.c.bf16 %v11129_v26, %v11132_v8  ;;  %5703 = vrot.lane.b32.xlu1 %v7248_v24, %s7978_s16  ;;  %v5583_v63 = vpack.c.bf16 %v11132_v8, %v11124_v38  ;;  %v7957_v38 = vld [vmem:[%s11327_s9 + $0x98] sm:$0xff]   ;;  %v7960_v26 = vld [vmem:[%s11327_s9 + $0xe8] sm:$0xff]   ;;  %v7962_v24 = vld [vmem:[%s11327_s9 + $0xf0] sm:$0xff]  }
 0x543   :  { %v7961_v8 = vld [vmem:[%s11327_s9 + $0xa8] sm:$0xff]  }
 0x544   :  { %5697 = vrot.lane.b32.xlu0 %v7246_v35, %s7978_s16  ;;  %7498 = vmatpush3.bf16.msra.mxu0 %v7943_v3  ;;  %v7946_v35 = vld [vmem:[%s11327_s9 + $0x70] sm:$0xff]   ;;  %v5606_v11 = vunpack.c.h.b16 %v5583_v63 }
 0x545   :  { %7499 = vmatprep.subr.bf16.mxu0 %v7944_v10 }
 0x546   :  { %v5701_v60 = vpack.c.b16 %v5606_v11, %v8327_v40 }
 0x548   :  { %5699 = vrot.lane.b32.xlu0 %v7247_v32, %s7978_s16  ;;  %7500 = vmatpush3.bf16.msra.mxu0 %v7945_v23  ;;  %v7941_v32 = vld [vmem:[%s11328_s7 + $0x118] sm:$0xff]  }
 0x549   :  { %7501 = vmatprep.subr.bf16.mxu0 %v7946_v35 }
 0x54c   :  { %7502 = vmatpush3.bf16.msra.mxu0 %v7947_v55 }
 0x54d   :  { %7503 = vmatprep.subr.bf16.mxu0 %v7948_v28 }
 0x5a2   :  { %v5690_v29 = vpop.permute.xlu1 %5689 }
 0x5a3   :  { %v5713_v56 = vsel %vm3951_vm1, %v11369_v7, %v5690_v29  ;;  %v7926_v7 = vld [vmem:[%s11328_s7 + $0xd8] sm:$0xff]  }
 0x5a4   :  { %5988 = vmatprep.mubr.bf16.mxu1 %v5713_v56 }
 0x5a5   :  { %5989 = vmatmul.mubr.bf16.vlgmr.msra.gmra.mrb[148].mxu1 %v5706_v61 }
 0x5a6   :  { %7456 = vmatpush3.bf16.msra.mxu1 %v7921_v48  ;;  %v5685_v49 = vpop.permute.xlu1 %5684 }
 0x5a7   :  { %7457 = vmatprep.subr.bf16.mxu1 %v7922_v58  ;;  %v5710_v46 = vsel %vm3951_vm1, %v5682_v9, %v5685_v49 }
 0x5aa   :  { %7458 = vmatpush3.bf16.msra.mxu1 %v7923_v5  ;;  %v5681_v5 = vld [vmem:[%s11330_s8] sm:$0x7] }
 0x5ab   :  { %7459 = vmatprep.subr.bf16.mxu1 %v7924_v50  ;;  %v5734_v50 = vrot.slane %v5681_v5, %v11379_v27 }
 0x5ae   :  { %7460 = vmatpush3.bf16.msra.mxu1 %v7925_v37 }
 0x5af   :  { %7461 = vmatprep.subr.bf16.mxu1 %v7926_v7 }
 0x5b2   :  { %7462 = vmatpush3.bf16.msra.mxu1 %v7927_v0  ;;  %v5692_v53 = vpop.permute.xlu0 %5691 }
 0x5b3   :  { %v5717_v25 = vsel %vm3951_vm1, %v11091_v36, %v5692_v53  ;;  %7463 = vmatprep.subr.bf16.mxu1 %v7928_v20 }
 0x5b4   :  { %5996 = vmatprep.mubr.bf16.mxu1 %v5717_v25  ;;  %v5704_v41 = vpop.permute.xlu1 %5703 }
 0x5b5   :  { %5997 = vmatmul.mubr.bf16.gmra.mrb[152].mxu1 %v5710_v46  ;;  %v5729_v57 = vsel %vm3951_vm1, %v5701_v60, %v5704_v41 }
 0x5b6   :  { %7464 = vmatpush3.bf16.msra.mxu1 %v7929_v62  ;;  %6037 = vmatprep.mubr.bf16.mxu1 %v5710_v46  ;;  %v5698_v13 = vpop.permute.xlu0 %5697 }
 0x5b7   :  { %7465 = vmatprep.subr.bf16.mxu1 %v7930_v14  ;;  %v5721_v12 = vsel %vm3951_vm1, %v7244_v21, %v5698_v13  ;;  %v7949_v21 = vld [vmem:[%s11327_s9 + $0x38] sm:$0xff]  }
 0x5b8   :  { %7504 = vmatpush3.bf16.msra.mxu0 %v7949_v21 }
 0x5ba   :  { %7466 = vmatpush3.bf16.msra.mxu1 %v7931_v52  ;;  %v5700_v40 = vpop.permute.xlu0 %5699 }
 0x5bb   :  { %7467 = vmatprep.subr.bf16.mxu1 %v7932_v45  ;;  %v5725_v30 = vsel %vm3951_vm1, %v7245_v16, %v5700_v40  ;;  %v7956_v16 = vld [vmem:[%s11327_s9 + $0xd8] sm:$0xff]  }
 0x5be   :  { %7468 = vmatpush3.bf16.msra.mxu1 %v7933_v31 }
 0x5bf   :  { %7469 = vmatprep.subr.bf16.mxu1 %v7934_v2 }
 0x5c2   :  { %7470 = vmatpush3.bf16.msra.mxu1 %v7935_v47 }
 0x5c3   :  { %7751 = vmatprep.subr.bf16.mxu1 %v7938_v51 }
 0x5c5   :  { %6038 = vmatmul.mubr.bf16.vlgmr.msra.gmra.mrb[156].mxu1 %v5721_v12 }
 0x5c6   :  { %6045 = vmatprep.mubr.bf16.mxu1 %v5729_v57  ;;  %7752 = vmatpush3.bf16.msra.mxu1 %v7938_v51 }
 0x5c7   :  { %7753 = vmatprep.subr.bf16.mxu1 %v7939_v44 }
 0x5ca   :  { %7754 = vmatpush3.bf16.msra.mxu1 %v7939_v44  ;;  %v6118_v44 = vrot.slane %v5681_v5, %v11380_v33 }
 0x5cb   :  { %7755 = vmatprep.subr.bf16.mxu1 %v7940_v43 }
 0x5cd   :  { %6046 = vmatmul.mubr.bf16.gmra.mrb[160].mxu1 %v5725_v30 }
 0x5ce   :  { %7756 = vmatpush3.bf16.msra.mxu1 %v7940_v43  ;;  %7759 = vmatprep.mubr.msk.bf16.mxu1 %vm3951_vm1, %v11091_v36  ;;  %v7950_v36 = vld [vmem:[%s11327_s9 + $0xc0] sm:$0xff]  }
 0x5cf   :  { %7757 = vmatprep.subr.bf16.mxu1 %v7941_v32 }
 0x5d2   :  { %7758 = vmatpush3.bf16.msra.mxu1 %v7941_v32 }
 0x5d3   :  { %7511 = vmatprep.subr.bf16.mxu1 %v7950_v36  ;;  %v6126_v36 = vrot.slane %v5681_v5, %v11381_v15 }
 0x5d5   :  { %7760 = vmatmul.mubr.msk.bf16.vlgmr.msra.gmra.mrb[164].mxu1 %vm3951_vm1, %v7249_v22  ;;  %v7963_v22 = vld [vmem:[%s11327_s9 + $0xb0] sm:$0xff]  }
 0x5d6   :  { %7512 = vmatpush3.bf16.msra.mxu1 %v7951_v17 }
 0x5d7   :  { %7513 = vmatprep.subr.bf16.mxu1 %v7952_v59 }
 0x5da   :  { %7514 = vmatpush3.bf16.msra.mxu1 %v7953_v34 }
 0x5db   :  { %7515 = vmatprep.subr.bf16.mxu1 %v7954_v4 }
 0x5de   :  { %7516 = vmatpush3.bf16.msra.mxu1 %v7955_v18 }
 0x5df   :  { %7517 = vmatprep.subr.bf16.mxu1 %v7956_v16 }
 0x5e2   :  { %7518 = vmatpush3.bf16.msra.mxu1 %v7957_v38 }
 0x5e3   :  { %7519 = vmatprep.subr.bf16.mxu1 %v7958_v6 }
 0x5e6   :  { %7520 = vmatpush3.bf16.msra.mxu1 %v7959_v42 }
 0x5e7   :  { %7521 = vmatprep.subr.bf16.mxu1 %v7960_v26 }
 0x5ea   :  { %7522 = vmatpush3.bf16.msra.mxu1 %v7961_v8 }
 0x5eb   :  { %7523 = vmatprep.subr.bf16.mxu1 %v7962_v24 }
 0x5ee   :  { %7524 = vmatpush3.bf16.msra.mxu1 %v7963_v22 }
 0x5ef   :  { %7525 = vmatprep.subr.bf16.mxu1 %v7964_v54 }
 0x5f2   :  { %7526 = vmatpush3.bf16.msra.mxu1 %v7965_v1 }
 0x678   :  { %v7443_v63 = vpop.f32.mrb[148].mxu1 }
 0x679   :  { %v7444_v19 = vpop.f32.mrb[149].mxu1 }
 0x67a   :  { %v7445_v3 = vadd.f32 %v7444_v19, %v7443_v63  ;;  %v7446_v10 = vpop.f32.mrb[150].mxu1 }
 0x67b   :  { %v7447_v23 = vpop.f32.mrb[151].mxu1 }
 0x67c   :  { %v7448_v35 = vadd.f32 %v7447_v23, %v7446_v10  ;;  %v5991_v0 = vadd.f32 %v7445_v3, %v5734_v50  ;;  %v7017_v23 = vld [vmem:[%s11331_s10] ss:$0 sm:$0xff] }
 0x67e   :  { %v5994_v53 = vadd.f32 %v7448_v35, %v5734_v50 }
 0x688   :  { %v7449_v55 = vpop.f32.mrb[152].mxu1 }
 0x689   :  { %v7450_v29 = vpop.f32.mrb[153].mxu1 }
 0x68a   :  { %v7451_v48 = vadd.f32 %v7450_v29, %v7449_v55  ;;  %v7452_v56 = vpop.f32.mrb[154].mxu1 }
 0x68b   :  { %v7453_v58 = vpop.f32.mrb[155].mxu1 }
 0x68c   :  { %v7454_v61 = vadd.f32 %v7453_v58, %v7452_v56  ;;  %v5999_v52 = vadd.f32 %v7451_v48, %v5734_v50 }
 0x68e   :  { %v6002_v47 = vadd.f32 %v7454_v61, %v5734_v50 }
 0x698   :  { %v7471_v37 = vpop.f32.mrb[156].mxu1 }
 0x699   :  { %v7472_v7 = vpop.f32.mrb[157].mxu1 }
 0x69a   :  { %v7473_v39 = vadd.f32 %v7472_v7, %v7471_v37  ;;  %v7474_v20 = vpop.f32.mrb[158].mxu1 }
 0x69b   :  { %v7475_v49 = vpop.f32.mrb[159].mxu1 }
 0x69c   :  { %v7476_v9 = vadd.f32 %v7475_v49, %v7474_v20  ;;  %v6040_v62 = vadd.f32 %v7473_v39, %v5991_v0 }
 0x69e   :  { %v6043_v25 = vadd.f32 %v7476_v9, %v5994_v53 }
 0x6a0   :  { %v7477_v14 = vpop.f32.mrb[160].mxu1 }
 0x6a1   :  { %v7478_v46 = vpop.f32.mrb[161].mxu1 }
 0x6a2   :  { %v7479_v45 = vadd.f32 %v7478_v46, %v7477_v14  ;;  %v7480_v31 = vpop.f32.mrb[162].mxu1 }
 0x6a3   :  { %v7481_v2 = vpop.f32.mrb[163].mxu1 }
 0x6a4   :  { %v7482_v51 = vadd.f32 %v7481_v2, %v7480_v31  ;;  %v6048_v11 = vadd.f32 %v7479_v45, %v5999_v52 }
 0x6a6   :  { %v6051_v27 = vadd.f32 %v7482_v51, %v6002_v47 }
 0x6a8   :  { %v7761_v13 = vpop.f32.mrb[164].mxu1 }
 0x6a9   :  { %v6097_v41 = vadd.f32 %v7761_v13, %v6048_v11  ;;  %v6088_v60 = vpop.f32.mrb[165].mxu1 }
 0x6aa   :  { %v6089_v12 = vadd.f32 %v6088_v60, %v6040_v62  ;;  %v7762_v57 = vpop.f32.mrb[166].mxu1 }
 0x6ab   :  { %vm6105_vm1 = vcmp.gt.f32.partialorder %v6097_v41, 0.0  ;;  %v6109_v43 = vmul.f32 0.2, %v6097_v41  ;;  %v6100_v40 = vadd.f32 %v7762_v57, %v6051_v27  ;;  %v6091_v32 = vpop.f32.mrb[167].mxu1 }
 0x6ac   :  { %vm6103_vm13 = vcmp.gt.f32.partialorder %v6089_v12, 0.0  ;;  %v6107_v30 = vmul.f32 0.2, %v6089_v12  ;;  %v6092_v28 = vadd.f32 %v6091_v32, %v6043_v25 }
 0x6ad   :  { %v6113_v21 = vsel %vm6105_vm1, %v6097_v41, %v6109_v43  ;;  %vm6106_vm15 = vcmp.gt.f32.partialorder %v6100_v40, 0.0  ;;  %v6110_v17 = vmul.f32 0.2, %v6100_v40 }
 0x6ae   :  { %v6121_v59 = vmul.f32 %v6118_v44, %v6113_v21  ;;  %v6111_v34 = vsel %vm6103_vm13, %v6089_v12, %v6107_v30  ;;  %vm6104_vm11 = vcmp.gt.f32.partialorder %v6092_v28, 0.0  ;;  %v6108_v4 = vmul.f32 0.2, %v6092_v28 }
 0x6af   :  { %v6119_v18 = vmul.f32 %v6118_v44, %v6111_v34  ;;  %v6114_v33 = vsel %vm6106_vm15, %v6100_v40, %v6110_v17 }
 0x6b0   :  { %v6122_v16 = vmul.f32 %v6118_v44, %v6114_v33  ;;  %v6112_v38 = vsel %vm6104_vm11, %v6092_v28, %v6108_v4  ;;  %v6129_v42 = vadd.f32 %v6126_v36, %v6121_v59 }
 0x6b1   :  { %v6120_v6 = vmul.f32 %v6118_v44, %v6112_v38  ;;  %v6127_v26 = vadd.f32 %v6126_v36, %v6119_v18 }
 0x6b2   :  { %v6130_v8 = vadd.f32 %v6126_v36, %v6122_v16  ;;  %v7252_v1 = vpack.c.bf16 %v6129_v42, %v6129_v42 }
 0x6b3   :  { %v6128_v24 = vadd.f32 %v6126_v36, %v6120_v6  ;;  %v7250_v63 = vpack.c.bf16 %v6127_v26, %v6127_v26 }
 0x6b4   :  { %v7253_v22 = vpack.c.bf16 %v6130_v8, %v6130_v8 }
 0x6b5   :  { %v7251_v54 = vpack.c.bf16 %v6128_v24, %v6128_v24 }
 0x6b6   :  { %6482 = vmatprep.mubr.bf16.mxu1 %v7253_v22 }
 0x6b7   :  { %6442 = vmatprep.mubr.bf16.mxu0 %v7251_v54  ;;  %6483 = vmatmul.mubr.bf16.vlgmr.msra.gmra.mrb[168].mxu1 %v7252_v1 }
 0x6b8   :  { %6443 = vmatmul.mubr.bf16.vlgmr.msra.gmra.mrb[196].mxu0 %v7250_v63 }
 0x78a   :  { %v7527_v15 = vpop.f32.mrb[168].mxu1 }
 0x78b   :  { %v7505_v19 = vpop.f32.mrb[196].mxu0  ;;  %v7528_v3 = vpop.f32.mrb[169].mxu1 }
 0x78c   :  { %v7529_v10 = vadd.f32 %v7528_v3, %v7527_v15  ;;  %v7506_v35 = vpop.f32.mrb[197].mxu0  ;;  %v7530_v55 = vpop.f32.mrb[170].mxu1 }
 0x78d   :  { %v7507_v29 = vadd.f32 %v7506_v35, %v7505_v19  ;;  %v7508_v48 = vpop.f32.mrb[198].mxu0  ;;  %v7531_v56 = vpop.f32.mrb[171].mxu1 }
 0x78e   :  { %v7509_v58 = vpop.f32.mrb[199].mxu0 }
 0x78f   :  { %v6445_v61 = vadd.f32 %v7507_v29, %v7017_v23 }
 0x791   :  { %v6485_v5 = vadd.f32 %v7529_v10, %v6445_v61 }
 0x793   :  { %v6490_v50 = vsub.f32 0.0, %v6485_v5  ;;  %v6496_v37 = vsub.f32 %v6485_v5, %v6485_v5 }
 0x795   :  { %v6491_v7 = vmul.f32 1.442695, %v6490_v50  ;;  %v6497_v0 = vmul.f32 1.442695, %v6496_v37 }
 0x797   :  { %7966 = vpow2.f32 %v6491_v7 }
 0x798   :  { %7968 = vpow2.f32 %v6497_v0 }
 0x7a1   :  { %v7967_v39 = vpop.eup %7966 }
 0x7a2   :  { %v7969_v20 = vpop.eup %7968  ;;  %v6493_v49 = vadd.f32 1.0, %v7967_v39 }
 0x7a3   :  { %7970 = vrcp.f32 %v7969_v20 }
 0x7a4   :  { %7972 = vrcp.f32 %v6493_v49 }
 0x7ad   :  { %v7971_v53 = vpop.eup %7970 }
 0x7ae   :  { %v7973_v9 = vpop.eup %7972  ;;  %v6501_v62 = vmul.f32 %v7971_v53, %v7969_v20 }
 0x7b0   :  { %v6503_v25 = vsel %vm6502_vm14, %v7973_v9, %v6501_v62 }
 0x7b1   :  { %6505 = vst.msk [vmem:[%s11332_s11] sm:$0xff] %vm6504_vm0, %v6503_v25 }

</bundles_post_ra>
